<compile_context>
chip_gen: v6e
topology: v6e:2x2x1
jax: 0.10.0
libtpu: 0.0.40
codegen_flags: <defaults>
</compile_context>

<pallas_src>
import functools

import jax
import jax.numpy as jnp
import numpy as np
from jax import lax
from jax.experimental import pallas as pl
from jax.experimental.pallas import tpu as pltpu

LANE = 128                        # all channel widths padded to a multiple of this
_EPS = 1e-5
_VMEM_LIMIT = 48 * 1024 * 1024    # headroom below v7x's 64 MiB, above default scoped limits


def _round_up(a, b):
    return (a + b - 1) // b * b


def _pick_tile(padded_dim, candidates):
    for c in candidates:
        if padded_dim % c == 0:
            return c
    return padded_dim


# ----------------------------------------------------------------------------
# Pallas kernel: K-tiled matmul (bf16 inputs, f32 accumulation) with a fused
# epilogue: folded-BN affine + optional residual add + ReLU.
# ----------------------------------------------------------------------------
def _fused_kernel(relu, has_res, *refs):
    if has_res:
        x_ref, w_ref, s_ref, b_ref, r_ref, o_ref, acc_ref = refs
    else:
        x_ref, w_ref, s_ref, b_ref, o_ref, acc_ref = refs
        r_ref = None
    k = pl.program_id(2)

    @pl.when(k == 0)
    def _():
        acc_ref[...] = jnp.zeros_like(acc_ref)

    acc_ref[...] += jnp.dot(x_ref[...], w_ref[...],
                            preferred_element_type=jnp.float32)

    @pl.when(k == pl.num_programs(2) - 1)
    def _():
        acc = acc_ref[...] * s_ref[...] + b_ref[...]
        if has_res:
            acc = acc + r_ref[...].astype(jnp.float32)
        if relu:
            acc = jnp.maximum(acc, 0.0)
        o_ref[...] = acc.astype(o_ref.dtype)


def fused_matmul_bn(x2d, w, scale, bias, residual=None, relu=True,
                    out_dtype=jnp.bfloat16):
    """x2d: [M, K], w: [K, N], scale/bias: [N] -> [M, N] in out_dtype."""
    M, K = x2d.shape
    K2, N = w.shape
    assert K == K2, (x2d.shape, w.shape)

    # cdiv-style tiling with zero-padded edge tiles: every block stays lane /
    # sublane aligned and VMEM-bounded regardless of the real M / K / N.
    TM = 256 if M >= 256 else _round_up(M, 16)
    Mp = _round_up(M, TM)
    Kp = _round_up(K, LANE)
    TK = _pick_tile(Kp, (512, 384, 256, 128))
    Np = _round_up(N, LANE)
    TN = _pick_tile(Np, (512, 256, 128))

    def pad2(a, rows, cols):
        if a.shape == (rows, cols):
            return a
        return jnp.pad(a, ((0, rows - a.shape[0]), (0, cols - a.shape[1])))

    # bf16 operands for the MXU; accumulation stays f32 inside the kernel.
    xb = pad2(x2d.astype(jnp.bfloat16), Mp, Kp)
    wb = pad2(w.astype(jnp.bfloat16), Kp, Np)
    s2 = pad2(scale.reshape(1, -1).astype(jnp.float32), 1, Np)
    b2 = pad2(bias.reshape(1, -1).astype(jnp.float32), 1, Np)

    in_specs = [
        pl.BlockSpec((TM, TK), lambda i, j, k: (i, k)),
        pl.BlockSpec((TK, TN), lambda i, j, k: (k, j)),
        pl.BlockSpec((1, TN), lambda i, j, k: (0, j)),
        pl.BlockSpec((1, TN), lambda i, j, k: (0, j)),
    ]
    args = [xb, wb, s2, b2]
    if residual is not None:
        rb = pad2(residual.astype(jnp.bfloat16), Mp, Np)
        in_specs.append(pl.BlockSpec((TM, TN), lambda i, j, k: (i, j)))
        args.append(rb)

    kernel = functools.partial(_fused_kernel, relu, residual is not None)
    out = pl.pallas_call(
        kernel,
        out_shape=jax.ShapeDtypeStruct((Mp, Np), out_dtype),
        grid_spec=pltpu.PrefetchScalarGridSpec(
            num_scalar_prefetch=0,
            grid=(Mp // TM, Np // TN, Kp // TK),
            in_specs=in_specs,
            out_specs=pl.BlockSpec((TM, TN), lambda i, j, k: (i, j)),
            scratch_shapes=[pltpu.VMEM((TM, TN), jnp.float32)],
        ),
        compiler_params=pltpu.CompilerParams(
            dimension_semantics=("parallel", "parallel", "arbitrary"),
            vmem_limit_bytes=_VMEM_LIMIT),
    )(*args)
    if (Mp, Np) != (M, N):
        out = out[:M, :N]
    return out


# ----------------------------------------------------------------------------
# Conv wrappers (im2col / striding is glue; the matmul hot path is in Pallas)
# ----------------------------------------------------------------------------
def _im2col_3x3(x, stride):
    """x: [N,H,W,C] (bf16) -> patches [N*Ho*Wo, 9*C] (bf16), Ho, Wo (padding=1)."""
    N, H, W, C = x.shape
    xp = jnp.pad(x, ((0, 0), (1, 1), (1, 1), (0, 0)))
    Ho = (H - 1) // stride + 1
    Wo = (W - 1) // stride + 1
    cols = []
    for ky in range(3):
        for kx in range(3):
            patch = xp[:, ky:ky + (Ho - 1) * stride + 1:stride,
                          kx:kx + (Wo - 1) * stride + 1:stride, :]
            cols.append(patch)
    patches = jnp.concatenate(cols, axis=-1)          # [N,Ho,Wo,9*C] bf16
    return patches.reshape(N * Ho * Wo, 9 * C), Ho, Wo


def conv3x3_bn(x, w, scale, bias, stride=1, relu=True):
    """x: [N,H,W,Cin] bf16, w: [3,3,Cin,Cout]."""
    N = x.shape[0]
    # TODO(synk): the 9 taps are still materialized (im2col) in HBM, although in
    # bf16; an in-kernel tap accumulation over shifted index_maps of the padded
    # input would remove that activation traffic entirely.
    x2d, Ho, Wo = _im2col_3x3(x, stride)
    w2d = w.reshape(-1, w.shape[-1])                  # [9*Cin, Cout]
    y2d = fused_matmul_bn(x2d, w2d, scale, bias, relu=relu)
    return y2d.reshape(N, Ho, Wo, -1)


def conv1x1_bn(x, w, scale, bias, stride=1, relu=True, residual=None):
    """x: [N,H,W,Cin] bf16, w: [Cin,Cout]."""
    if stride > 1:
        # TODO(synk): fold the stride into the matmul BlockSpec/index_map instead
        # of materializing the strided slice (extra read+write of the bf16 map).
        x = x[:, ::stride, ::stride, :]
    N, Ho, Wo, Cin = x.shape
    x2d = x.reshape(N * Ho * Wo, Cin)
    res2d = None if residual is None else residual.reshape(N * Ho * Wo, -1)
    y2d = fused_matmul_bn(x2d, w, scale, bias, residual=res2d, relu=relu)
    return y2d.reshape(N, Ho, Wo, -1)


# ----------------------------------------------------------------------------
# Parameter init (deterministic; channels padded to LANE once; eval-mode BN fold)
# ----------------------------------------------------------------------------
def _bn_fold(c):
    gamma = jnp.ones((c,), jnp.float32)
    beta = jnp.zeros((c,), jnp.float32)
    mean = jnp.zeros((c,), jnp.float32)
    var = jnp.ones((c,), jnp.float32)
    scale = gamma / jnp.sqrt(var + _EPS)
    bias = beta - mean * scale
    return scale, bias


def _he_normal(key, shape, fan_in):
    return jax.random.normal(key, shape, jnp.float32) * np.sqrt(2.0 / fan_in)


def _pad_to(a, shape):
    pads = [(0, t - s) for s, t in zip(a.shape, shape)]
    return jnp.pad(a, pads)


def init_resblock(key, cin, cout, stride):
    cmid = cout // 4
    cin_p, cmid_p, cout_p = (_round_up(c, LANE) for c in (cin, cmid, cout))
    ks = jax.random.split(key, 4)
    p = {"stride": stride}
    p["w1"] = _pad_to(_he_normal(ks[0], (cin, cmid), cin), (cin_p, cmid_p))
    p["s1"], p["b1"] = _bn_fold(cmid_p)
    p["w2"] = _pad_to(_he_normal(ks[1], (3, 3, cmid, cmid), 9 * cmid),
                      (3, 3, cmid_p, cmid_p))
    p["s2"], p["b2"] = _bn_fold(cmid_p)
    p["w3"] = _pad_to(_he_normal(ks[2], (cmid, cout), cmid), (cmid_p, cout_p))
    p["s3"], p["b3"] = _bn_fold(cout_p)
    if stride != 1 or cin != cout:          # decided on the *original* widths
        p["sc_w"] = _pad_to(_he_normal(ks[3], (cin, cout), cin), (cin_p, cout_p))
        p["sc_s"], p["sc_b"] = _bn_fold(cout_p)
    return p


def init_resnet(key, input_channel, num_blocks, channels):
    keys = jax.random.split(key, 1 + sum(num_blocks))
    cin_p = _round_up(input_channel, LANE)
    c0_p = _round_up(channels[0], LANE)
    params = {"stem": {}, "layers": [],
              "in_channels": input_channel, "in_channels_pad": cin_p,
              "out_channels": channels[-1]}
    params["stem"]["w"] = _pad_to(
        _he_normal(keys[0], (3, 3, input_channel, channels[0]), 9 * input_channel),
        (3, 3, cin_p, c0_p))
    params["stem"]["s"], params["stem"]["b"] = _bn_fold(c0_p)
    ki = 1
    cin = channels[0]
    for li, nb in enumerate(num_blocks):
        cout = channels[li]
        strides = [2] + [1] * (nb - 1)
        layer = []
        for s in strides:
            layer.append(init_resblock(keys[ki], cin, cout, s))
            ki += 1
            cin = cout
        params["layers"].append(layer)
    return params


# ----------------------------------------------------------------------------
# Forward pass (Pallas)
# ----------------------------------------------------------------------------
def res_block_fwd(x, p):
    stride = p["stride"]
    h = conv1x1_bn(x, p["w1"], p["s1"], p["b1"], stride=1, relu=True)
    h = conv3x3_bn(h, p["w2"], p["s2"], p["b2"], stride=stride, relu=True)
    if "sc_w" in p:
        sc = conv1x1_bn(x, p["sc_w"], p["sc_s"], p["sc_b"], stride=stride, relu=False)
    else:
        sc = x
    # conv3 + BN + residual-add + ReLU fused in one kernel epilogue
    return conv1x1_bn(h, p["w3"], p["s3"], p["b3"], stride=1, relu=True, residual=sc)


def resnet50_forward(x_nchw, params):
    # layout: accept NCHW (PyTorch convention), compute in padded NHWC bf16,
    # return NCHW f32 with the real channel count.
    x = jnp.transpose(x_nchw, (0, 2, 3, 1)).astype(jnp.bfloat16)
    cpad = params["in_channels_pad"] - params["in_channels"]
    if cpad:
        x = jnp.pad(x, ((0, 0), (0, 0), (0, 0), (0, cpad)))
    st = params["stem"]
    x = conv3x3_bn(x, st["w"], st["s"], st["b"], stride=1, relu=True)
    for layer in params["layers"]:
        for blk in layer:
            x = res_block_fwd(x, blk)
    x = x[..., :params["out_channels"]]
    return jnp.transpose(x, (0, 3, 1, 2)).astype(jnp.float32)


# ----------------------------------------------------------------------------
# Pure-JAX reference with matching numerics (bf16 conv inputs, f32 accumulation,
# bf16 inter-layer activations) for the correctness check.
# ----------------------------------------------------------------------------
def _ref_conv(x, w, stride, pad):
    return lax.conv_general_dilated(
        x.astype(jnp.bfloat16), w.astype(jnp.bfloat16),
        (stride, stride), [(pad, pad), (pad, pad)],
        dimension_numbers=("NHWC", "HWIO", "NHWC"),
        preferred_element_type=jnp.float32)


def _ref_block(x, p):
    s = p["stride"]
    h = jnp.maximum(_ref_conv(x, p["w1"][None, None], 1, 0) * p["s1"] + p["b1"], 0.0)
    h = h.astype(jnp.bfloat16)
    h = jnp.maximum(_ref_conv(h, p["w2"], s, 1) * p["s2"] + p["b2"], 0.0)
    h = h.astype(jnp.bfloat16)
    if "sc_w" in p:
        sc = (_ref_conv(x, p["sc_w"][None, None], s, 0) * p["sc_s"] + p["sc_b"])
        sc = sc.astype(jnp.bfloat16)
    else:
        sc = x
    h = _ref_conv(h, p["w3"][None, None], 1, 0) * p["s3"] + p["b3"]
    return jnp.maximum(h + sc.astype(jnp.float32), 0.0).astype(jnp.bfloat16)


def resnet50_reference(x_nchw, params):
    x = jnp.transpose(x_nchw, (0, 2, 3, 1)).astype(jnp.bfloat16)
    cpad = params["in_channels_pad"] - params["in_channels"]
    if cpad:
        x = jnp.pad(x, ((0, 0), (0, 0), (0, 0), (0, cpad)))
    st = params["stem"]
    x = jnp.maximum(_ref_conv(x, st["w"], 1, 1) * st["s"] + st["b"], 0.0)
    x = x.astype(jnp.bfloat16)
    for layer in params["layers"]:
        for blk in layer:
            x = _ref_block(x, blk)
    x = x[..., :params["out_channels"]]
    return jnp.transpose(x, (0, 3, 1, 2)).astype(jnp.float32)


# ----------------------------------------------------------------------------
if __name__ == "__main__":
    # Small-but-faithful config: same architecture, reduced widths/depths.
    input_channel = 3
    num_blocks = [2, 2, 2, 2]
    channels = [16, 32, 64, 128]

    key = jax.random.PRNGKey(0)
    k_par, k_in = jax.random.split(key)
    params = init_resnet(k_par, input_channel, num_blocks, channels)

    x = jax.random.normal(k_in, (2, input_channel, 16, 16), jnp.float32)  # NCHW

    fwd = jax.jit(lambda inp: resnet50_forward(inp, params))
    out = jax.block_until_ready(fwd(x))

    # Expected output: 4 stride-2 stages: 16 -> 8 -> 4 -> 2 -> 1
    assert out.shape == (2, channels[-1], 1, 1), out.shape
    assert bool(jnp.all(jnp.isfinite(out)))

    ref_fn = jax.jit(lambda inp: resnet50_reference(inp, params))
    ref = jax.block_until_ready(ref_fn(x))
    err = float(jnp.max(jnp.abs(out - ref)) / (jnp.max(jnp.abs(ref)) + 1e-6))
    assert err < 1e-2, f"mismatch vs reference, rel err={err}"

    print("KERNEL_OK")
</pallas_src>

<mosaic_0001>
module attributes {stable_mosaic.version = 11 : i64} {
  func.func @_fused_kernel(%arg0: i32, %arg1: i32, %arg2: i32, %arg3: memref<256x384xbf16, #tpu.memory_space<vmem>>, %arg4: memref<384x128xbf16, #tpu.memory_space<vmem>>, %arg5: memref<1x128xf32, #tpu.memory_space<vmem>>, %arg6: memref<1x128xf32, #tpu.memory_space<vmem>>, %arg7: memref<256x128xbf16, #tpu.memory_space<vmem>>, %arg8: memref<256x128xf32, #tpu.memory_space<vmem>>) attributes {dimension_semantics = [#tpu.dimension_semantics<parallel>, #tpu.dimension_semantics<parallel>, #tpu.dimension_semantics<arbitrary>], iteration_bounds = array<i64: 2, 1, 3>, scalar_prefetch = 0 : i64, scratch_operands = 1 : i64, tpu.core_type = #tpu.core_type<tc>, window_params = [{transform_indices = @transform_0, window_bounds = array<i64: 256, 384>}, {transform_indices = @transform_1, window_bounds = array<i64: 384, 128>}, {transform_indices = @transform_2, window_bounds = array<i64: 1, 128>}, {transform_indices = @transform_3, window_bounds = array<i64: 1, 128>}, {transform_indices = @transform_4, window_bounds = array<i64: 256, 128>}]} {
    %c0_i32 = arith.constant 0 : i32
    %0 = arith.cmpi eq, %arg2, %c0_i32 : i32
    %1 = arith.extui %0 : i1 to i32
    %c0_i32_0 = arith.constant 0 : i32
    %2 = arith.cmpi ne, %1, %c0_i32_0 : i32
    scf.if %2 {
      %cst_9 = arith.constant 0.000000e+00 : f32
      %12 = vector.broadcast %cst_9 : f32 to vector<256x128xf32>
      %c0_10 = arith.constant 0 : index
      %c0_11 = arith.constant 0 : index
      %13 = vector.load %arg8[%c0_10, %c0_11] : memref<256x128xf32, #tpu.memory_space<vmem>>, vector<256x128xf32>
      tpu.vector_store %arg8[%c0_10, %c0_11], %12 {strides = array<i32>} : memref<256x128xf32, #tpu.memory_space<vmem>>, vector<256x128xf32>,
    } else {
    }
    %c0 = arith.constant 0 : index
    %c0_1 = arith.constant 0 : index
    %3 = vector.load %arg8[%c0, %c0_1] : memref<256x128xf32, #tpu.memory_space<vmem>>, vector<256x128xf32>
    %c0_2 = arith.constant 0 : index
    %c0_3 = arith.constant 0 : index
    %4 = vector.load %arg3[%c0_2, %c0_3] : memref<256x384xbf16, #tpu.memory_space<vmem>>, vector<256x384xbf16>
    %c0_4 = arith.constant 0 : index
    %c0_5 = arith.constant 0 : index
    %5 = vector.load %arg4[%c0_4, %c0_5] : memref<384x128xbf16, #tpu.memory_space<vmem>>, vector<384x128xbf16>
    %cst = arith.constant dense<0.000000e+00> : vector<256x128xf32>
    %6 = tpu.matmul %4, %5, %cst {dimension_numbers = #tpu.dot_dimension_numbers<[1], [0], [0], [1], [0, 0, 1, 1], [], []>} : vector<256x384xbf16>, vector<384x128xbf16>, vector<256x128xf32> -> vector<256x128xf32>
    %7 = arith.addf %3, %6 : vector<256x128xf32>
    %c0_6 = arith.constant 0 : index
    %c0_7 = arith.constant 0 : index
    %8 = vector.load %arg8[%c0_6, %c0_7] : memref<256x128xf32, #tpu.memory_space<vmem>>, vector<256x128xf32>
    tpu.vector_store %arg8[%c0_6, %c0_7], %7 {strides = array<i32>} : memref<256x128xf32, #tpu.memory_space<vmem>>, vector<256x128xf32>,
    %c2_i32 = arith.constant 2 : i32
    %9 = arith.cmpi eq, %arg2, %c2_i32 : i32
    %10 = arith.extui %9 : i1 to i32
    %c0_i32_8 = arith.constant 0 : i32
    %11 = arith.cmpi ne, %10, %c0_i32_8 : i32
    scf.if %11 {
      %c0_9 = arith.constant 0 : index
      %c0_10 = arith.constant 0 : index
      %12 = vector.load %arg8[%c0_9, %c0_10] : memref<256x128xf32, #tpu.memory_space<vmem>>, vector<256x128xf32>
      %c0_11 = arith.constant 0 : index
      %c0_12 = arith.constant 0 : index
      %13 = vector.load %arg5[%c0_11, %c0_12] : memref<1x128xf32, #tpu.memory_space<vmem>>, vector<1x128xf32>
      %14 = vector.broadcast %13 : vector<1x128xf32> to vector<256x128xf32>
      %15 = arith.mulf %12, %14 : vector<256x128xf32>
      %c0_13 = arith.constant 0 : index
      %c0_14 = arith.constant 0 : index
      %16 = vector.load %arg6[%c0_13, %c0_14] : memref<1x128xf32, #tpu.memory_space<vmem>>, vector<1x128xf32>
      %17 = vector.broadcast %16 : vector<1x128xf32> to vector<256x128xf32>
      %18 = arith.addf %15, %17 : vector<256x128xf32>
      %cst_15 = arith.constant 0.000000e+00 : f32
      %19 = vector.broadcast %cst_15 : f32 to vector<256x128xf32>
      %20 = arith.maximumf %18, %19 : vector<256x128xf32>
      %21 = arith.truncf %20 : vector<256x128xf32> to vector<256x128xbf16>
      %c0_16 = arith.constant 0 : index
      %c0_17 = arith.constant 0 : index
      %22 = vector.load %arg7[%c0_16, %c0_17] : memref<256x128xbf16, #tpu.memory_space<vmem>>, vector<256x128xbf16>
      tpu.vector_store %arg7[%c0_16, %c0_17], %21 {strides = array<i32>} : memref<256x128xbf16, #tpu.memory_space<vmem>>, vector<256x128xbf16>,
    } else {
    }
    return
  }
  func.func @transform_0(%arg0: i32, %arg1: i32, %arg2: i32) -> (i32, i32) {
    %c0_i32 = arith.constant 0 : i32
    return %arg0, %arg2 : i32, i32
  }
  func.func @transform_1(%arg0: i32, %arg1: i32, %arg2: i32) -> (i32, i32) {
    %c0_i32 = arith.constant 0 : i32
    return %arg2, %arg1 : i32, i32
  }
  func.func @transform_2(%arg0: i32, %arg1: i32, %arg2: i32) -> (i32, i32) {
    %c0_i32 = arith.constant 0 : i32
    %c0_i32_0 = arith.constant 0 : i32
    return %c0_i32, %arg1 : i32, i32
  }
  func.func @transform_3(%arg0: i32, %arg1: i32, %arg2: i32) -> (i32, i32) {
    %c0_i32 = arith.constant 0 : i32
    %c0_i32_0 = arith.constant 0 : i32
    return %c0_i32, %arg1 : i32, i32
  }
  func.func @transform_4(%arg0: i32, %arg1: i32, %arg2: i32) -> (i32, i32) {
    %c0_i32 = arith.constant 0 : i32
    return %arg0, %arg1 : i32, i32
  }
}

module attributes {stable_mosaic.version = 11 : i64} {
  func.func @_fused_kernel(%arg0: i32, %arg1: i32, %arg2: i32, %arg3: memref<128x128xbf16, #tpu.memory_space<vmem>>, %arg4: memref<128x128xbf16, #tpu.memory_space<vmem>>, %arg5: memref<1x128xf32, #tpu.memory_space<vmem>>, %arg6: memref<1x128xf32, #tpu.memory_space<vmem>>, %arg7: memref<128x128xbf16, #tpu.memory_space<vmem>>, %arg8: memref<128x128xf32, #tpu.memory_space<vmem>>) attributes {dimension_semantics = [#tpu.dimension_semantics<parallel>, #tpu.dimension_semantics<parallel>, #tpu.dimension_semantics<arbitrary>], iteration_bounds = array<i64: 1, 1, 1>, scalar_prefetch = 0 : i64, scratch_operands = 1 : i64, tpu.core_type = #tpu.core_type<tc>, window_params = [{transform_indices = @transform_0, window_bounds = array<i64: 128, 128>}, {transform_indices = @transform_1, window_bounds = array<i64: 128, 128>}, {transform_indices = @transform_2, window_bounds = array<i64: 1, 128>}, {transform_indices = @transform_3, window_bounds = array<i64: 1, 128>}, {transform_indices = @transform_4, window_bounds = array<i64: 128, 128>}]} {
    %c0_i32 = arith.constant 0 : i32
    %0 = arith.cmpi eq, %arg2, %c0_i32 : i32
    %1 = arith.extui %0 : i1 to i32
    %c0_i32_0 = arith.constant 0 : i32
    %2 = arith.cmpi ne, %1, %c0_i32_0 : i32
    scf.if %2 {
      %cst_10 = arith.constant 0.000000e+00 : f32
      %12 = vector.broadcast %cst_10 : f32 to vector<128x128xf32>
      %c0_11 = arith.constant 0 : index
      %c0_12 = arith.constant 0 : index
      %13 = vector.load %arg8[%c0_11, %c0_12] : memref<128x128xf32, #tpu.memory_space<vmem>>, vector<128x128xf32>
      tpu.vector_store %arg8[%c0_11, %c0_12], %12 {strides = array<i32>} : memref<128x128xf32, #tpu.memory_space<vmem>>, vector<128x128xf32>,
    } else {
    }
    %c0 = arith.constant 0 : index
    %c0_1 = arith.constant 0 : index
    %3 = vector.load %arg8[%c0, %c0_1] : memref<128x128xf32, #tpu.memory_space<vmem>>, vector<128x128xf32>
    %c0_2 = arith.constant 0 : index
    %c0_3 = arith.constant 0 : index
    %4 = vector.load %arg3[%c0_2, %c0_3] : memref<128x128xbf16, #tpu.memory_space<vmem>>, vector<128x128xbf16>
    %c0_4 = arith.constant 0 : index
    %c0_5 = arith.constant 0 : index
    %5 = vector.load %arg4[%c0_4, %c0_5] : memref<128x128xbf16, #tpu.memory_space<vmem>>, vector<128x128xbf16>
    %cst = arith.constant dense<0.000000e+00> : vector<128x128xf32>
    %6 = tpu.matmul %4, %5, %cst {dimension_numbers = #tpu.dot_dimension_numbers<[1], [0], [0], [1], [0, 0, 1, 1], [], []>} : vector<128x128xbf16>, vector<128x128xbf16>, vector<128x128xf32> -> vector<128x128xf32>
    %7 = arith.addf %3, %6 : vector<128x128xf32>
    %c0_6 = arith.constant 0 : index
    %c0_7 = arith.constant 0 : index
    %8 = vector.load %arg8[%c0_6, %c0_7] : memref<128x128xf32, #tpu.memory_space<vmem>>, vector<128x128xf32>
    tpu.vector_store %arg8[%c0_6, %c0_7], %7 {strides = array<i32>} : memref<128x128xf32, #tpu.memory_space<vmem>>, vector<128x128xf32>,
    %c0_i32_8 = arith.constant 0 : i32
    %9 = arith.cmpi eq, %arg2, %c0_i32_8 : i32
    %10 = arith.extui %9 : i1 to i32
    %c0_i32_9 = arith.constant 0 : i32
    %11 = arith.cmpi ne, %10, %c0_i32_9 : i32
    scf.if %11 {
      %c0_10 = arith.constant 0 : index
      %c0_11 = arith.constant 0 : index
      %12 = vector.load %arg8[%c0_10, %c0_11] : memref<128x128xf32, #tpu.memory_space<vmem>>, vector<128x128xf32>
      %c0_12 = arith.constant 0 : index
      %c0_13 = arith.constant 0 : index
      %13 = vector.load %arg5[%c0_12, %c0_13] : memref<1x128xf32, #tpu.memory_space<vmem>>, vector<1x128xf32>
      %14 = vector.broadcast %13 : vector<1x128xf32> to vector<128x128xf32>
      %15 = arith.mulf %12, %14 : vector<128x128xf32>
      %c0_14 = arith.constant 0 : index
      %c0_15 = arith.constant 0 : index
      %16 = vector.load %arg6[%c0_14, %c0_15] : memref<1x128xf32, #tpu.memory_space<vmem>>, vector<1x128xf32>
      %17 = vector.broadcast %16 : vector<1x128xf32> to vector<128x128xf32>
      %18 = arith.addf %15, %17 : vector<128x128xf32>
      %19 = arith.truncf %18 : vector<128x128xf32> to vector<128x128xbf16>
      %c0_16 = arith.constant 0 : index
      %c0_17 = arith.constant 0 : index
      %20 = vector.load %arg7[%c0_16, %c0_17] : memref<128x128xbf16, #tpu.memory_space<vmem>>, vector<128x128xbf16>
      tpu.vector_store %arg7[%c0_16, %c0_17], %19 {strides = array<i32>} : memref<128x128xbf16, #tpu.memory_space<vmem>>, vector<128x128xbf16>,
    } else {
    }
    return
  }
  func.func @transform_0(%arg0: i32, %arg1: i32, %arg2: i32) -> (i32, i32) {
    %c0_i32 = arith.constant 0 : i32
    return %arg0, %arg2 : i32, i32
  }
  func.func @transform_1(%arg0: i32, %arg1: i32, %arg2: i32) -> (i32, i32) {
    %c0_i32 = arith.constant 0 : i32
    return %arg2, %arg1 : i32, i32
  }
  func.func @transform_2(%arg0: i32, %arg1: i32, %arg2: i32) -> (i32, i32) {
    %c0_i32 = arith.constant 0 : i32
    %c0_i32_0 = arith.constant 0 : i32
    return %c0_i32, %arg1 : i32, i32
  }
  func.func @transform_3(%arg0: i32, %arg1: i32, %arg2: i32) -> (i32, i32) {
    %c0_i32 = arith.constant 0 : i32
    %c0_i32_0 = arith.constant 0 : i32
    return %c0_i32, %arg1 : i32, i32
  }
  func.func @transform_4(%arg0: i32, %arg1: i32, %arg2: i32) -> (i32, i32) {
    %c0_i32 = arith.constant 0 : i32
    return %arg0, %arg1 : i32, i32
  }
}

module attributes {stable_mosaic.version = 11 : i64} {
  func.func @_fused_kernel(%arg0: i32, %arg1: i32, %arg2: i32, %arg3: memref<256x128xbf16, #tpu.memory_space<vmem>>, %arg4: memref<128x128xbf16, #tpu.memory_space<vmem>>, %arg5: memref<1x128xf32, #tpu.memory_space<vmem>>, %arg6: memref<1x128xf32, #tpu.memory_space<vmem>>, %arg7: memref<256x128xbf16, #tpu.memory_space<vmem>>, %arg8: memref<256x128xf32, #tpu.memory_space<vmem>>) attributes {dimension_semantics = [#tpu.dimension_semantics<parallel>, #tpu.dimension_semantics<parallel>, #tpu.dimension_semantics<arbitrary>], iteration_bounds = array<i64: 2, 1, 1>, scalar_prefetch = 0 : i64, scratch_operands = 1 : i64, tpu.core_type = #tpu.core_type<tc>, window_params = [{transform_indices = @transform_0, window_bounds = array<i64: 256, 128>}, {transform_indices = @transform_1, window_bounds = array<i64: 128, 128>}, {transform_indices = @transform_2, window_bounds = array<i64: 1, 128>}, {transform_indices = @transform_3, window_bounds = array<i64: 1, 128>}, {transform_indices = @transform_4, window_bounds = array<i64: 256, 128>}]} {
    %c0_i32 = arith.constant 0 : i32
    %0 = arith.cmpi eq, %arg2, %c0_i32 : i32
    %1 = arith.extui %0 : i1 to i32
    %c0_i32_0 = arith.constant 0 : i32
    %2 = arith.cmpi ne, %1, %c0_i32_0 : i32
    scf.if %2 {
      %cst_10 = arith.constant 0.000000e+00 : f32
      %12 = vector.broadcast %cst_10 : f32 to vector<256x128xf32>
      %c0_11 = arith.constant 0 : index
      %c0_12 = arith.constant 0 : index
      %13 = vector.load %arg8[%c0_11, %c0_12] : memref<256x128xf32, #tpu.memory_space<vmem>>, vector<256x128xf32>
      tpu.vector_store %arg8[%c0_11, %c0_12], %12 {strides = array<i32>} : memref<256x128xf32, #tpu.memory_space<vmem>>, vector<256x128xf32>,
    } else {
    }
    %c0 = arith.constant 0 : index
    %c0_1 = arith.constant 0 : index
    %3 = vector.load %arg8[%c0, %c0_1] : memref<256x128xf32, #tpu.memory_space<vmem>>, vector<256x128xf32>
    %c0_2 = arith.constant 0 : index
    %c0_3 = arith.constant 0 : index
    %4 = vector.load %arg3[%c0_2, %c0_3] : memref<256x128xbf16, #tpu.memory_space<vmem>>, vector<256x128xbf16>
    %c0_4 = arith.constant 0 : index
    %c0_5 = arith.constant 0 : index
    %5 = vector.load %arg4[%c0_4, %c0_5] : memref<128x128xbf16, #tpu.memory_space<vmem>>, vector<128x128xbf16>
    %cst = arith.constant dense<0.000000e+00> : vector<256x128xf32>
    %6 = tpu.matmul %4, %5, %cst {dimension_numbers = #tpu.dot_dimension_numbers<[1], [0], [0], [1], [0, 0, 1, 1], [], []>} : vector<256x128xbf16>, vector<128x128xbf16>, vector<256x128xf32> -> vector<256x128xf32>
    %7 = arith.addf %3, %6 : vector<256x128xf32>
    %c0_6 = arith.constant 0 : index
    %c0_7 = arith.constant 0 : index
    %8 = vector.load %arg8[%c0_6, %c0_7] : memref<256x128xf32, #tpu.memory_space<vmem>>, vector<256x128xf32>
    tpu.vector_store %arg8[%c0_6, %c0_7], %7 {strides = array<i32>} : memref<256x128xf32, #tpu.memory_space<vmem>>, vector<256x128xf32>,
    %c0_i32_8 = arith.constant 0 : i32
    %9 = arith.cmpi eq, %arg2, %c0_i32_8 : i32
    %10 = arith.extui %9 : i1 to i32
    %c0_i32_9 = arith.constant 0 : i32
    %11 = arith.cmpi ne, %10, %c0_i32_9 : i32
    scf.if %11 {
      %c0_10 = arith.constant 0 : index
      %c0_11 = arith.constant 0 : index
      %12 = vector.load %arg8[%c0_10, %c0_11] : memref<256x128xf32, #tpu.memory_space<vmem>>, vector<256x128xf32>
      %c0_12 = arith.constant 0 : index
      %c0_13 = arith.constant 0 : index
      %13 = vector.load %arg5[%c0_12, %c0_13] : memref<1x128xf32, #tpu.memory_space<vmem>>, vector<1x128xf32>
      %14 = vector.broadcast %13 : vector<1x128xf32> to vector<256x128xf32>
      %15 = arith.mulf %12, %14 : vector<256x128xf32>
      %c0_14 = arith.constant 0 : index
      %c0_15 = arith.constant 0 : index
      %16 = vector.load %arg6[%c0_14, %c0_15] : memref<1x128xf32, #tpu.memory_space<vmem>>, vector<1x128xf32>
      %17 = vector.broadcast %16 : vector<1x128xf32> to vector<256x128xf32>
      %18 = arith.addf %15, %17 : vector<256x128xf32>
      %cst_16 = arith.constant 0.000000e+00 : f32
      %19 = vector.broadcast %cst_16 : f32 to vector<256x128xf32>
      %20 = arith.maximumf %18, %19 : vector<256x128xf32>
      %21 = arith.truncf %20 : vector<256x128xf32> to vector<256x128xbf16>
      %c0_17 = arith.constant 0 : index
      %c0_18 = arith.constant 0 : index
      %22 = vector.load %arg7[%c0_17, %c0_18] : memref<256x128xbf16, #tpu.memory_space<vmem>>, vector<256x128xbf16>
      tpu.vector_store %arg7[%c0_17, %c0_18], %21 {strides = array<i32>} : memref<256x128xbf16, #tpu.memory_space<vmem>>, vector<256x128xbf16>,
    } else {
    }
    return
  }
  func.func @transform_0(%arg0: i32, %arg1: i32, %arg2: i32) -> (i32, i32) {
    %c0_i32 = arith.constant 0 : i32
    return %arg0, %arg2 : i32, i32
  }
  func.func @transform_1(%arg0: i32, %arg1: i32, %arg2: i32) -> (i32, i32) {
    %c0_i32 = arith.constant 0 : i32
    return %arg2, %arg1 : i32, i32
  }
  func.func @transform_2(%arg0: i32, %arg1: i32, %arg2: i32) -> (i32, i32) {
    %c0_i32 = arith.constant 0 : i32
    %c0_i32_0 = arith.constant 0 : i32
    return %c0_i32, %arg1 : i32, i32
  }
  func.func @transform_3(%arg0: i32, %arg1: i32, %arg2: i32) -> (i32, i32) {
    %c0_i32 = arith.constant 0 : i32
    %c0_i32_0 = arith.constant 0 : i32
    return %c0_i32, %arg1 : i32, i32
  }
  func.func @transform_4(%arg0: i32, %arg1: i32, %arg2: i32) -> (i32, i32) {
    %c0_i32 = arith.constant 0 : i32
    return %arg0, %arg1 : i32, i32
  }
}

module attributes {stable_mosaic.version = 11 : i64} {
  func.func @_fused_kernel(%arg0: i32, %arg1: i32, %arg2: i32, %arg3: memref<128x384xbf16, #tpu.memory_space<vmem>>, %arg4: memref<384x128xbf16, #tpu.memory_space<vmem>>, %arg5: memref<1x128xf32, #tpu.memory_space<vmem>>, %arg6: memref<1x128xf32, #tpu.memory_space<vmem>>, %arg7: memref<128x128xbf16, #tpu.memory_space<vmem>>, %arg8: memref<128x128xf32, #tpu.memory_space<vmem>>) attributes {dimension_semantics = [#tpu.dimension_semantics<parallel>, #tpu.dimension_semantics<parallel>, #tpu.dimension_semantics<arbitrary>], iteration_bounds = array<i64: 1, 1, 3>, scalar_prefetch = 0 : i64, scratch_operands = 1 : i64, tpu.core_type = #tpu.core_type<tc>, window_params = [{transform_indices = @transform_0, window_bounds = array<i64: 128, 384>}, {transform_indices = @transform_1, window_bounds = array<i64: 384, 128>}, {transform_indices = @transform_2, window_bounds = array<i64: 1, 128>}, {transform_indices = @transform_3, window_bounds = array<i64: 1, 128>}, {transform_indices = @transform_4, window_bounds = array<i64: 128, 128>}]} {
    %c0_i32 = arith.constant 0 : i32
    %0 = arith.cmpi eq, %arg2, %c0_i32 : i32
    %1 = arith.extui %0 : i1 to i32
    %c0_i32_0 = arith.constant 0 : i32
    %2 = arith.cmpi ne, %1, %c0_i32_0 : i32
    scf.if %2 {
      %cst_9 = arith.constant 0.000000e+00 : f32
      %12 = vector.broadcast %cst_9 : f32 to vector<128x128xf32>
      %c0_10 = arith.constant 0 : index
      %c0_11 = arith.constant 0 : index
      %13 = vector.load %arg8[%c0_10, %c0_11] : memref<128x128xf32, #tpu.memory_space<vmem>>, vector<128x128xf32>
      tpu.vector_store %arg8[%c0_10, %c0_11], %12 {strides = array<i32>} : memref<128x128xf32, #tpu.memory_space<vmem>>, vector<128x128xf32>,
    } else {
    }
    %c0 = arith.constant 0 : index
    %c0_1 = arith.constant 0 : index
    %3 = vector.load %arg8[%c0, %c0_1] : memref<128x128xf32, #tpu.memory_space<vmem>>, vector<128x128xf32>
    %c0_2 = arith.constant 0 : index
    %c0_3 = arith.constant 0 : index
    %4 = vector.load %arg3[%c0_2, %c0_3] : memref<128x384xbf16, #tpu.memory_space<vmem>>, vector<128x384xbf16>
    %c0_4 = arith.constant 0 : index
    %c0_5 = arith.constant 0 : index
    %5 = vector.load %arg4[%c0_4, %c0_5] : memref<384x128xbf16, #tpu.memory_space<vmem>>, vector<384x128xbf16>
    %cst = arith.constant dense<0.000000e+00> : vector<128x128xf32>
    %6 = tpu.matmul %4, %5, %cst {dimension_numbers = #tpu.dot_dimension_numbers<[1], [0], [0], [1], [0, 0, 1, 1], [], []>} : vector<128x384xbf16>, vector<384x128xbf16>, vector<128x128xf32> -> vector<128x128xf32>
    %7 = arith.addf %3, %6 : vector<128x128xf32>
    %c0_6 = arith.constant 0 : index
    %c0_7 = arith.constant 0 : index
    %8 = vector.load %arg8[%c0_6, %c0_7] : memref<128x128xf32, #tpu.memory_space<vmem>>, vector<128x128xf32>
    tpu.vector_store %arg8[%c0_6, %c0_7], %7 {strides = array<i32>} : memref<128x128xf32, #tpu.memory_space<vmem>>, vector<128x128xf32>,
    %c2_i32 = arith.constant 2 : i32
    %9 = arith.cmpi eq, %arg2, %c2_i32 : i32
    %10 = arith.extui %9 : i1 to i32
    %c0_i32_8 = arith.constant 0 : i32
    %11 = arith.cmpi ne, %10, %c0_i32_8 : i32
    scf.if %11 {
      %c0_9 = arith.constant 0 : index
      %c0_10 = arith.constant 0 : index
      %12 = vector.load %arg8[%c0_9, %c0_10] : memref<128x128xf32, #tpu.memory_space<vmem>>, vector<128x128xf32>
      %c0_11 = arith.constant 0 : index
      %c0_12 = arith.constant 0 : index
      %13 = vector.load %arg5[%c0_11, %c0_12] : memref<1x128xf32, #tpu.memory_space<vmem>>, vector<1x128xf32>
      %14 = vector.broadcast %13 : vector<1x128xf32> to vector<128x128xf32>
      %15 = arith.mulf %12, %14 : vector<128x128xf32>
      %c0_13 = arith.constant 0 : index
      %c0_14 = arith.constant 0 : index
      %16 = vector.load %arg6[%c0_13, %c0_14] : memref<1x128xf32, #tpu.memory_space<vmem>>, vector<1x128xf32>
      %17 = vector.broadcast %16 : vector<1x128xf32> to vector<128x128xf32>
      %18 = arith.addf %15, %17 : vector<128x128xf32>
      %cst_15 = arith.constant 0.000000e+00 : f32
      %19 = vector.broadcast %cst_15 : f32 to vector<128x128xf32>
      %20 = arith.maximumf %18, %19 : vector<128x128xf32>
      %21 = arith.truncf %20 : vector<128x128xf32> to vector<128x128xbf16>
      %c0_16 = arith.constant 0 : index
      %c0_17 = arith.constant 0 : index
      %22 = vector.load %arg7[%c0_16, %c0_17] : memref<128x128xbf16, #tpu.memory_space<vmem>>, vector<128x128xbf16>
      tpu.vector_store %arg7[%c0_16, %c0_17], %21 {strides = array<i32>} : memref<128x128xbf16, #tpu.memory_space<vmem>>, vector<128x128xbf16>,
    } else {
    }
    return
  }
  func.func @transform_0(%arg0: i32, %arg1: i32, %arg2: i32) -> (i32, i32) {
    %c0_i32 = arith.constant 0 : i32
    return %arg0, %arg2 : i32, i32
  }
  func.func @transform_1(%arg0: i32, %arg1: i32, %arg2: i32) -> (i32, i32) {
    %c0_i32 = arith.constant 0 : i32
    return %arg2, %arg1 : i32, i32
  }
  func.func @transform_2(%arg0: i32, %arg1: i32, %arg2: i32) -> (i32, i32) {
    %c0_i32 = arith.constant 0 : i32
    %c0_i32_0 = arith.constant 0 : i32
    return %c0_i32, %arg1 : i32, i32
  }
  func.func @transform_3(%arg0: i32, %arg1: i32, %arg2: i32) -> (i32, i32) {
    %c0_i32 = arith.constant 0 : i32
    %c0_i32_0 = arith.constant 0 : i32
    return %c0_i32, %arg1 : i32, i32
  }
  func.func @transform_4(%arg0: i32, %arg1: i32, %arg2: i32) -> (i32, i32) {
    %c0_i32 = arith.constant 0 : i32
    return %arg0, %arg1 : i32, i32
  }
}

module attributes {stable_mosaic.version = 11 : i64} {
  func.func @_fused_kernel(%arg0: i32, %arg1: i32, %arg2: i32, %arg3: memref<128x128xbf16, #tpu.memory_space<vmem>>, %arg4: memref<128x128xbf16, #tpu.memory_space<vmem>>, %arg5: memref<1x128xf32, #tpu.memory_space<vmem>>, %arg6: memref<1x128xf32, #tpu.memory_space<vmem>>, %arg7: memref<128x128xbf16, #tpu.memory_space<vmem>>, %arg8: memref<128x128xbf16, #tpu.memory_space<vmem>>, %arg9: memref<128x128xf32, #tpu.memory_space<vmem>>) attributes {dimension_semantics = [#tpu.dimension_semantics<parallel>, #tpu.dimension_semantics<parallel>, #tpu.dimension_semantics<arbitrary>], iteration_bounds = array<i64: 1, 1, 1>, scalar_prefetch = 0 : i64, scratch_operands = 1 : i64, tpu.core_type = #tpu.core_type<tc>, window_params = [{transform_indices = @transform_0, window_bounds = array<i64: 128, 128>}, {transform_indices = @transform_1, window_bounds = array<i64: 128, 128>}, {transform_indices = @transform_2, window_bounds = array<i64: 1, 128>}, {transform_indices = @transform_3, window_bounds = array<i64: 1, 128>}, {transform_indices = @transform_4, window_bounds = array<i64: 128, 128>}, {transform_indices = @transform_5, window_bounds = array<i64: 128, 128>}]} {
    %c0_i32 = arith.constant 0 : i32
    %0 = arith.cmpi eq, %arg2, %c0_i32 : i32
    %1 = arith.extui %0 : i1 to i32
    %c0_i32_0 = arith.constant 0 : i32
    %2 = arith.cmpi ne, %1, %c0_i32_0 : i32
    scf.if %2 {
      %cst_10 = arith.constant 0.000000e+00 : f32
      %12 = vector.broadcast %cst_10 : f32 to vector<128x128xf32>
      %c0_11 = arith.constant 0 : index
      %c0_12 = arith.constant 0 : index
      %13 = vector.load %arg9[%c0_11, %c0_12] : memref<128x128xf32, #tpu.memory_space<vmem>>, vector<128x128xf32>
      tpu.vector_store %arg9[%c0_11, %c0_12], %12 {strides = array<i32>} : memref<128x128xf32, #tpu.memory_space<vmem>>, vector<128x128xf32>,
    } else {
    }
    %c0 = arith.constant 0 : index
    %c0_1 = arith.constant 0 : index
    %3 = vector.load %arg9[%c0, %c0_1] : memref<128x128xf32, #tpu.memory_space<vmem>>, vector<128x128xf32>
    %c0_2 = arith.constant 0 : index
    %c0_3 = arith.constant 0 : index
    %4 = vector.load %arg3[%c0_2, %c0_3] : memref<128x128xbf16, #tpu.memory_space<vmem>>, vector<128x128xbf16>
    %c0_4 = arith.constant 0 : index
    %c0_5 = arith.constant 0 : index
    %5 = vector.load %arg4[%c0_4, %c0_5] : memref<128x128xbf16, #tpu.memory_space<vmem>>, vector<128x128xbf16>
    %cst = arith.constant dense<0.000000e+00> : vector<128x128xf32>
    %6 = tpu.matmul %4, %5, %cst {dimension_numbers = #tpu.dot_dimension_numbers<[1], [0], [0], [1], [0, 0, 1, 1], [], []>} : vector<128x128xbf16>, vector<128x128xbf16>, vector<128x128xf32> -> vector<128x128xf32>
    %7 = arith.addf %3, %6 : vector<128x128xf32>
    %c0_6 = arith.constant 0 : index
    %c0_7 = arith.constant 0 : index
    %8 = vector.load %arg9[%c0_6, %c0_7] : memref<128x128xf32, #tpu.memory_space<vmem>>, vector<128x128xf32>
    tpu.vector_store %arg9[%c0_6, %c0_7], %7 {strides = array<i32>} : memref<128x128xf32, #tpu.memory_space<vmem>>, vector<128x128xf32>,
    %c0_i32_8 = arith.constant 0 : i32
    %9 = arith.cmpi eq, %arg2, %c0_i32_8 : i32
    %10 = arith.extui %9 : i1 to i32
    %c0_i32_9 = arith.constant 0 : i32
    %11 = arith.cmpi ne, %10, %c0_i32_9 : i32
    scf.if %11 {
      %c0_10 = arith.constant 0 : index
      %c0_11 = arith.constant 0 : index
      %12 = vector.load %arg9[%c0_10, %c0_11] : memref<128x128xf32, #tpu.memory_space<vmem>>, vector<128x128xf32>
      %c0_12 = arith.constant 0 : index
      %c0_13 = arith.constant 0 : index
      %13 = vector.load %arg5[%c0_12, %c0_13] : memref<1x128xf32, #tpu.memory_space<vmem>>, vector<1x128xf32>
      %14 = vector.broadcast %13 : vector<1x128xf32> to vector<128x128xf32>
      %15 = arith.mulf %12, %14 : vector<128x128xf32>
      %c0_14 = arith.constant 0 : index
      %c0_15 = arith.constant 0 : index
      %16 = vector.load %arg6[%c0_14, %c0_15] : memref<1x128xf32, #tpu.memory_space<vmem>>, vector<1x128xf32>
      %17 = vector.broadcast %16 : vector<1x128xf32> to vector<128x128xf32>
      %18 = arith.addf %15, %17 : vector<128x128xf32>
      %c0_16 = arith.constant 0 : index
      %c0_17 = arith.constant 0 : index
      %19 = vector.load %arg7[%c0_16, %c0_17] : memref<128x128xbf16, #tpu.memory_space<vmem>>, vector<128x128xbf16>
      %20 = arith.extf %19 : vector<128x128xbf16> to vector<128x128xf32>
      %21 = arith.addf %18, %20 : vector<128x128xf32>
      %cst_18 = arith.constant 0.000000e+00 : f32
      %22 = vector.broadcast %cst_18 : f32 to vector<128x128xf32>
      %23 = arith.maximumf %21, %22 : vector<128x128xf32>
      %24 = arith.truncf %23 : vector<128x128xf32> to vector<128x128xbf16>
      %c0_19 = arith.constant 0 : index
      %c0_20 = arith.constant 0 : index
      %25 = vector.load %arg8[%c0_19, %c0_20] : memref<128x128xbf16, #tpu.memory_space<vmem>>, vector<128x128xbf16>
      tpu.vector_store %arg8[%c0_19, %c0_20], %24 {strides = array<i32>} : memref<128x128xbf16, #tpu.memory_space<vmem>>, vector<128x128xbf16>,
    } else {
    }
    return
  }
  func.func @transform_0(%arg0: i32, %arg1: i32, %arg2: i32) -> (i32, i32) {
    %c0_i32 = arith.constant 0 : i32
    return %arg0, %arg2 : i32, i32
  }
  func.func @transform_1(%arg0: i32, %arg1: i32, %arg2: i32) -> (i32, i32) {
    %c0_i32 = arith.constant 0 : i32
    return %arg2, %arg1 : i32, i32
  }
  func.func @transform_2(%arg0: i32, %arg1: i32, %arg2: i32) -> (i32, i32) {
    %c0_i32 = arith.constant 0 : i32
    %c0_i32_0 = arith.constant 0 : i32
    return %c0_i32, %arg1 : i32, i32
  }
  func.func @transform_3(%arg0: i32, %arg1: i32, %arg2: i32) -> (i32, i32) {
    %c0_i32 = arith.constant 0 : i32
    %c0_i32_0 = arith.constant 0 : i32
    return %c0_i32, %arg1 : i32, i32
  }
  func.func @transform_4(%arg0: i32, %arg1: i32, %arg2: i32) -> (i32, i32) {
    %c0_i32 = arith.constant 0 : i32
    return %arg0, %arg1 : i32, i32
  }
  func.func @transform_5(%arg0: i32, %arg1: i32, %arg2: i32) -> (i32, i32) {
    %c0_i32 = arith.constant 0 : i32
    return %arg0, %arg1 : i32, i32
  }
}

module attributes {stable_mosaic.version = 11 : i64} {
  func.func @_fused_kernel(%arg0: i32, %arg1: i32, %arg2: i32, %arg3: memref<128x128xbf16, #tpu.memory_space<vmem>>, %arg4: memref<128x128xbf16, #tpu.memory_space<vmem>>, %arg5: memref<1x128xf32, #tpu.memory_space<vmem>>, %arg6: memref<1x128xf32, #tpu.memory_space<vmem>>, %arg7: memref<128x128xbf16, #tpu.memory_space<vmem>>, %arg8: memref<128x128xf32, #tpu.memory_space<vmem>>) attributes {dimension_semantics = [#tpu.dimension_semantics<parallel>, #tpu.dimension_semantics<parallel>, #tpu.dimension_semantics<arbitrary>], iteration_bounds = array<i64: 1, 1, 1>, scalar_prefetch = 0 : i64, scratch_operands = 1 : i64, tpu.core_type = #tpu.core_type<tc>, window_params = [{transform_indices = @transform_0, window_bounds = array<i64: 128, 128>}, {transform_indices = @transform_1, window_bounds = array<i64: 128, 128>}, {transform_indices = @transform_2, window_bounds = array<i64: 1, 128>}, {transform_indices = @transform_3, window_bounds = array<i64: 1, 128>}, {transform_indices = @transform_4, window_bounds = array<i64: 128, 128>}]} {
    %c0_i32 = arith.constant 0 : i32
    %0 = arith.cmpi eq, %arg2, %c0_i32 : i32
    %1 = arith.extui %0 : i1 to i32
    %c0_i32_0 = arith.constant 0 : i32
    %2 = arith.cmpi ne, %1, %c0_i32_0 : i32
    scf.if %2 {
      %cst_10 = arith.constant 0.000000e+00 : f32
      %12 = vector.broadcast %cst_10 : f32 to vector<128x128xf32>
      %c0_11 = arith.constant 0 : index
      %c0_12 = arith.constant 0 : index
      %13 = vector.load %arg8[%c0_11, %c0_12] : memref<128x128xf32, #tpu.memory_space<vmem>>, vector<128x128xf32>
      tpu.vector_store %arg8[%c0_11, %c0_12], %12 {strides = array<i32>} : memref<128x128xf32, #tpu.memory_space<vmem>>, vector<128x128xf32>,
    } else {
    }
    %c0 = arith.constant 0 : index
    %c0_1 = arith.constant 0 : index
    %3 = vector.load %arg8[%c0, %c0_1] : memref<128x128xf32, #tpu.memory_space<vmem>>, vector<128x128xf32>
    %c0_2 = arith.constant 0 : index
    %c0_3 = arith.constant 0 : index
    %4 = vector.load %arg3[%c0_2, %c0_3] : memref<128x128xbf16, #tpu.memory_space<vmem>>, vector<128x128xbf16>
    %c0_4 = arith.constant 0 : index
    %c0_5 = arith.constant 0 : index
    %5 = vector.load %arg4[%c0_4, %c0_5] : memref<128x128xbf16, #tpu.memory_space<vmem>>, vector<128x128xbf16>
    %cst = arith.constant dense<0.000000e+00> : vector<128x128xf32>
    %6 = tpu.matmul %4, %5, %cst {dimension_numbers = #tpu.dot_dimension_numbers<[1], [0], [0], [1], [0, 0, 1, 1], [], []>} : vector<128x128xbf16>, vector<128x128xbf16>, vector<128x128xf32> -> vector<128x128xf32>
    %7 = arith.addf %3, %6 : vector<128x128xf32>
    %c0_6 = arith.constant 0 : index
    %c0_7 = arith.constant 0 : index
    %8 = vector.load %arg8[%c0_6, %c0_7] : memref<128x128xf32, #tpu.memory_space<vmem>>, vector<128x128xf32>
    tpu.vector_store %arg8[%c0_6, %c0_7], %7 {strides = array<i32>} : memref<128x128xf32, #tpu.memory_space<vmem>>, vector<128x128xf32>,
    %c0_i32_8 = arith.constant 0 : i32
    %9 = arith.cmpi eq, %arg2, %c0_i32_8 : i32
    %10 = arith.extui %9 : i1 to i32
    %c0_i32_9 = arith.constant 0 : i32
    %11 = arith.cmpi ne, %10, %c0_i32_9 : i32
    scf.if %11 {
      %c0_10 = arith.constant 0 : index
      %c0_11 = arith.constant 0 : index
      %12 = vector.load %arg8[%c0_10, %c0_11] : memref<128x128xf32, #tpu.memory_space<vmem>>, vector<128x128xf32>
      %c0_12 = arith.constant 0 : index
      %c0_13 = arith.constant 0 : index
      %13 = vector.load %arg5[%c0_12, %c0_13] : memref<1x128xf32, #tpu.memory_space<vmem>>, vector<1x128xf32>
      %14 = vector.broadcast %13 : vector<1x128xf32> to vector<128x128xf32>
      %15 = arith.mulf %12, %14 : vector<128x128xf32>
      %c0_14 = arith.constant 0 : index
      %c0_15 = arith.constant 0 : index
      %16 = vector.load %arg6[%c0_14, %c0_15] : memref<1x128xf32, #tpu.memory_space<vmem>>, vector<1x128xf32>
      %17 = vector.broadcast %16 : vector<1x128xf32> to vector<128x128xf32>
      %18 = arith.addf %15, %17 : vector<128x128xf32>
      %cst_16 = arith.constant 0.000000e+00 : f32
      %19 = vector.broadcast %cst_16 : f32 to vector<128x128xf32>
      %20 = arith.maximumf %18, %19 : vector<128x128xf32>
      %21 = arith.truncf %20 : vector<128x128xf32> to vector<128x128xbf16>
      %c0_17 = arith.constant 0 : index
      %c0_18 = arith.constant 0 : index
      %22 = vector.load %arg7[%c0_17, %c0_18] : memref<128x128xbf16, #tpu.memory_space<vmem>>, vector<128x128xbf16>
      tpu.vector_store %arg7[%c0_17, %c0_18], %21 {strides = array<i32>} : memref<128x128xbf16, #tpu.memory_space<vmem>>, vector<128x128xbf16>,
    } else {
    }
    return
  }
  func.func @transform_0(%arg0: i32, %arg1: i32, %arg2: i32) -> (i32, i32) {
    %c0_i32 = arith.constant 0 : i32
    return %arg0, %arg2 : i32, i32
  }
  func.func @transform_1(%arg0: i32, %arg1: i32, %arg2: i32) -> (i32, i32) {
    %c0_i32 = arith.constant 0 : i32
    return %arg2, %arg1 : i32, i32
  }
  func.func @transform_2(%arg0: i32, %arg1: i32, %arg2: i32) -> (i32, i32) {
    %c0_i32 = arith.constant 0 : i32
    %c0_i32_0 = arith.constant 0 : i32
    return %c0_i32, %arg1 : i32, i32
  }
  func.func @transform_3(%arg0: i32, %arg1: i32, %arg2: i32) -> (i32, i32) {
    %c0_i32 = arith.constant 0 : i32
    %c0_i32_0 = arith.constant 0 : i32
    return %c0_i32, %arg1 : i32, i32
  }
  func.func @transform_4(%arg0: i32, %arg1: i32, %arg2: i32) -> (i32, i32) {
    %c0_i32 = arith.constant 0 : i32
    return %arg0, %arg1 : i32, i32
  }
}

module attributes {stable_mosaic.version = 11 : i64} {
  func.func @_fused_kernel(%arg0: i32, %arg1: i32, %arg2: i32, %arg3: memref<32x128xbf16, #tpu.memory_space<vmem>>, %arg4: memref<128x128xbf16, #tpu.memory_space<vmem>>, %arg5: memref<1x128xf32, #tpu.memory_space<vmem>>, %arg6: memref<1x128xf32, #tpu.memory_space<vmem>>, %arg7: memref<32x128xbf16, #tpu.memory_space<vmem>>, %arg8: memref<32x128xf32, #tpu.memory_space<vmem>>) attributes {dimension_semantics = [#tpu.dimension_semantics<parallel>, #tpu.dimension_semantics<parallel>, #tpu.dimension_semantics<arbitrary>], iteration_bounds = array<i64: 1, 1, 1>, scalar_prefetch = 0 : i64, scratch_operands = 1 : i64, tpu.core_type = #tpu.core_type<tc>, window_params = [{transform_indices = @transform_0, window_bounds = array<i64: 32, 128>}, {transform_indices = @transform_1, window_bounds = array<i64: 128, 128>}, {transform_indices = @transform_2, window_bounds = array<i64: 1, 128>}, {transform_indices = @transform_3, window_bounds = array<i64: 1, 128>}, {transform_indices = @transform_4, window_bounds = array<i64: 32, 128>}]} {
    %c0_i32 = arith.constant 0 : i32
    %0 = arith.cmpi eq, %arg2, %c0_i32 : i32
    %1 = arith.extui %0 : i1 to i32
    %c0_i32_0 = arith.constant 0 : i32
    %2 = arith.cmpi ne, %1, %c0_i32_0 : i32
    scf.if %2 {
      %cst_10 = arith.constant 0.000000e+00 : f32
      %12 = vector.broadcast %cst_10 : f32 to vector<32x128xf32>
      %c0_11 = arith.constant 0 : index
      %c0_12 = arith.constant 0 : index
      %13 = vector.load %arg8[%c0_11, %c0_12] : memref<32x128xf32, #tpu.memory_space<vmem>>, vector<32x128xf32>
      tpu.vector_store %arg8[%c0_11, %c0_12], %12 {strides = array<i32>} : memref<32x128xf32, #tpu.memory_space<vmem>>, vector<32x128xf32>,
    } else {
    }
    %c0 = arith.constant 0 : index
    %c0_1 = arith.constant 0 : index
    %3 = vector.load %arg8[%c0, %c0_1] : memref<32x128xf32, #tpu.memory_space<vmem>>, vector<32x128xf32>
    %c0_2 = arith.constant 0 : index
    %c0_3 = arith.constant 0 : index
    %4 = vector.load %arg3[%c0_2, %c0_3] : memref<32x128xbf16, #tpu.memory_space<vmem>>, vector<32x128xbf16>
    %c0_4 = arith.constant 0 : index
    %c0_5 = arith.constant 0 : index
    %5 = vector.load %arg4[%c0_4, %c0_5] : memref<128x128xbf16, #tpu.memory_space<vmem>>, vector<128x128xbf16>
    %cst = arith.constant dense<0.000000e+00> : vector<32x128xf32>
    %6 = tpu.matmul %4, %5, %cst {dimension_numbers = #tpu.dot_dimension_numbers<[1], [0], [0], [1], [0, 0, 1, 1], [], []>} : vector<32x128xbf16>, vector<128x128xbf16>, vector<32x128xf32> -> vector<32x128xf32>
    %7 = arith.addf %3, %6 : vector<32x128xf32>
    %c0_6 = arith.constant 0 : index
    %c0_7 = arith.constant 0 : index
    %8 = vector.load %arg8[%c0_6, %c0_7] : memref<32x128xf32, #tpu.memory_space<vmem>>, vector<32x128xf32>
    tpu.vector_store %arg8[%c0_6, %c0_7], %7 {strides = array<i32>} : memref<32x128xf32, #tpu.memory_space<vmem>>, vector<32x128xf32>,
    %c0_i32_8 = arith.constant 0 : i32
    %9 = arith.cmpi eq, %arg2, %c0_i32_8 : i32
    %10 = arith.extui %9 : i1 to i32
    %c0_i32_9 = arith.constant 0 : i32
    %11 = arith.cmpi ne, %10, %c0_i32_9 : i32
    scf.if %11 {
      %c0_10 = arith.constant 0 : index
      %c0_11 = arith.constant 0 : index
      %12 = vector.load %arg8[%c0_10, %c0_11] : memref<32x128xf32, #tpu.memory_space<vmem>>, vector<32x128xf32>
      %c0_12 = arith.constant 0 : index
      %c0_13 = arith.constant 0 : index
      %13 = vector.load %arg5[%c0_12, %c0_13] : memref<1x128xf32, #tpu.memory_space<vmem>>, vector<1x128xf32>
      %14 = vector.broadcast %13 : vector<1x128xf32> to vector<32x128xf32>
      %15 = arith.mulf %12, %14 : vector<32x128xf32>
      %c0_14 = arith.constant 0 : index
      %c0_15 = arith.constant 0 : index
      %16 = vector.load %arg6[%c0_14, %c0_15] : memref<1x128xf32, #tpu.memory_space<vmem>>, vector<1x128xf32>
      %17 = vector.broadcast %16 : vector<1x128xf32> to vector<32x128xf32>
      %18 = arith.addf %15, %17 : vector<32x128xf32>
      %19 = arith.truncf %18 : vector<32x128xf32> to vector<32x128xbf16>
      %c0_16 = arith.constant 0 : index
      %c0_17 = arith.constant 0 : index
      %20 = vector.load %arg7[%c0_16, %c0_17] : memref<32x128xbf16, #tpu.memory_space<vmem>>, vector<32x128xbf16>
      tpu.vector_store %arg7[%c0_16, %c0_17], %19 {strides = array<i32>} : memref<32x128xbf16, #tpu.memory_space<vmem>>, vector<32x128xbf16>,
    } else {
    }
    return
  }
  func.func @transform_0(%arg0: i32, %arg1: i32, %arg2: i32) -> (i32, i32) {
    %c0_i32 = arith.constant 0 : i32
    return %arg0, %arg2 : i32, i32
  }
  func.func @transform_1(%arg0: i32, %arg1: i32, %arg2: i32) -> (i32, i32) {
    %c0_i32 = arith.constant 0 : i32
    return %arg2, %arg1 : i32, i32
  }
  func.func @transform_2(%arg0: i32, %arg1: i32, %arg2: i32) -> (i32, i32) {
    %c0_i32 = arith.constant 0 : i32
    %c0_i32_0 = arith.constant 0 : i32
    return %c0_i32, %arg1 : i32, i32
  }
  func.func @transform_3(%arg0: i32, %arg1: i32, %arg2: i32) -> (i32, i32) {
    %c0_i32 = arith.constant 0 : i32
    %c0_i32_0 = arith.constant 0 : i32
    return %c0_i32, %arg1 : i32, i32
  }
  func.func @transform_4(%arg0: i32, %arg1: i32, %arg2: i32) -> (i32, i32) {
    %c0_i32 = arith.constant 0 : i32
    return %arg0, %arg1 : i32, i32
  }
}

module attributes {stable_mosaic.version = 11 : i64} {
  func.func @_fused_kernel(%arg0: i32, %arg1: i32, %arg2: i32, %arg3: memref<32x128xbf16, #tpu.memory_space<vmem>>, %arg4: memref<128x128xbf16, #tpu.memory_space<vmem>>, %arg5: memref<1x128xf32, #tpu.memory_space<vmem>>, %arg6: memref<1x128xf32, #tpu.memory_space<vmem>>, %arg7: memref<32x128xbf16, #tpu.memory_space<vmem>>, %arg8: memref<32x128xbf16, #tpu.memory_space<vmem>>, %arg9: memref<32x128xf32, #tpu.memory_space<vmem>>) attributes {dimension_semantics = [#tpu.dimension_semantics<parallel>, #tpu.dimension_semantics<parallel>, #tpu.dimension_semantics<arbitrary>], iteration_bounds = array<i64: 1, 1, 1>, scalar_prefetch = 0 : i64, scratch_operands = 1 : i64, tpu.core_type = #tpu.core_type<tc>, window_params = [{transform_indices = @transform_0, window_bounds = array<i64: 32, 128>}, {transform_indices = @transform_1, window_bounds = array<i64: 128, 128>}, {transform_indices = @transform_2, window_bounds = array<i64: 1, 128>}, {transform_indices = @transform_3, window_bounds = array<i64: 1, 128>}, {transform_indices = @transform_4, window_bounds = array<i64: 32, 128>}, {transform_indices = @transform_5, window_bounds = array<i64: 32, 128>}]} {
    %c0_i32 = arith.constant 0 : i32
    %0 = arith.cmpi eq, %arg2, %c0_i32 : i32
    %1 = arith.extui %0 : i1 to i32
    %c0_i32_0 = arith.constant 0 : i32
    %2 = arith.cmpi ne, %1, %c0_i32_0 : i32
    scf.if %2 {
      %cst_10 = arith.constant 0.000000e+00 : f32
      %12 = vector.broadcast %cst_10 : f32 to vector<32x128xf32>
      %c0_11 = arith.constant 0 : index
      %c0_12 = arith.constant 0 : index
      %13 = vector.load %arg9[%c0_11, %c0_12] : memref<32x128xf32, #tpu.memory_space<vmem>>, vector<32x128xf32>
      tpu.vector_store %arg9[%c0_11, %c0_12], %12 {strides = array<i32>} : memref<32x128xf32, #tpu.memory_space<vmem>>, vector<32x128xf32>,
    } else {
    }
    %c0 = arith.constant 0 : index
    %c0_1 = arith.constant 0 : index
    %3 = vector.load %arg9[%c0, %c0_1] : memref<32x128xf32, #tpu.memory_space<vmem>>, vector<32x128xf32>
    %c0_2 = arith.constant 0 : index
    %c0_3 = arith.constant 0 : index
    %4 = vector.load %arg3[%c0_2, %c0_3] : memref<32x128xbf16, #tpu.memory_space<vmem>>, vector<32x128xbf16>
    %c0_4 = arith.constant 0 : index
    %c0_5 = arith.constant 0 : index
    %5 = vector.load %arg4[%c0_4, %c0_5] : memref<128x128xbf16, #tpu.memory_space<vmem>>, vector<128x128xbf16>
    %cst = arith.constant dense<0.000000e+00> : vector<32x128xf32>
    %6 = tpu.matmul %4, %5, %cst {dimension_numbers = #tpu.dot_dimension_numbers<[1], [0], [0], [1], [0, 0, 1, 1], [], []>} : vector<32x128xbf16>, vector<128x128xbf16>, vector<32x128xf32> -> vector<32x128xf32>
    %7 = arith.addf %3, %6 : vector<32x128xf32>
    %c0_6 = arith.constant 0 : index
    %c0_7 = arith.constant 0 : index
    %8 = vector.load %arg9[%c0_6, %c0_7] : memref<32x128xf32, #tpu.memory_space<vmem>>, vector<32x128xf32>
    tpu.vector_store %arg9[%c0_6, %c0_7], %7 {strides = array<i32>} : memref<32x128xf32, #tpu.memory_space<vmem>>, vector<32x128xf32>,
    %c0_i32_8 = arith.constant 0 : i32
    %9 = arith.cmpi eq, %arg2, %c0_i32_8 : i32
    %10 = arith.extui %9 : i1 to i32
    %c0_i32_9 = arith.constant 0 : i32
    %11 = arith.cmpi ne, %10, %c0_i32_9 : i32
    scf.if %11 {
      %c0_10 = arith.constant 0 : index
      %c0_11 = arith.constant 0 : index
      %12 = vector.load %arg9[%c0_10, %c0_11] : memref<32x128xf32, #tpu.memory_space<vmem>>, vector<32x128xf32>
      %c0_12 = arith.constant 0 : index
      %c0_13 = arith.constant 0 : index
      %13 = vector.load %arg5[%c0_12, %c0_13] : memref<1x128xf32, #tpu.memory_space<vmem>>, vector<1x128xf32>
      %14 = vector.broadcast %13 : vector<1x128xf32> to vector<32x128xf32>
      %15 = arith.mulf %12, %14 : vector<32x128xf32>
      %c0_14 = arith.constant 0 : index
      %c0_15 = arith.constant 0 : index
      %16 = vector.load %arg6[%c0_14, %c0_15] : memref<1x128xf32, #tpu.memory_space<vmem>>, vector<1x128xf32>
      %17 = vector.broadcast %16 : vector<1x128xf32> to vector<32x128xf32>
      %18 = arith.addf %15, %17 : vector<32x128xf32>
      %c0_16 = arith.constant 0 : index
      %c0_17 = arith.constant 0 : index
      %19 = vector.load %arg7[%c0_16, %c0_17] : memref<32x128xbf16, #tpu.memory_space<vmem>>, vector<32x128xbf16>
      %20 = arith.extf %19 : vector<32x128xbf16> to vector<32x128xf32>
      %21 = arith.addf %18, %20 : vector<32x128xf32>
      %cst_18 = arith.constant 0.000000e+00 : f32
      %22 = vector.broadcast %cst_18 : f32 to vector<32x128xf32>
      %23 = arith.maximumf %21, %22 : vector<32x128xf32>
      %24 = arith.truncf %23 : vector<32x128xf32> to vector<32x128xbf16>
      %c0_19 = arith.constant 0 : index
      %c0_20 = arith.constant 0 : index
      %25 = vector.load %arg8[%c0_19, %c0_20] : memref<32x128xbf16, #tpu.memory_space<vmem>>, vector<32x128xbf16>
      tpu.vector_store %arg8[%c0_19, %c0_20], %24 {strides = array<i32>} : memref<32x128xbf16, #tpu.memory_space<vmem>>, vector<32x128xbf16>,
    } else {
    }
    return
  }
  func.func @transform_0(%arg0: i32, %arg1: i32, %arg2: i32) -> (i32, i32) {
    %c0_i32 = arith.constant 0 : i32
    return %arg0, %arg2 : i32, i32
  }
  func.func @transform_1(%arg0: i32, %arg1: i32, %arg2: i32) -> (i32, i32) {
    %c0_i32 = arith.constant 0 : i32
    return %arg2, %arg1 : i32, i32
  }
  func.func @transform_2(%arg0: i32, %arg1: i32, %arg2: i32) -> (i32, i32) {
    %c0_i32 = arith.constant 0 : i32
    %c0_i32_0 = arith.constant 0 : i32
    return %c0_i32, %arg1 : i32, i32
  }
  func.func @transform_3(%arg0: i32, %arg1: i32, %arg2: i32) -> (i32, i32) {
    %c0_i32 = arith.constant 0 : i32
    %c0_i32_0 = arith.constant 0 : i32
    return %c0_i32, %arg1 : i32, i32
  }
  func.func @transform_4(%arg0: i32, %arg1: i32, %arg2: i32) -> (i32, i32) {
    %c0_i32 = arith.constant 0 : i32
    return %arg0, %arg1 : i32, i32
  }
  func.func @transform_5(%arg0: i32, %arg1: i32, %arg2: i32) -> (i32, i32) {
    %c0_i32 = arith.constant 0 : i32
    return %arg0, %arg1 : i32, i32
  }
}

module attributes {stable_mosaic.version = 11 : i64} {
  func.func @_fused_kernel(%arg0: i32, %arg1: i32, %arg2: i32, %arg3: memref<32x384xbf16, #tpu.memory_space<vmem>>, %arg4: memref<384x128xbf16, #tpu.memory_space<vmem>>, %arg5: memref<1x128xf32, #tpu.memory_space<vmem>>, %arg6: memref<1x128xf32, #tpu.memory_space<vmem>>, %arg7: memref<32x128xbf16, #tpu.memory_space<vmem>>, %arg8: memref<32x128xf32, #tpu.memory_space<vmem>>) attributes {dimension_semantics = [#tpu.dimension_semantics<parallel>, #tpu.dimension_semantics<parallel>, #tpu.dimension_semantics<arbitrary>], iteration_bounds = array<i64: 1, 1, 3>, scalar_prefetch = 0 : i64, scratch_operands = 1 : i64, tpu.core_type = #tpu.core_type<tc>, window_params = [{transform_indices = @transform_0, window_bounds = array<i64: 32, 384>}, {transform_indices = @transform_1, window_bounds = array<i64: 384, 128>}, {transform_indices = @transform_2, window_bounds = array<i64: 1, 128>}, {transform_indices = @transform_3, window_bounds = array<i64: 1, 128>}, {transform_indices = @transform_4, window_bounds = array<i64: 32, 128>}]} {
    %c0_i32 = arith.constant 0 : i32
    %0 = arith.cmpi eq, %arg2, %c0_i32 : i32
    %1 = arith.extui %0 : i1 to i32
    %c0_i32_0 = arith.constant 0 : i32
    %2 = arith.cmpi ne, %1, %c0_i32_0 : i32
    scf.if %2 {
      %cst_9 = arith.constant 0.000000e+00 : f32
      %12 = vector.broadcast %cst_9 : f32 to vector<32x128xf32>
      %c0_10 = arith.constant 0 : index
      %c0_11 = arith.constant 0 : index
      %13 = vector.load %arg8[%c0_10, %c0_11] : memref<32x128xf32, #tpu.memory_space<vmem>>, vector<32x128xf32>
      tpu.vector_store %arg8[%c0_10, %c0_11], %12 {strides = array<i32>} : memref<32x128xf32, #tpu.memory_space<vmem>>, vector<32x128xf32>,
    } else {
    }
    %c0 = arith.constant 0 : index
    %c0_1 = arith.constant 0 : index
    %3 = vector.load %arg8[%c0, %c0_1] : memref<32x128xf32, #tpu.memory_space<vmem>>, vector<32x128xf32>
    %c0_2 = arith.constant 0 : index
    %c0_3 = arith.constant 0 : index
    %4 = vector.load %arg3[%c0_2, %c0_3] : memref<32x384xbf16, #tpu.memory_space<vmem>>, vector<32x384xbf16>
    %c0_4 = arith.constant 0 : index
    %c0_5 = arith.constant 0 : index
    %5 = vector.load %arg4[%c0_4, %c0_5] : memref<384x128xbf16, #tpu.memory_space<vmem>>, vector<384x128xbf16>
    %cst = arith.constant dense<0.000000e+00> : vector<32x128xf32>
    %6 = tpu.matmul %4, %5, %cst {dimension_numbers = #tpu.dot_dimension_numbers<[1], [0], [0], [1], [0, 0, 1, 1], [], []>} : vector<32x384xbf16>, vector<384x128xbf16>, vector<32x128xf32> -> vector<32x128xf32>
    %7 = arith.addf %3, %6 : vector<32x128xf32>
    %c0_6 = arith.constant 0 : index
    %c0_7 = arith.constant 0 : index
    %8 = vector.load %arg8[%c0_6, %c0_7] : memref<32x128xf32, #tpu.memory_space<vmem>>, vector<32x128xf32>
    tpu.vector_store %arg8[%c0_6, %c0_7], %7 {strides = array<i32>} : memref<32x128xf32, #tpu.memory_space<vmem>>, vector<32x128xf32>,
    %c2_i32 = arith.constant 2 : i32
    %9 = arith.cmpi eq, %arg2, %c2_i32 : i32
    %10 = arith.extui %9 : i1 to i32
    %c0_i32_8 = arith.constant 0 : i32
    %11 = arith.cmpi ne, %10, %c0_i32_8 : i32
    scf.if %11 {
      %c0_9 = arith.constant 0 : index
      %c0_10 = arith.constant 0 : index
      %12 = vector.load %arg8[%c0_9, %c0_10] : memref<32x128xf32, #tpu.memory_space<vmem>>, vector<32x128xf32>
      %c0_11 = arith.constant 0 : index
      %c0_12 = arith.constant 0 : index
      %13 = vector.load %arg5[%c0_11, %c0_12] : memref<1x128xf32, #tpu.memory_space<vmem>>, vector<1x128xf32>
      %14 = vector.broadcast %13 : vector<1x128xf32> to vector<32x128xf32>
      %15 = arith.mulf %12, %14 : vector<32x128xf32>
      %c0_13 = arith.constant 0 : index
      %c0_14 = arith.constant 0 : index
      %16 = vector.load %arg6[%c0_13, %c0_14] : memref<1x128xf32, #tpu.memory_space<vmem>>, vector<1x128xf32>
      %17 = vector.broadcast %16 : vector<1x128xf32> to vector<32x128xf32>
      %18 = arith.addf %15, %17 : vector<32x128xf32>
      %cst_15 = arith.constant 0.000000e+00 : f32
      %19 = vector.broadcast %cst_15 : f32 to vector<32x128xf32>
      %20 = arith.maximumf %18, %19 : vector<32x128xf32>
      %21 = arith.truncf %20 : vector<32x128xf32> to vector<32x128xbf16>
      %c0_16 = arith.constant 0 : index
      %c0_17 = arith.constant 0 : index
      %22 = vector.load %arg7[%c0_16, %c0_17] : memref<32x128xbf16, #tpu.memory_space<vmem>>, vector<32x128xbf16>
      tpu.vector_store %arg7[%c0_16, %c0_17], %21 {strides = array<i32>} : memref<32x128xbf16, #tpu.memory_space<vmem>>, vector<32x128xbf16>,
    } else {
    }
    return
  }
  func.func @transform_0(%arg0: i32, %arg1: i32, %arg2: i32) -> (i32, i32) {
    %c0_i32 = arith.constant 0 : i32
    return %arg0, %arg2 : i32, i32
  }
  func.func @transform_1(%arg0: i32, %arg1: i32, %arg2: i32) -> (i32, i32) {
    %c0_i32 = arith.constant 0 : i32
    return %arg2, %arg1 : i32, i32
  }
  func.func @transform_2(%arg0: i32, %arg1: i32, %arg2: i32) -> (i32, i32) {
    %c0_i32 = arith.constant 0 : i32
    %c0_i32_0 = arith.constant 0 : i32
    return %c0_i32, %arg1 : i32, i32
  }
  func.func @transform_3(%arg0: i32, %arg1: i32, %arg2: i32) -> (i32, i32) {
    %c0_i32 = arith.constant 0 : i32
    %c0_i32_0 = arith.constant 0 : i32
    return %c0_i32, %arg1 : i32, i32
  }
  func.func @transform_4(%arg0: i32, %arg1: i32, %arg2: i32) -> (i32, i32) {
    %c0_i32 = arith.constant 0 : i32
    return %arg0, %arg1 : i32, i32
  }
}

module attributes {stable_mosaic.version = 11 : i64} {
  func.func @_fused_kernel(%arg0: i32, %arg1: i32, %arg2: i32, %arg3: memref<32x128xbf16, #tpu.memory_space<vmem>>, %arg4: memref<128x128xbf16, #tpu.memory_space<vmem>>, %arg5: memref<1x128xf32, #tpu.memory_space<vmem>>, %arg6: memref<1x128xf32, #tpu.memory_space<vmem>>, %arg7: memref<32x128xbf16, #tpu.memory_space<vmem>>, %arg8: memref<32x128xf32, #tpu.memory_space<vmem>>) attributes {dimension_semantics = [#tpu.dimension_semantics<parallel>, #tpu.dimension_semantics<parallel>, #tpu.dimension_semantics<arbitrary>], iteration_bounds = array<i64: 1, 1, 1>, scalar_prefetch = 0 : i64, scratch_operands = 1 : i64, tpu.core_type = #tpu.core_type<tc>, window_params = [{transform_indices = @transform_0, window_bounds = array<i64: 32, 128>}, {transform_indices = @transform_1, window_bounds = array<i64: 128, 128>}, {transform_indices = @transform_2, window_bounds = array<i64: 1, 128>}, {transform_indices = @transform_3, window_bounds = array<i64: 1, 128>}, {transform_indices = @transform_4, window_bounds = array<i64: 32, 128>}]} {
    %c0_i32 = arith.constant 0 : i32
    %0 = arith.cmpi eq, %arg2, %c0_i32 : i32
    %1 = arith.extui %0 : i1 to i32
    %c0_i32_0 = arith.constant 0 : i32
    %2 = arith.cmpi ne, %1, %c0_i32_0 : i32
    scf.if %2 {
      %cst_10 = arith.constant 0.000000e+00 : f32
      %12 = vector.broadcast %cst_10 : f32 to vector<32x128xf32>
      %c0_11 = arith.constant 0 : index
      %c0_12 = arith.constant 0 : index
      %13 = vector.load %arg8[%c0_11, %c0_12] : memref<32x128xf32, #tpu.memory_space<vmem>>, vector<32x128xf32>
      tpu.vector_store %arg8[%c0_11, %c0_12], %12 {strides = array<i32>} : memref<32x128xf32, #tpu.memory_space<vmem>>, vector<32x128xf32>,
    } else {
    }
    %c0 = arith.constant 0 : index
    %c0_1 = arith.constant 0 : index
    %3 = vector.load %arg8[%c0, %c0_1] : memref<32x128xf32, #tpu.memory_space<vmem>>, vector<32x128xf32>
    %c0_2 = arith.constant 0 : index
    %c0_3 = arith.constant 0 : index
    %4 = vector.load %arg3[%c0_2, %c0_3] : memref<32x128xbf16, #tpu.memory_space<vmem>>, vector<32x128xbf16>
    %c0_4 = arith.constant 0 : index
    %c0_5 = arith.constant 0 : index
    %5 = vector.load %arg4[%c0_4, %c0_5] : memref<128x128xbf16, #tpu.memory_space<vmem>>, vector<128x128xbf16>
    %cst = arith.constant dense<0.000000e+00> : vector<32x128xf32>
    %6 = tpu.matmul %4, %5, %cst {dimension_numbers = #tpu.dot_dimension_numbers<[1], [0], [0], [1], [0, 0, 1, 1], [], []>} : vector<32x128xbf16>, vector<128x128xbf16>, vector<32x128xf32> -> vector<32x128xf32>
    %7 = arith.addf %3, %6 : vector<32x128xf32>
    %c0_6 = arith.constant 0 : index
    %c0_7 = arith.constant 0 : index
    %8 = vector.load %arg8[%c0_6, %c0_7] : memref<32x128xf32, #tpu.memory_space<vmem>>, vector<32x128xf32>
    tpu.vector_store %arg8[%c0_6, %c0_7], %7 {strides = array<i32>} : memref<32x128xf32, #tpu.memory_space<vmem>>, vector<32x128xf32>,
    %c0_i32_8 = arith.constant 0 : i32
    %9 = arith.cmpi eq, %arg2, %c0_i32_8 : i32
    %10 = arith.extui %9 : i1 to i32
    %c0_i32_9 = arith.constant 0 : i32
    %11 = arith.cmpi ne, %10, %c0_i32_9 : i32
    scf.if %11 {
      %c0_10 = arith.constant 0 : index
      %c0_11 = arith.constant 0 : index
      %12 = vector.load %arg8[%c0_10, %c0_11] : memref<32x128xf32, #tpu.memory_space<vmem>>, vector<32x128xf32>
      %c0_12 = arith.constant 0 : index
      %c0_13 = arith.constant 0 : index
      %13 = vector.load %arg5[%c0_12, %c0_13] : memref<1x128xf32, #tpu.memory_space<vmem>>, vector<1x128xf32>
      %14 = vector.broadcast %13 : vector<1x128xf32> to vector<32x128xf32>
      %15 = arith.mulf %12, %14 : vector<32x128xf32>
      %c0_14 = arith.constant 0 : index
      %c0_15 = arith.constant 0 : index
      %16 = vector.load %arg6[%c0_14, %c0_15] : memref<1x128xf32, #tpu.memory_space<vmem>>, vector<1x128xf32>
      %17 = vector.broadcast %16 : vector<1x128xf32> to vector<32x128xf32>
      %18 = arith.addf %15, %17 : vector<32x128xf32>
      %cst_16 = arith.constant 0.000000e+00 : f32
      %19 = vector.broadcast %cst_16 : f32 to vector<32x128xf32>
      %20 = arith.maximumf %18, %19 : vector<32x128xf32>
      %21 = arith.truncf %20 : vector<32x128xf32> to vector<32x128xbf16>
      %c0_17 = arith.constant 0 : index
      %c0_18 = arith.constant 0 : index
      %22 = vector.load %arg7[%c0_17, %c0_18] : memref<32x128xbf16, #tpu.memory_space<vmem>>, vector<32x128xbf16>
      tpu.vector_store %arg7[%c0_17, %c0_18], %21 {strides = array<i32>} : memref<32x128xbf16, #tpu.memory_space<vmem>>, vector<32x128xbf16>,
    } else {
    }
    return
  }
  func.func @transform_0(%arg0: i32, %arg1: i32, %arg2: i32) -> (i32, i32) {
    %c0_i32 = arith.constant 0 : i32
    return %arg0, %arg2 : i32, i32
  }
  func.func @transform_1(%arg0: i32, %arg1: i32, %arg2: i32) -> (i32, i32) {
    %c0_i32 = arith.constant 0 : i32
    return %arg2, %arg1 : i32, i32
  }
  func.func @transform_2(%arg0: i32, %arg1: i32, %arg2: i32) -> (i32, i32) {
    %c0_i32 = arith.constant 0 : i32
    %c0_i32_0 = arith.constant 0 : i32
    return %c0_i32, %arg1 : i32, i32
  }
  func.func @transform_3(%arg0: i32, %arg1: i32, %arg2: i32) -> (i32, i32) {
    %c0_i32 = arith.constant 0 : i32
    %c0_i32_0 = arith.constant 0 : i32
    return %c0_i32, %arg1 : i32, i32
  }
  func.func @transform_4(%arg0: i32, %arg1: i32, %arg2: i32) -> (i32, i32) {
    %c0_i32 = arith.constant 0 : i32
    return %arg0, %arg1 : i32, i32
  }
}

module attributes {stable_mosaic.version = 11 : i64} {
  func.func @_fused_kernel(%arg0: i32, %arg1: i32, %arg2: i32, %arg3: memref<16x128xbf16, #tpu.memory_space<vmem>>, %arg4: memref<128x128xbf16, #tpu.memory_space<vmem>>, %arg5: memref<1x128xf32, #tpu.memory_space<vmem>>, %arg6: memref<1x128xf32, #tpu.memory_space<vmem>>, %arg7: memref<16x128xbf16, #tpu.memory_space<vmem>>, %arg8: memref<16x128xf32, #tpu.memory_space<vmem>>) attributes {dimension_semantics = [#tpu.dimension_semantics<parallel>, #tpu.dimension_semantics<parallel>, #tpu.dimension_semantics<arbitrary>], iteration_bounds = array<i64: 1, 1, 1>, scalar_prefetch = 0 : i64, scratch_operands = 1 : i64, tpu.core_type = #tpu.core_type<tc>, window_params = [{transform_indices = @transform_0, window_bounds = array<i64: 16, 128>}, {transform_indices = @transform_1, window_bounds = array<i64: 128, 128>}, {transform_indices = @transform_2, window_bounds = array<i64: 1, 128>}, {transform_indices = @transform_3, window_bounds = array<i64: 1, 128>}, {transform_indices = @transform_4, window_bounds = array<i64: 16, 128>}]} {
    %c0_i32 = arith.constant 0 : i32
    %0 = arith.cmpi eq, %arg2, %c0_i32 : i32
    %1 = arith.extui %0 : i1 to i32
    %c0_i32_0 = arith.constant 0 : i32
    %2 = arith.cmpi ne, %1, %c0_i32_0 : i32
    scf.if %2 {
      %cst_10 = arith.constant 0.000000e+00 : f32
      %12 = vector.broadcast %cst_10 : f32 to vector<16x128xf32>
      %c0_11 = arith.constant 0 : index
      %c0_12 = arith.constant 0 : index
      %13 = vector.load %arg8[%c0_11, %c0_12] : memref<16x128xf32, #tpu.memory_space<vmem>>, vector<16x128xf32>
      tpu.vector_store %arg8[%c0_11, %c0_12], %12 {strides = array<i32>} : memref<16x128xf32, #tpu.memory_space<vmem>>, vector<16x128xf32>,
    } else {
    }
    %c0 = arith.constant 0 : index
    %c0_1 = arith.constant 0 : index
    %3 = vector.load %arg8[%c0, %c0_1] : memref<16x128xf32, #tpu.memory_space<vmem>>, vector<16x128xf32>
    %c0_2 = arith.constant 0 : index
    %c0_3 = arith.constant 0 : index
    %4 = vector.load %arg3[%c0_2, %c0_3] : memref<16x128xbf16, #tpu.memory_space<vmem>>, vector<16x128xbf16>
    %c0_4 = arith.constant 0 : index
    %c0_5 = arith.constant 0 : index
    %5 = vector.load %arg4[%c0_4, %c0_5] : memref<128x128xbf16, #tpu.memory_space<vmem>>, vector<128x128xbf16>
    %cst = arith.constant dense<0.000000e+00> : vector<16x128xf32>
    %6 = tpu.matmul %4, %5, %cst {dimension_numbers = #tpu.dot_dimension_numbers<[1], [0], [0], [1], [0, 0, 1, 1], [], []>} : vector<16x128xbf16>, vector<128x128xbf16>, vector<16x128xf32> -> vector<16x128xf32>
    %7 = arith.addf %3, %6 : vector<16x128xf32>
    %c0_6 = arith.constant 0 : index
    %c0_7 = arith.constant 0 : index
    %8 = vector.load %arg8[%c0_6, %c0_7] : memref<16x128xf32, #tpu.memory_space<vmem>>, vector<16x128xf32>
    tpu.vector_store %arg8[%c0_6, %c0_7], %7 {strides = array<i32>} : memref<16x128xf32, #tpu.memory_space<vmem>>, vector<16x128xf32>,
    %c0_i32_8 = arith.constant 0 : i32
    %9 = arith.cmpi eq, %arg2, %c0_i32_8 : i32
    %10 = arith.extui %9 : i1 to i32
    %c0_i32_9 = arith.constant 0 : i32
    %11 = arith.cmpi ne, %10, %c0_i32_9 : i32
    scf.if %11 {
      %c0_10 = arith.constant 0 : index
      %c0_11 = arith.constant 0 : index
      %12 = vector.load %arg8[%c0_10, %c0_11] : memref<16x128xf32, #tpu.memory_space<vmem>>, vector<16x128xf32>
      %c0_12 = arith.constant 0 : index
      %c0_13 = arith.constant 0 : index
      %13 = vector.load %arg5[%c0_12, %c0_13] : memref<1x128xf32, #tpu.memory_space<vmem>>, vector<1x128xf32>
      %14 = vector.broadcast %13 : vector<1x128xf32> to vector<16x128xf32>
      %15 = arith.mulf %12, %14 : vector<16x128xf32>
      %c0_14 = arith.constant 0 : index
      %c0_15 = arith.constant 0 : index
      %16 = vector.load %arg6[%c0_14, %c0_15] : memref<1x128xf32, #tpu.memory_space<vmem>>, vector<1x128xf32>
      %17 = vector.broadcast %16 : vector<1x128xf32> to vector<16x128xf32>
      %18 = arith.addf %15, %17 : vector<16x128xf32>
      %19 = arith.truncf %18 : vector<16x128xf32> to vector<16x128xbf16>
      %c0_16 = arith.constant 0 : index
      %c0_17 = arith.constant 0 : index
      %20 = vector.load %arg7[%c0_16, %c0_17] : memref<16x128xbf16, #tpu.memory_space<vmem>>, vector<16x128xbf16>
      tpu.vector_store %arg7[%c0_16, %c0_17], %19 {strides = array<i32>} : memref<16x128xbf16, #tpu.memory_space<vmem>>, vector<16x128xbf16>,
    } else {
    }
    return
  }
  func.func @transform_0(%arg0: i32, %arg1: i32, %arg2: i32) -> (i32, i32) {
    %c0_i32 = arith.constant 0 : i32
    return %arg0, %arg2 : i32, i32
  }
  func.func @transform_1(%arg0: i32, %arg1: i32, %arg2: i32) -> (i32, i32) {
    %c0_i32 = arith.constant 0 : i32
    return %arg2, %arg1 : i32, i32
  }
  func.func @transform_2(%arg0: i32, %arg1: i32, %arg2: i32) -> (i32, i32) {
    %c0_i32 = arith.constant 0 : i32
    %c0_i32_0 = arith.constant 0 : i32
    return %c0_i32, %arg1 : i32, i32
  }
  func.func @transform_3(%arg0: i32, %arg1: i32, %arg2: i32) -> (i32, i32) {
    %c0_i32 = arith.constant 0 : i32
    %c0_i32_0 = arith.constant 0 : i32
    return %c0_i32, %arg1 : i32, i32
  }
  func.func @transform_4(%arg0: i32, %arg1: i32, %arg2: i32) -> (i32, i32) {
    %c0_i32 = arith.constant 0 : i32
    return %arg0, %arg1 : i32, i32
  }
}

module attributes {stable_mosaic.version = 11 : i64} {
  func.func @_fused_kernel(%arg0: i32, %arg1: i32, %arg2: i32, %arg3: memref<16x384xbf16, #tpu.memory_space<vmem>>, %arg4: memref<384x128xbf16, #tpu.memory_space<vmem>>, %arg5: memref<1x128xf32, #tpu.memory_space<vmem>>, %arg6: memref<1x128xf32, #tpu.memory_space<vmem>>, %arg7: memref<16x128xbf16, #tpu.memory_space<vmem>>, %arg8: memref<16x128xf32, #tpu.memory_space<vmem>>) attributes {dimension_semantics = [#tpu.dimension_semantics<parallel>, #tpu.dimension_semantics<parallel>, #tpu.dimension_semantics<arbitrary>], iteration_bounds = array<i64: 1, 1, 3>, scalar_prefetch = 0 : i64, scratch_operands = 1 : i64, tpu.core_type = #tpu.core_type<tc>, window_params = [{transform_indices = @transform_0, window_bounds = array<i64: 16, 384>}, {transform_indices = @transform_1, window_bounds = array<i64: 384, 128>}, {transform_indices = @transform_2, window_bounds = array<i64: 1, 128>}, {transform_indices = @transform_3, window_bounds = array<i64: 1, 128>}, {transform_indices = @transform_4, window_bounds = array<i64: 16, 128>}]} {
    %c0_i32 = arith.constant 0 : i32
    %0 = arith.cmpi eq, %arg2, %c0_i32 : i32
    %1 = arith.extui %0 : i1 to i32
    %c0_i32_0 = arith.constant 0 : i32
    %2 = arith.cmpi ne, %1, %c0_i32_0 : i32
    scf.if %2 {
      %cst_9 = arith.constant 0.000000e+00 : f32
      %12 = vector.broadcast %cst_9 : f32 to vector<16x128xf32>
      %c0_10 = arith.constant 0 : index
      %c0_11 = arith.constant 0 : index
      %13 = vector.load %arg8[%c0_10, %c0_11] : memref<16x128xf32, #tpu.memory_space<vmem>>, vector<16x128xf32>
      tpu.vector_store %arg8[%c0_10, %c0_11], %12 {strides = array<i32>} : memref<16x128xf32, #tpu.memory_space<vmem>>, vector<16x128xf32>,
    } else {
    }
    %c0 = arith.constant 0 : index
    %c0_1 = arith.constant 0 : index
    %3 = vector.load %arg8[%c0, %c0_1] : memref<16x128xf32, #tpu.memory_space<vmem>>, vector<16x128xf32>
    %c0_2 = arith.constant 0 : index
    %c0_3 = arith.constant 0 : index
    %4 = vector.load %arg3[%c0_2, %c0_3] : memref<16x384xbf16, #tpu.memory_space<vmem>>, vector<16x384xbf16>
    %c0_4 = arith.constant 0 : index
    %c0_5 = arith.constant 0 : index
    %5 = vector.load %arg4[%c0_4, %c0_5] : memref<384x128xbf16, #tpu.memory_space<vmem>>, vector<384x128xbf16>
    %cst = arith.constant dense<0.000000e+00> : vector<16x128xf32>
    %6 = tpu.matmul %4, %5, %cst {dimension_numbers = #tpu.dot_dimension_numbers<[1], [0], [0], [1], [0, 0, 1, 1], [], []>} : vector<16x384xbf16>, vector<384x128xbf16>, vector<16x128xf32> -> vector<16x128xf32>
    %7 = arith.addf %3, %6 : vector<16x128xf32>
    %c0_6 = arith.constant 0 : index
    %c0_7 = arith.constant 0 : index
    %8 = vector.load %arg8[%c0_6, %c0_7] : memref<16x128xf32, #tpu.memory_space<vmem>>, vector<16x128xf32>
    tpu.vector_store %arg8[%c0_6, %c0_7], %7 {strides = array<i32>} : memref<16x128xf32, #tpu.memory_space<vmem>>, vector<16x128xf32>,
    %c2_i32 = arith.constant 2 : i32
    %9 = arith.cmpi eq, %arg2, %c2_i32 : i32
    %10 = arith.extui %9 : i1 to i32
    %c0_i32_8 = arith.constant 0 : i32
    %11 = arith.cmpi ne, %10, %c0_i32_8 : i32
    scf.if %11 {
      %c0_9 = arith.constant 0 : index
      %c0_10 = arith.constant 0 : index
      %12 = vector.load %arg8[%c0_9, %c0_10] : memref<16x128xf32, #tpu.memory_space<vmem>>, vector<16x128xf32>
      %c0_11 = arith.constant 0 : index
      %c0_12 = arith.constant 0 : index
      %13 = vector.load %arg5[%c0_11, %c0_12] : memref<1x128xf32, #tpu.memory_space<vmem>>, vector<1x128xf32>
      %14 = vector.broadcast %13 : vector<1x128xf32> to vector<16x128xf32>
      %15 = arith.mulf %12, %14 : vector<16x128xf32>
      %c0_13 = arith.constant 0 : index
      %c0_14 = arith.constant 0 : index
      %16 = vector.load %arg6[%c0_13, %c0_14] : memref<1x128xf32, #tpu.memory_space<vmem>>, vector<1x128xf32>
      %17 = vector.broadcast %16 : vector<1x128xf32> to vector<16x128xf32>
      %18 = arith.addf %15, %17 : vector<16x128xf32>
      %cst_15 = arith.constant 0.000000e+00 : f32
      %19 = vector.broadcast %cst_15 : f32 to vector<16x128xf32>
      %20 = arith.maximumf %18, %19 : vector<16x128xf32>
      %21 = arith.truncf %20 : vector<16x128xf32> to vector<16x128xbf16>
      %c0_16 = arith.constant 0 : index
      %c0_17 = arith.constant 0 : index
      %22 = vector.load %arg7[%c0_16, %c0_17] : memref<16x128xbf16, #tpu.memory_space<vmem>>, vector<16x128xbf16>
      tpu.vector_store %arg7[%c0_16, %c0_17], %21 {strides = array<i32>} : memref<16x128xbf16, #tpu.memory_space<vmem>>, vector<16x128xbf16>,
    } else {
    }
    return
  }
  func.func @transform_0(%arg0: i32, %arg1: i32, %arg2: i32) -> (i32, i32) {
    %c0_i32 = arith.constant 0 : i32
    return %arg0, %arg2 : i32, i32
  }
  func.func @transform_1(%arg0: i32, %arg1: i32, %arg2: i32) -> (i32, i32) {
    %c0_i32 = arith.constant 0 : i32
    return %arg2, %arg1 : i32, i32
  }
  func.func @transform_2(%arg0: i32, %arg1: i32, %arg2: i32) -> (i32, i32) {
    %c0_i32 = arith.constant 0 : i32
    %c0_i32_0 = arith.constant 0 : i32
    return %c0_i32, %arg1 : i32, i32
  }
  func.func @transform_3(%arg0: i32, %arg1: i32, %arg2: i32) -> (i32, i32) {
    %c0_i32 = arith.constant 0 : i32
    %c0_i32_0 = arith.constant 0 : i32
    return %c0_i32, %arg1 : i32, i32
  }
  func.func @transform_4(%arg0: i32, %arg1: i32, %arg2: i32) -> (i32, i32) {
    %c0_i32 = arith.constant 0 : i32
    return %arg0, %arg1 : i32, i32
  }
}

module attributes {stable_mosaic.version = 11 : i64} {
  func.func @_fused_kernel(%arg0: i32, %arg1: i32, %arg2: i32, %arg3: memref<16x128xbf16, #tpu.memory_space<vmem>>, %arg4: memref<128x128xbf16, #tpu.memory_space<vmem>>, %arg5: memref<1x128xf32, #tpu.memory_space<vmem>>, %arg6: memref<1x128xf32, #tpu.memory_space<vmem>>, %arg7: memref<16x128xbf16, #tpu.memory_space<vmem>>, %arg8: memref<16x128xbf16, #tpu.memory_space<vmem>>, %arg9: memref<16x128xf32, #tpu.memory_space<vmem>>) attributes {dimension_semantics = [#tpu.dimension_semantics<parallel>, #tpu.dimension_semantics<parallel>, #tpu.dimension_semantics<arbitrary>], iteration_bounds = array<i64: 1, 1, 1>, scalar_prefetch = 0 : i64, scratch_operands = 1 : i64, tpu.core_type = #tpu.core_type<tc>, window_params = [{transform_indices = @transform_0, window_bounds = array<i64: 16, 128>}, {transform_indices = @transform_1, window_bounds = array<i64: 128, 128>}, {transform_indices = @transform_2, window_bounds = array<i64: 1, 128>}, {transform_indices = @transform_3, window_bounds = array<i64: 1, 128>}, {transform_indices = @transform_4, window_bounds = array<i64: 16, 128>}, {transform_indices = @transform_5, window_bounds = array<i64: 16, 128>}]} {
    %c0_i32 = arith.constant 0 : i32
    %0 = arith.cmpi eq, %arg2, %c0_i32 : i32
    %1 = arith.extui %0 : i1 to i32
    %c0_i32_0 = arith.constant 0 : i32
    %2 = arith.cmpi ne, %1, %c0_i32_0 : i32
    scf.if %2 {
      %cst_10 = arith.constant 0.000000e+00 : f32
      %12 = vector.broadcast %cst_10 : f32 to vector<16x128xf32>
      %c0_11 = arith.constant 0 : index
      %c0_12 = arith.constant 0 : index
      %13 = vector.load %arg9[%c0_11, %c0_12] : memref<16x128xf32, #tpu.memory_space<vmem>>, vector<16x128xf32>
      tpu.vector_store %arg9[%c0_11, %c0_12], %12 {strides = array<i32>} : memref<16x128xf32, #tpu.memory_space<vmem>>, vector<16x128xf32>,
    } else {
    }
    %c0 = arith.constant 0 : index
    %c0_1 = arith.constant 0 : index
    %3 = vector.load %arg9[%c0, %c0_1] : memref<16x128xf32, #tpu.memory_space<vmem>>, vector<16x128xf32>
    %c0_2 = arith.constant 0 : index
    %c0_3 = arith.constant 0 : index
    %4 = vector.load %arg3[%c0_2, %c0_3] : memref<16x128xbf16, #tpu.memory_space<vmem>>, vector<16x128xbf16>
    %c0_4 = arith.constant 0 : index
    %c0_5 = arith.constant 0 : index
    %5 = vector.load %arg4[%c0_4, %c0_5] : memref<128x128xbf16, #tpu.memory_space<vmem>>, vector<128x128xbf16>
    %cst = arith.constant dense<0.000000e+00> : vector<16x128xf32>
    %6 = tpu.matmul %4, %5, %cst {dimension_numbers = #tpu.dot_dimension_numbers<[1], [0], [0], [1], [0, 0, 1, 1], [], []>} : vector<16x128xbf16>, vector<128x128xbf16>, vector<16x128xf32> -> vector<16x128xf32>
    %7 = arith.addf %3, %6 : vector<16x128xf32>
    %c0_6 = arith.constant 0 : index
    %c0_7 = arith.constant 0 : index
    %8 = vector.load %arg9[%c0_6, %c0_7] : memref<16x128xf32, #tpu.memory_space<vmem>>, vector<16x128xf32>
    tpu.vector_store %arg9[%c0_6, %c0_7], %7 {strides = array<i32>} : memref<16x128xf32, #tpu.memory_space<vmem>>, vector<16x128xf32>,
    %c0_i32_8 = arith.constant 0 : i32
    %9 = arith.cmpi eq, %arg2, %c0_i32_8 : i32
    %10 = arith.extui %9 : i1 to i32
    %c0_i32_9 = arith.constant 0 : i32
    %11 = arith.cmpi ne, %10, %c0_i32_9 : i32
    scf.if %11 {
      %c0_10 = arith.constant 0 : index
      %c0_11 = arith.constant 0 : index
      %12 = vector.load %arg9[%c0_10, %c0_11] : memref<16x128xf32, #tpu.memory_space<vmem>>, vector<16x128xf32>
      %c0_12 = arith.constant 0 : index
      %c0_13 = arith.constant 0 : index
      %13 = vector.load %arg5[%c0_12, %c0_13] : memref<1x128xf32, #tpu.memory_space<vmem>>, vector<1x128xf32>
      %14 = vector.broadcast %13 : vector<1x128xf32> to vector<16x128xf32>
      %15 = arith.mulf %12, %14 : vector<16x128xf32>
      %c0_14 = arith.constant 0 : index
      %c0_15 = arith.constant 0 : index
      %16 = vector.load %arg6[%c0_14, %c0_15] : memref<1x128xf32, #tpu.memory_space<vmem>>, vector<1x128xf32>
      %17 = vector.broadcast %16 : vector<1x128xf32> to vector<16x128xf32>
      %18 = arith.addf %15, %17 : vector<16x128xf32>
      %c0_16 = arith.constant 0 : index
      %c0_17 = arith.constant 0 : index
      %19 = vector.load %arg7[%c0_16, %c0_17] : memref<16x128xbf16, #tpu.memory_space<vmem>>, vector<16x128xbf16>
      %20 = arith.extf %19 : vector<16x128xbf16> to vector<16x128xf32>
      %21 = arith.addf %18, %20 : vector<16x128xf32>
      %cst_18 = arith.constant 0.000000e+00 : f32
      %22 = vector.broadcast %cst_18 : f32 to vector<16x128xf32>
      %23 = arith.maximumf %21, %22 : vector<16x128xf32>
      %24 = arith.truncf %23 : vector<16x128xf32> to vector<16x128xbf16>
      %c0_19 = arith.constant 0 : index
      %c0_20 = arith.constant 0 : index
      %25 = vector.load %arg8[%c0_19, %c0_20] : memref<16x128xbf16, #tpu.memory_space<vmem>>, vector<16x128xbf16>
      tpu.vector_store %arg8[%c0_19, %c0_20], %24 {strides = array<i32>} : memref<16x128xbf16, #tpu.memory_space<vmem>>, vector<16x128xbf16>,
    } else {
    }
    return
  }
  func.func @transform_0(%arg0: i32, %arg1: i32, %arg2: i32) -> (i32, i32) {
    %c0_i32 = arith.constant 0 : i32
    return %arg0, %arg2 : i32, i32
  }
  func.func @transform_1(%arg0: i32, %arg1: i32, %arg2: i32) -> (i32, i32) {
    %c0_i32 = arith.constant 0 : i32
    return %arg2, %arg1 : i32, i32
  }
  func.func @transform_2(%arg0: i32, %arg1: i32, %arg2: i32) -> (i32, i32) {
    %c0_i32 = arith.constant 0 : i32
    %c0_i32_0 = arith.constant 0 : i32
    return %c0_i32, %arg1 : i32, i32
  }
  func.func @transform_3(%arg0: i32, %arg1: i32, %arg2: i32) -> (i32, i32) {
    %c0_i32 = arith.constant 0 : i32
    %c0_i32_0 = arith.constant 0 : i32
    return %c0_i32, %arg1 : i32, i32
  }
  func.func @transform_4(%arg0: i32, %arg1: i32, %arg2: i32) -> (i32, i32) {
    %c0_i32 = arith.constant 0 : i32
    return %arg0, %arg1 : i32, i32
  }
  func.func @transform_5(%arg0: i32, %arg1: i32, %arg2: i32) -> (i32, i32) {
    %c0_i32 = arith.constant 0 : i32
    return %arg0, %arg1 : i32, i32
  }
}

module attributes {stable_mosaic.version = 11 : i64} {
  func.func @_fused_kernel(%arg0: i32, %arg1: i32, %arg2: i32, %arg3: memref<16x128xbf16, #tpu.memory_space<vmem>>, %arg4: memref<128x128xbf16, #tpu.memory_space<vmem>>, %arg5: memref<1x128xf32, #tpu.memory_space<vmem>>, %arg6: memref<1x128xf32, #tpu.memory_space<vmem>>, %arg7: memref<16x128xbf16, #tpu.memory_space<vmem>>, %arg8: memref<16x128xf32, #tpu.memory_space<vmem>>) attributes {dimension_semantics = [#tpu.dimension_semantics<parallel>, #tpu.dimension_semantics<parallel>, #tpu.dimension_semantics<arbitrary>], iteration_bounds = array<i64: 1, 1, 1>, scalar_prefetch = 0 : i64, scratch_operands = 1 : i64, tpu.core_type = #tpu.core_type<tc>, window_params = [{transform_indices = @transform_0, window_bounds = array<i64: 16, 128>}, {transform_indices = @transform_1, window_bounds = array<i64: 128, 128>}, {transform_indices = @transform_2, window_bounds = array<i64: 1, 128>}, {transform_indices = @transform_3, window_bounds = array<i64: 1, 128>}, {transform_indices = @transform_4, window_bounds = array<i64: 16, 128>}]} {
    %c0_i32 = arith.constant 0 : i32
    %0 = arith.cmpi eq, %arg2, %c0_i32 : i32
    %1 = arith.extui %0 : i1 to i32
    %c0_i32_0 = arith.constant 0 : i32
    %2 = arith.cmpi ne, %1, %c0_i32_0 : i32
    scf.if %2 {
      %cst_10 = arith.constant 0.000000e+00 : f32
      %12 = vector.broadcast %cst_10 : f32 to vector<16x128xf32>
      %c0_11 = arith.constant 0 : index
      %c0_12 = arith.constant 0 : index
      %13 = vector.load %arg8[%c0_11, %c0_12] : memref<16x128xf32, #tpu.memory_space<vmem>>, vector<16x128xf32>
      tpu.vector_store %arg8[%c0_11, %c0_12], %12 {strides = array<i32>} : memref<16x128xf32, #tpu.memory_space<vmem>>, vector<16x128xf32>,
    } else {
    }
    %c0 = arith.constant 0 : index
    %c0_1 = arith.constant 0 : index
    %3 = vector.load %arg8[%c0, %c0_1] : memref<16x128xf32, #tpu.memory_space<vmem>>, vector<16x128xf32>
    %c0_2 = arith.constant 0 : index
    %c0_3 = arith.constant 0 : index
    %4 = vector.load %arg3[%c0_2, %c0_3] : memref<16x128xbf16, #tpu.memory_space<vmem>>, vector<16x128xbf16>
    %c0_4 = arith.constant 0 : index
    %c0_5 = arith.constant 0 : index
    %5 = vector.load %arg4[%c0_4, %c0_5] : memref<128x128xbf16, #tpu.memory_space<vmem>>, vector<128x128xbf16>
    %cst = arith.constant dense<0.000000e+00> : vector<16x128xf32>
    %6 = tpu.matmul %4, %5, %cst {dimension_numbers = #tpu.dot_dimension_numbers<[1], [0], [0], [1], [0, 0, 1, 1], [], []>} : vector<16x128xbf16>, vector<128x128xbf16>, vector<16x128xf32> -> vector<16x128xf32>
    %7 = arith.addf %3, %6 : vector<16x128xf32>
    %c0_6 = arith.constant 0 : index
    %c0_7 = arith.constant 0 : index
    %8 = vector.load %arg8[%c0_6, %c0_7] : memref<16x128xf32, #tpu.memory_space<vmem>>, vector<16x128xf32>
    tpu.vector_store %arg8[%c0_6, %c0_7], %7 {strides = array<i32>} : memref<16x128xf32, #tpu.memory_space<vmem>>, vector<16x128xf32>,
    %c0_i32_8 = arith.constant 0 : i32
    %9 = arith.cmpi eq, %arg2, %c0_i32_8 : i32
    %10 = arith.extui %9 : i1 to i32
    %c0_i32_9 = arith.constant 0 : i32
    %11 = arith.cmpi ne, %10, %c0_i32_9 : i32
    scf.if %11 {
      %c0_10 = arith.constant 0 : index
      %c0_11 = arith.constant 0 : index
      %12 = vector.load %arg8[%c0_10, %c0_11] : memref<16x128xf32, #tpu.memory_space<vmem>>, vector<16x128xf32>
      %c0_12 = arith.constant 0 : index
      %c0_13 = arith.constant 0 : index
      %13 = vector.load %arg5[%c0_12, %c0_13] : memref<1x128xf32, #tpu.memory_space<vmem>>, vector<1x128xf32>
      %14 = vector.broadcast %13 : vector<1x128xf32> to vector<16x128xf32>
      %15 = arith.mulf %12, %14 : vector<16x128xf32>
      %c0_14 = arith.constant 0 : index
      %c0_15 = arith.constant 0 : index
      %16 = vector.load %arg6[%c0_14, %c0_15] : memref<1x128xf32, #tpu.memory_space<vmem>>, vector<1x128xf32>
      %17 = vector.broadcast %16 : vector<1x128xf32> to vector<16x128xf32>
      %18 = arith.addf %15, %17 : vector<16x128xf32>
      %cst_16 = arith.constant 0.000000e+00 : f32
      %19 = vector.broadcast %cst_16 : f32 to vector<16x128xf32>
      %20 = arith.maximumf %18, %19 : vector<16x128xf32>
      %21 = arith.truncf %20 : vector<16x128xf32> to vector<16x128xbf16>
      %c0_17 = arith.constant 0 : index
      %c0_18 = arith.constant 0 : index
      %22 = vector.load %arg7[%c0_17, %c0_18] : memref<16x128xbf16, #tpu.memory_space<vmem>>, vector<16x128xbf16>
      tpu.vector_store %arg7[%c0_17, %c0_18], %21 {strides = array<i32>} : memref<16x128xbf16, #tpu.memory_space<vmem>>, vector<16x128xbf16>,
    } else {
    }
    return
  }
  func.func @transform_0(%arg0: i32, %arg1: i32, %arg2: i32) -> (i32, i32) {
    %c0_i32 = arith.constant 0 : i32
    return %arg0, %arg2 : i32, i32
  }
  func.func @transform_1(%arg0: i32, %arg1: i32, %arg2: i32) -> (i32, i32) {
    %c0_i32 = arith.constant 0 : i32
    return %arg2, %arg1 : i32, i32
  }
  func.func @transform_2(%arg0: i32, %arg1: i32, %arg2: i32) -> (i32, i32) {
    %c0_i32 = arith.constant 0 : i32
    %c0_i32_0 = arith.constant 0 : i32
    return %c0_i32, %arg1 : i32, i32
  }
  func.func @transform_3(%arg0: i32, %arg1: i32, %arg2: i32) -> (i32, i32) {
    %c0_i32 = arith.constant 0 : i32
    %c0_i32_0 = arith.constant 0 : i32
    return %c0_i32, %arg1 : i32, i32
  }
  func.func @transform_4(%arg0: i32, %arg1: i32, %arg2: i32) -> (i32, i32) {
    %c0_i32 = arith.constant 0 : i32
    return %arg0, %arg1 : i32, i32
  }
}

</mosaic_0001>

<bundles_post_ra>
// kernel: _lambda_.32
= control target key start
LH: loop header
LB: loop body
LE: loop exit
PB: predicated region body
PF: predicated region fallthrough
CT: control target
= control target key end

     0   :  { %s740_s1 = inlined_call_operand.vmem [shape: bf16[128,128], index: 1, kind: input, shape index: {}]   ;;  %s741_s0 = inlined_call_operand.vmem [shape: bf16[128,128], index: 0, kind: input, shape index: {}]   ;;  %s742_s2 = inlined_call_operand.vmem [shape: f32[1,128], index: 2, kind: input, shape index: {}]   ;;  %s743_s3 = inlined_call_operand.vmem [shape: f32[1,128], index: 3, kind: input, shape index: {}]   ;;  %s744_s4 = inlined_call_operand.vmem [shape: bf16[128,128], index: 4, kind: output, shape index: {}]  }
   0x1   :  { %v621_v0 = vld [vmem:[%s740_s1 + $0x38] sm:$0xff]   ;;  %v622_v1 = vld [vmem:[%s740_s1 + $0x30] sm:$0xff]   ;;  %v623_v2 = vld [vmem:[%s740_s1 + $0x28] sm:$0xff]  }
   0x2   :  { %573 = vmatprep.subr.bf16.mxu0 %v621_v0  ;;  %605 = vmatprep.subr.bf16.mxu1 %v621_v0  ;;  %v624_v3 = vld [vmem:[%s740_s1 + $0x20] sm:$0xff]   ;;  %v625_v6 = vld [vmem:[%s740_s1 + $0x18] sm:$0xff]   ;;  %v626_v7 = vld [vmem:[%s740_s1 + $0x10] sm:$0xff]  }
   0x3   :  { %574 = vmatpush3.bf16.msra.mxu0 %v621_v0  ;;  %613 = vmatpush3.bf16.msra.mxu1 %v621_v0  ;;  %v629_v4 = vld [vmem:[%s741_s0] sm:$0xff]   ;;  %v627_v8 = vld [vmem:[%s740_s1 + $0x8] sm:$0xff]   ;;  %v633_v12 = vld [vmem:[%s741_s0 + $0x10] sm:$0xff]  }
   0x4   :  { %575 = vmatprep.subr.bf16.mxu0 %v622_v1  ;;  %606 = vmatprep.subr.bf16.mxu1 %v622_v1  ;;  %v630_v5 = vld [vmem:[%s741_s0 + $0x20] sm:$0xff]   ;;  %v631_v10 = vld [vmem:[%s741_s0 + $0x8] sm:$0xff]   ;;  %v634_v13 = vld [vmem:[%s741_s0 + $0x30] sm:$0xff]  }
   0x5   :  { %589 = vmatprep.mubr.bf16.mxu0 %v629_v4  ;;  %597 = vmatprep.mubr.bf16.mxu1 %v630_v5  ;;  %v628_v9 = vld [vmem:[%s740_s1] sm:$0xff]   ;;  %v632_v11 = vld [vmem:[%s741_s0 + $0x28] sm:$0xff]   ;;  %v635_v14 = vld [vmem:[%s741_s0 + $0x18] sm:$0xff]  }
   0x6   :  { %v636_v15 = vld [vmem:[%s741_s0 + $0x38] sm:$0xff]   ;;  %v476_v16 = vld [vmem:[%s742_s2] ss:$0 sm:$0xff] }
   0x7   :  { %576 = vmatpush3.bf16.msra.mxu0 %v622_v1  ;;  %614 = vmatpush3.bf16.msra.mxu1 %v622_v1  ;;  %v477_v23 = vld [vmem:[%s743_s3] ss:$0 sm:$0xff] }
   0x8   :  { %577 = vmatprep.subr.bf16.mxu0 %v623_v2  ;;  %607 = vmatprep.subr.bf16.mxu1 %v623_v2 }
   0xb   :  { %578 = vmatpush3.bf16.msra.mxu0 %v623_v2  ;;  %615 = vmatpush3.bf16.msra.mxu1 %v623_v2 }
   0xc   :  { %579 = vmatprep.subr.bf16.mxu0 %v624_v3  ;;  %608 = vmatprep.subr.bf16.mxu1 %v624_v3 }
   0xf   :  { %580 = vmatpush3.bf16.msra.mxu0 %v624_v3  ;;  %616 = vmatpush3.bf16.msra.mxu1 %v624_v3 }
  0x10   :  { %581 = vmatprep.subr.bf16.mxu0 %v625_v6  ;;  %609 = vmatprep.subr.bf16.mxu1 %v625_v6 }
  0x13   :  { %582 = vmatpush3.bf16.msra.mxu0 %v625_v6  ;;  %617 = vmatpush3.bf16.msra.mxu1 %v625_v6 }
  0x14   :  { %583 = vmatprep.subr.bf16.mxu0 %v626_v7  ;;  %610 = vmatprep.subr.bf16.mxu1 %v626_v7 }
  0x17   :  { %584 = vmatpush3.bf16.msra.mxu0 %v626_v7  ;;  %618 = vmatpush3.bf16.msra.mxu1 %v626_v7 }
  0x18   :  { %585 = vmatprep.subr.bf16.mxu0 %v627_v8  ;;  %611 = vmatprep.subr.bf16.mxu1 %v627_v8 }
  0x1b   :  { %586 = vmatpush3.bf16.msra.mxu0 %v627_v8  ;;  %619 = vmatpush3.bf16.msra.mxu1 %v627_v8 }
  0x1c   :  { %587 = vmatprep.subr.bf16.mxu0 %v628_v9  ;;  %612 = vmatprep.subr.bf16.mxu1 %v628_v9 }
  0x1f   :  { %588 = vmatpush3.bf16.msra.mxu0 %v628_v9  ;;  %620 = vmatpush3.bf16.msra.mxu1 %v628_v9 }
  0x22   :  { %590 = vmatmul.mubr.bf16.vlgmr.msra.gmra.mxu0 %v631_v10  ;;  %598 = vmatmul.mubr.bf16.vlgmr.msra.gmra.mxu1 %v632_v11 }
  0x23   :  { %593 = vmatprep.mubr.bf16.mxu0 %v633_v12  ;;  %601 = vmatprep.mubr.bf16.mxu1 %v634_v13 }
  0x2a   :  { %594 = vmatmul.mubr.bf16.gmra.mxu0 %v635_v14  ;;  %602 = vmatmul.mubr.bf16.gmra.mxu1 %v636_v15 }
  0xe2   :  { %v591_v17 = vpop.f32.mrf.mxu0  ;;  %v599_v18 = vpop.f32.mrf.mxu1 }
  0xe3   :  { %v339_v19 = vmul.f32 %v591_v17, %v476_v16  ;;  %v347_v20 = vmul.f32 %v599_v18, %v476_v16 }
  0xe4   :  { %v216_v21 = vpop.f32.mrf.mxu0  ;;  %v248_v22 = vpop.f32.mrf.mxu1 }
  0xe5   :  { %v337_v24 = vmul.f32 %v476_v16, %v216_v21  ;;  %v345_v25 = vmul.f32 %v476_v16, %v248_v22  ;;  %v362_v30 = vadd.f32 %v477_v23, %v339_v19  ;;  %v370_v31 = vadd.f32 %v477_v23, %v347_v20 }
  0xe6   :  { %v592_v26 = vpop.f32.mrf.mxu0  ;;  %v600_v27 = vpop.f32.mrf.mxu1 }
  0xe7   :  { %v340_v28 = vmul.f32 %v592_v26, %v476_v16  ;;  %v348_v29 = vmul.f32 %v600_v27, %v476_v16  ;;  %v360_v38 = vadd.f32 %v477_v23, %v337_v24  ;;  %v368_v39 = vadd.f32 %v477_v23, %v345_v25 }
  0xe8   :  { %v219_v32 = vpop.f32.mrf.mxu0  ;;  %v251_v33 = vpop.f32.mrf.mxu1 }
  0xe9   :  { %v363_v34 = vadd.f32 %v477_v23, %v340_v28  ;;  %v371_v35 = vadd.f32 %v477_v23, %v348_v29  ;;  %v338_v36 = vmul.f32 %v476_v16, %v219_v32  ;;  %v346_v37 = vmul.f32 %v476_v16, %v251_v33 }
  0xea   :  { %v595_v40 = vpop.f32.mrf.mxu0  ;;  %v603_v41 = vpop.f32.mrf.mxu1 }
  0xeb   :  { %v518_v42 = vpack.c.bf16 %v363_v34, %v362_v30  ;;  %v538_v43 = vpack.c.bf16 %v371_v35, %v370_v31  ;;  %v361_v44 = vadd.f32 %v477_v23, %v338_v36  ;;  %v369_v45 = vadd.f32 %v477_v23, %v346_v37 }
  0xec   :  { %v343_v46 = vmul.f32 %v595_v40, %v476_v16  ;;  %v351_v47 = vmul.f32 %v603_v41, %v476_v16  ;;  %v232_v48 = vpop.f32.mrf.mxu0  ;;  %v264_v49 = vpop.f32.mrf.mxu1 }
  0xed   :  { %550 = vst [vmem:[%s744_s4 + $0x8] sm:$0xff] %v518_v42   ;;  %554 = vst [vmem:[%s744_s4 + $0x28] sm:$0xff] %v538_v43   ;;  %v513_v50 = vpack.c.bf16 %v361_v44, %v360_v38  ;;  %v533_v51 = vpack.c.bf16 %v369_v45, %v368_v39  ;;  %v341_v52 = vmul.f32 %v476_v16, %v232_v48 }
  0xee   :  { %v349_v53 = vmul.f32 %v476_v16, %v264_v49  ;;  %v596_v54 = vpop.f32.mrf.mxu0  ;;  %v604_v55 = vpop.f32.mrf.mxu1  ;;  %v366_v58 = vadd.f32 %v477_v23, %v343_v46  ;;  %v374_v59 = vadd.f32 %v477_v23, %v351_v47 }
  0xef   :  { %514 = vst [vmem:[%s744_s4] sm:$0xff] %v513_v50   ;;  %553 = vst [vmem:[%s744_s4 + $0x20] sm:$0xff] %v533_v51   ;;  %v344_v56 = vmul.f32 %v596_v54, %v476_v16  ;;  %v352_v57 = vmul.f32 %v604_v55, %v476_v16  ;;  %v364_v2 = vadd.f32 %v477_v23, %v341_v52 }
  0xf0   :  { %v235_v60 = vpop.f32.mrf.mxu0  ;;  %v267_v61 = vpop.f32.mrf.mxu1  ;;  %v372_v3 = vadd.f32 %v477_v23, %v349_v53 }
  0xf1   :  { %v367_v62 = vadd.f32 %v477_v23, %v344_v56  ;;  %v375_v63 = vadd.f32 %v477_v23, %v352_v57  ;;  %v342_v0 = vmul.f32 %v476_v16, %v235_v60  ;;  %v350_v1 = vmul.f32 %v476_v16, %v267_v61 }
  0xf3   :  { %v528_v4 = vpack.c.bf16 %v367_v62, %v366_v58  ;;  %v548_v5 = vpack.c.bf16 %v375_v63, %v374_v59  ;;  %v365_v6 = vadd.f32 %v477_v23, %v342_v0  ;;  %v373_v7 = vadd.f32 %v477_v23, %v350_v1 }
  0xf5   :  { %552 = vst [vmem:[%s744_s4 + $0x18] sm:$0xff] %v528_v4   ;;  %556 = vst [vmem:[%s744_s4 + $0x38] sm:$0xff] %v548_v5   ;;  %v523_v8 = vpack.c.bf16 %v365_v6, %v364_v2  ;;  %v543_v9 = vpack.c.bf16 %v373_v7, %v372_v3 }
  0xf7   :  { %551 = vst [vmem:[%s744_s4 + $0x10] sm:$0xff] %v523_v8   ;;  %555 = vst [vmem:[%s744_s4 + $0x30] sm:$0xff] %v543_v9  }

// kernel: _lambda_.29
= control target key start
LH: loop header
LB: loop body
LE: loop exit
PB: predicated region body
PF: predicated region fallthrough
CT: control target
= control target key end

     0   :  { %s2600_s15 = smov 0   ;;  %s2602_s16 = smov 0   ;;  %s3030_s0 = inlined_call_operand.vmem [shape: bf16[512,1152], index: 0, kind: input, shape index: {}]   ;;  %s3031_s1 = inlined_call_operand.vmem [shape: bf16[1152,128], index: 1, kind: input, shape index: {}]   ;;  %s3032_s2 = inlined_call_operand.vmem [shape: f32[1,128], index: 2, kind: input, shape index: {}]   ;;  %s3033_s3 = inlined_call_operand.vmem [shape: f32[1,128], index: 3, kind: input, shape index: {}]   ;;  %s3034_s4 = inlined_call_operand.vmem [shape: bf16[512,128], index: 4, kind: output, shape index: {}]  }
   0x1   :  { %s2604_s17 = smov 0   ;;  %s2606_s18 = smov 0  }
   0x2   :  { %s2608_s19 = smov 0   ;;  %s2610_s20 = smov 0  }
   0x3   :  { %s2612_s21 = smov 0  }
   0x4 LB: > { %s26_s22 = sadd.s32 1, %s2564_s19  ;;  %s33_s23 = sadd.s32 1, %s2568_s20  ;;  %s2572_s21 = sphi %s2612_s21, %s14_s21   ;;  %s2568_s20 = sphi %s2610_s20, %s3040_s20   ;;  %s2564_s19 = sphi %s2608_s19, %s3039_s19   ;;  %s2560_s18 = sphi %s2606_s18, %s3038_s18   ;;  %s2556_s17 = sphi %s2604_s17, %s3037_s17   ;;  %s2552_s16 = sphi %s2602_s16, %s3036_s16   ;;  %s2548_s15 = sphi %s2600_s15, %s3035_s15  }
   0x5   : > { %p27_p0 = scmp.ge.s32.totalorder %s26_s22, 3  ;;  %p49_p1 = scmp.ne.s32.totalorder %s2552_s16, %s2548_s15 }
   0x6   : > { %p50_p2 = scmp.eq.s32.totalorder %s2572_s21, 0  ;;  %s42_s27 = sadd.s32 1, %s2552_s16 }
   0x7   : > { %s3042_s22 = smov (%p27_p0, %s26_s22), 0  ;;  %s3044_s23 = smov (!%p27_p0, %s33_s23), %s2568_s20 }
   0x8   : > { %p51_p3 = por %p50_p2, %p49_p1  ;;  %p35_p4 = scmp.ge.s32.totalorder %s3044_s23, 2 }
   0x9   : > { %s38_s24 = ssub.s32 %s2564_s19, %s3042_s22  ;;  %p1861_p6 = scmp.ge.s32.totalorder %s2572_s21, 6 }
   0xa   : > { %s3046_s23 = smov (%p35_p4, %s3044_s23), 0 }
   0xb   : > { %s37_s25 = ssub.s32 %s2568_s20, %s3046_s23  ;;  %195 = sbr.rel (%p1861_p6) target bundleno = 62 (0x3e), region = 24 }
   0xc   : > { %s39_s26 = sor.u32 %s38_s24, %s37_s25 }
   0xd   : > { %p40_p5 = scmp.eq.s32.totalorder %s39_s26, 0 }
   0xf   : > { %s2651_s28 = scalar_select %p40_p5, %s2552_s16, %s42_s27  }
  0x10   : > { %198 = sbr.rel (!%p51_p3) target bundleno = 62 (0x3e), region = 28  ;;  %s200_s29 = sand.u32 (%p51_p3), 1, %s2552_s16  }
  0x11   : > { %s204_s30 = smul.u32 (%p51_p3), 3, %s2564_s19 }
  0x12   : > { %s2370_s5 = smul.u32 (%p51_p3), 384, %s200_s29 }
  0x13   : > { %s2371_s6 = smul.u32 (%p51_p3), 288, %s2568_s20 }
  0x14   : > { %s2665_s12 = scalar_lea.vmem (%p51_p3), [#allocation3], %s2370_s5 }
  0x15   : > { %s206_s7 = sadd.s32 %s2371_s6, %s204_s30 }
  0x16   : > { %s1864_s8 = sshll.u32 %s206_s7, 2 }
  0x17   : > { %s2660_s11 = scalar_lea.vmem %s3030_s0, %s1864_s8 }
  0x18   : > { %v223_v0 = vld [vmem:[%s2660_s11] sm:$0xff]  ;;  %v227_v2 = vld [vmem:[%s2660_s11 + $0x48] sm:$0xff]  ;;  %v231_v4 = vld [vmem:[%s2660_s11 + $0x90] sm:$0xff] }
  0x19   : > { %v225_v1 = vld [vmem:[%s2660_s11 + $0x24] sm:$0xff]  ;;  %224 = vst [vmem:[%s2665_s12] sm:$0xff] %v223_v0  ;;  %228 = vst [vmem:[%s2665_s12 + $0x18] sm:$0xff] %v227_v2  ;;  %v229_v3 = vld [vmem:[%s2660_s11 + $0x6c] sm:$0xff] }
  0x1a   : > { %226 = vst [vmem:[%s2665_s12 + $0xc] sm:$0xff] %v225_v1  ;;  %v233_v5 = vld [vmem:[%s2660_s11 + $0xb4] sm:$0xff]  ;;  %230 = vst [vmem:[%s2665_s12 + $0x24] sm:$0xff] %v229_v3  ;;  %v237_v7 = vld [vmem:[%s2660_s11 + $0xfc] sm:$0xff] }
  0x1b   : > { %232 = vst [vmem:[%s2665_s12 + $0x30] sm:$0xff] %v231_v4  ;;  %234 = vst [vmem:[%s2665_s12 + $0x3c] sm:$0xff] %v233_v5  ;;  %v235_v6 = vld [vmem:[%s2660_s11 + $0xd8] sm:$0xff]  ;;  %v239_v8 = vld [vmem:[%s2660_s11 + $0x120] sm:$0xff] }
  0x1c   : > { %236 = vst [vmem:[%s2665_s12 + $0x48] sm:$0xff] %v235_v6  ;;  %238 = vst [vmem:[%s2665_s12 + $0x54] sm:$0xff] %v237_v7  ;;  %v241_v9 = vld [vmem:[%s2660_s11 + $0x144] sm:$0xff]  ;;  %v245_v11 = vld [vmem:[%s2660_s11 + $0x18c] sm:$0xff] }
  0x1d   : > { %240 = vst [vmem:[%s2665_s12 + $0x60] sm:$0xff] %v239_v8  ;;  %v243_v10 = vld [vmem:[%s2660_s11 + $0x168] sm:$0xff]  ;;  %242 = vst [vmem:[%s2665_s12 + $0x6c] sm:$0xff] %v241_v9  ;;  %v247_v12 = vld [vmem:[%s2660_s11 + $0x1b0] sm:$0xff] }
  0x1e   : > { %244 = vst [vmem:[%s2665_s12 + $0x78] sm:$0xff] %v243_v10  ;;  %246 = vst [vmem:[%s2665_s12 + $0x84] sm:$0xff] %v245_v11  ;;  %v249_v13 = vld [vmem:[%s2660_s11 + $0x1d4] sm:$0xff]  ;;  %v253_v15 = vld [vmem:[%s2660_s11 + $0x21c] sm:$0xff] }
  0x1f   : > { %v251_v14 = vld [vmem:[%s2660_s11 + $0x1f8] sm:$0xff]  ;;  %248 = vst [vmem:[%s2665_s12 + $0x90] sm:$0xff] %v247_v12  ;;  %250 = vst [vmem:[%s2665_s12 + $0x9c] sm:$0xff] %v249_v13  ;;  %v255_v16 = vld [vmem:[%s2660_s11 + $0x240] sm:$0xff] }
  0x20   : > { %252 = vst [vmem:[%s2665_s12 + $0xa8] sm:$0xff] %v251_v14  ;;  %v257_v17 = vld [vmem:[%s2660_s11 + $0x264] sm:$0xff]  ;;  %254 = vst [vmem:[%s2665_s12 + $0xb4] sm:$0xff] %v253_v15  ;;  %v261_v19 = vld [vmem:[%s2660_s11 + $0x2ac] sm:$0xff] }
  0x21   : > { %256 = vst [vmem:[%s2665_s12 + $0xc0] sm:$0xff] %v255_v16  ;;  %258 = vst [vmem:[%s2665_s12 + $0xcc] sm:$0xff] %v257_v17  ;;  %v259_v18 = vld [vmem:[%s2660_s11 + $0x288] sm:$0xff]  ;;  %v263_v20 = vld [vmem:[%s2660_s11 + $0x2d0] sm:$0xff] }
  0x22   : > { %260 = vst [vmem:[%s2665_s12 + $0xd8] sm:$0xff] %v259_v18  ;;  %262 = vst [vmem:[%s2665_s12 + $0xe4] sm:$0xff] %v261_v19  ;;  %v265_v21 = vld [vmem:[%s2660_s11 + $0x2f4] sm:$0xff]  ;;  %v269_v23 = vld [vmem:[%s2660_s11 + $0x33c] sm:$0xff] }
  0x23   : > { %264 = vst [vmem:[%s2665_s12 + $0xf0] sm:$0xff] %v263_v20  ;;  %v267_v22 = vld [vmem:[%s2660_s11 + $0x318] sm:$0xff]  ;;  %266 = vst [vmem:[%s2665_s12 + $0xfc] sm:$0xff] %v265_v21  ;;  %v271_v24 = vld [vmem:[%s2660_s11 + $0x360] sm:$0xff] }
  0x24   : > { %268 = vst [vmem:[%s2665_s12 + $0x108] sm:$0xff] %v267_v22  ;;  %270 = vst [vmem:[%s2665_s12 + $0x114] sm:$0xff] %v269_v23  ;;  %v273_v25 = vld [vmem:[%s2660_s11 + $0x384] sm:$0xff]  ;;  %v277_v27 = vld [vmem:[%s2660_s11 + $0x3cc] sm:$0xff] }
  0x25   : > { %v275_v26 = vld [vmem:[%s2660_s11 + $0x3a8] sm:$0xff]  ;;  %272 = vst [vmem:[%s2665_s12 + $0x120] sm:$0xff] %v271_v24  ;;  %274 = vst [vmem:[%s2665_s12 + $0x12c] sm:$0xff] %v273_v25  ;;  %v279_v28 = vld [vmem:[%s2660_s11 + $0x3f0] sm:$0xff] }
  0x26   : > { %276 = vst [vmem:[%s2665_s12 + $0x138] sm:$0xff] %v275_v26  ;;  %v281_v29 = vld [vmem:[%s2660_s11 + $0x414] sm:$0xff]  ;;  %278 = vst [vmem:[%s2665_s12 + $0x144] sm:$0xff] %v277_v27  ;;  %v285_v31 = vld [vmem:[%s2660_s11 + $0x45c] sm:$0xff] }
  0x27   : > { %280 = vst [vmem:[%s2665_s12 + $0x150] sm:$0xff] %v279_v28  ;;  %282 = vst [vmem:[%s2665_s12 + $0x15c] sm:$0xff] %v281_v29  ;;  %v283_v30 = vld [vmem:[%s2660_s11 + $0x438] sm:$0xff]  ;;  %v1865_v32 = vld [vmem:[%s2660_s11 + $0x8] sm:$0xf] }
  0x28   : > { %284 = vst [vmem:[%s2665_s12 + $0x168] sm:$0xff] %v283_v30  ;;  %286 = vst [vmem:[%s2665_s12 + $0x174] sm:$0xff] %v285_v31  ;;  %v1867_v33 = vld [vmem:[%s2660_s11 + $0x2c] sm:$0xf]  ;;  %v1869_v34 = vld [vmem:[%s2660_s11 + $0x50] sm:$0xf] }
  0x29   : > { %1866 = vst [vmem:[%s2665_s12 + $0x8] sm:$0xf] %v1865_v32  ;;  %v1871_v35 = vld [vmem:[%s2660_s11 + $0x74] sm:$0xf]  ;;  %1868 = vst [vmem:[%s2665_s12 + $0x14] sm:$0xf] %v1867_v33 }
  0x2a   : > { %1870 = vst [vmem:[%s2665_s12 + $0x20] sm:$0xf] %v1869_v34  ;;  %1872 = vst [vmem:[%s2665_s12 + $0x2c] sm:$0xf] %v1871_v35  ;;  %v1873_v36 = vld [vmem:[%s2660_s11 + $0x98] sm:$0xf] }
  0x2b   : > { %v1875_v37 = vld [vmem:[%s2660_s11 + $0xbc] sm:$0xf]  ;;  %v1877_v38 = vld [vmem:[%s2660_s11 + $0xe0] sm:$0xf]  ;;  %1874 = vst [vmem:[%s2665_s12 + $0x38] sm:$0xf] %v1873_v36 }
  0x2c   : > { %1876 = vst [vmem:[%s2665_s12 + $0x44] sm:$0xf] %v1875_v37  ;;  %1878 = vst [vmem:[%s2665_s12 + $0x50] sm:$0xf] %v1877_v38  ;;  %v1879_v39 = vld [vmem:[%s2660_s11 + $0x104] sm:$0xf] }
  0x2d   : > { %v1881_v40 = vld [vmem:[%s2660_s11 + $0x128] sm:$0xf]  ;;  %v1883_v41 = vld [vmem:[%s2660_s11 + $0x14c] sm:$0xf]  ;;  %1880 = vst [vmem:[%s2665_s12 + $0x5c] sm:$0xf] %v1879_v39 }
  0x2e   : > { %1882 = vst [vmem:[%s2665_s12 + $0x68] sm:$0xf] %v1881_v40  ;;  %1884 = vst [vmem:[%s2665_s12 + $0x74] sm:$0xf] %v1883_v41  ;;  %v1885_v42 = vld [vmem:[%s2660_s11 + $0x170] sm:$0xf] }
  0x2f   : > { %v1887_v43 = vld [vmem:[%s2660_s11 + $0x194] sm:$0xf]  ;;  %v1889_v44 = vld [vmem:[%s2660_s11 + $0x1b8] sm:$0xf]  ;;  %1886 = vst [vmem:[%s2665_s12 + $0x80] sm:$0xf] %v1885_v42 }
  0x30   : > { %1888 = vst [vmem:[%s2665_s12 + $0x8c] sm:$0xf] %v1887_v43  ;;  %1890 = vst [vmem:[%s2665_s12 + $0x98] sm:$0xf] %v1889_v44  ;;  %v1891_v45 = vld [vmem:[%s2660_s11 + $0x1dc] sm:$0xf] }
  0x31   : > { %v1893_v46 = vld [vmem:[%s2660_s11 + $0x200] sm:$0xf]  ;;  %v1895_v47 = vld [vmem:[%s2660_s11 + $0x224] sm:$0xf]  ;;  %1892 = vst [vmem:[%s2665_s12 + $0xa4] sm:$0xf] %v1891_v45 }
  0x32   : > { %1894 = vst [vmem:[%s2665_s12 + $0xb0] sm:$0xf] %v1893_v46  ;;  %1896 = vst [vmem:[%s2665_s12 + $0xbc] sm:$0xf] %v1895_v47  ;;  %v1897_v48 = vld [vmem:[%s2660_s11 + $0x248] sm:$0xf] }
  0x33   : > { %v1899_v49 = vld [vmem:[%s2660_s11 + $0x26c] sm:$0xf]  ;;  %v1901_v50 = vld [vmem:[%s2660_s11 + $0x290] sm:$0xf]  ;;  %1898 = vst [vmem:[%s2665_s12 + $0xc8] sm:$0xf] %v1897_v48 }
  0x34   : > { %1900 = vst [vmem:[%s2665_s12 + $0xd4] sm:$0xf] %v1899_v49  ;;  %1902 = vst [vmem:[%s2665_s12 + $0xe0] sm:$0xf] %v1901_v50  ;;  %v1903_v51 = vld [vmem:[%s2660_s11 + $0x2b4] sm:$0xf] }
  0x35   : > { %v1905_v52 = vld [vmem:[%s2660_s11 + $0x2d8] sm:$0xf]  ;;  %v1907_v53 = vld [vmem:[%s2660_s11 + $0x2fc] sm:$0xf]  ;;  %1904 = vst [vmem:[%s2665_s12 + $0xec] sm:$0xf] %v1903_v51 }
  0x36   : > { %1906 = vst [vmem:[%s2665_s12 + $0xf8] sm:$0xf] %v1905_v52  ;;  %1908 = vst [vmem:[%s2665_s12 + $0x104] sm:$0xf] %v1907_v53  ;;  %v1909_v54 = vld [vmem:[%s2660_s11 + $0x320] sm:$0xf] }
  0x37   : > { %v1911_v55 = vld [vmem:[%s2660_s11 + $0x344] sm:$0xf]  ;;  %v1913_v56 = vld [vmem:[%s2660_s11 + $0x368] sm:$0xf]  ;;  %1910 = vst [vmem:[%s2665_s12 + $0x110] sm:$0xf] %v1909_v54 }
  0x38   : > { %1912 = vst [vmem:[%s2665_s12 + $0x11c] sm:$0xf] %v1911_v55  ;;  %1914 = vst [vmem:[%s2665_s12 + $0x128] sm:$0xf] %v1913_v56  ;;  %v1915_v57 = vld [vmem:[%s2660_s11 + $0x38c] sm:$0xf] }
  0x39   : > { %v1917_v58 = vld [vmem:[%s2660_s11 + $0x3b0] sm:$0xf]  ;;  %v1919_v59 = vld [vmem:[%s2660_s11 + $0x3d4] sm:$0xf]  ;;  %1916 = vst [vmem:[%s2665_s12 + $0x134] sm:$0xf] %v1915_v57 }
  0x3a   : > { %1918 = vst [vmem:[%s2665_s12 + $0x140] sm:$0xf] %v1917_v58  ;;  %1920 = vst [vmem:[%s2665_s12 + $0x14c] sm:$0xf] %v1919_v59  ;;  %v1921_v60 = vld [vmem:[%s2660_s11 + $0x3f8] sm:$0xf] }
  0x3b   : > { %v1923_v61 = vld [vmem:[%s2660_s11 + $0x41c] sm:$0xf]  ;;  %v1925_v62 = vld [vmem:[%s2660_s11 + $0x440] sm:$0xf]  ;;  %1922 = vst [vmem:[%s2665_s12 + $0x158] sm:$0xf] %v1921_v60 }
  0x3c   : > { %1924 = vst [vmem:[%s2665_s12 + $0x164] sm:$0xf] %v1923_v61  ;;  %1926 = vst [vmem:[%s2665_s12 + $0x170] sm:$0xf] %v1925_v62  ;;  %v1927_v63 = vld [vmem:[%s2660_s11 + $0x464] sm:$0xf] }
  0x3d   : > { %1928 = vst [vmem:[%s2665_s12 + $0x17c] sm:$0xf] %v1927_v63 }
  0x3e PF: > { %p1929_p7 = scmp.ge.s32.totalorder %s2572_s21, 1  ;;  %p375_p8 = scmp.lt.s32.totalorder %s2572_s21, 7 }
  0x40   : > { %p376_p9 = pnand %p1929_p7, %p375_p8 }
  0x41   : > { %s382_s13 = sand.u32 (!%p376_p9), 1, %s2548_s15   ;;  %s426_s14 = smul.u32 (!%p376_p9), 48, %s2556_s17 }
  0x42   : > { %379 = sbr.rel (%p376_p9) target bundleno = 459 (0x1cb), region = 58  ;;  %s1931_s25 = sshll.u32 (!%p376_p9), %s2560_s18, 5 }
  0x43   : > { %s2372_s24 = smul.u32 (!%p376_p9), 384, %s382_s13  ;;  %p427_p10 = scmp.lt.s32.totalorder (!%p376_p9), %s426_s14, 143 }
  0x44   : > { %p442_p11 = scmp.lt.s32.totalorder (!%p376_p9), %s1931_s25, 63  ;;  %p1933_p12 = scmp.ne.s32.totalorder (!%p376_p9), %s2556_s17, 0 }
  0x45   : > { %s2807_s15 = scalar_lea.vmem (!%p376_p9), [#allocation3], %s2372_s24 }
  0x47   : > { %s3048_s14 = smov (!%p427_p10, %s426_s14), 143  ;;  %s3050_s25 = smov (!%p442_p11, %s1931_s25), 63 }
  0x48   : > { %s1930_s26 = sshll.u32 %s3048_s14, 2  ;;  %s1932_s5 = sshll.u32 %s3050_s25, 2 }
  0x49   : > { %s2800_s30 = scalar_lea.vmem %s3031_s1, %s1930_s26  ;;  %s2805_s8 = scalar_lea.vmem %s3034_s4, %s1932_s5 }
  0x4a   : > { %454 = sbr.rel (%p1933_p12) target bundleno = 96 (0x60), region = 66 }
  0x4f   : > { %v2574_v0 = vmov 0.0  }
  0x50   : > { %455 = vst [vmem:[#allocation2 + $0xb0] sm:$0xff] %v2574_v0  ;;  %456 = vst [vmem:[#allocation2] sm:$0xff] %v2574_v0 }
  0x51   : > { %457 = vst [vmem:[#allocation2 + $0xd8] sm:$0xff] %v2574_v0  ;;  %458 = vst [vmem:[#allocation2 + $0x18] sm:$0xff] %v2574_v0 }
  0x52   : > { %459 = vst [vmem:[#allocation2 + $0x50] sm:$0xff] %v2574_v0  ;;  %460 = vst [vmem:[#allocation2 + $0x68] sm:$0xff] %v2574_v0 }
  0x53   : > { %461 = vst [vmem:[#allocation2 + $0x30] sm:$0xff] %v2574_v0  ;;  %462 = vst [vmem:[#allocation2 + $0x48] sm:$0xff] %v2574_v0 }
  0x54   : > { %463 = vst [vmem:[#allocation2 + $0x80] sm:$0xff] %v2574_v0  ;;  %464 = vst [vmem:[#allocation2 + $0x88] sm:$0xff] %v2574_v0 }
  0x55   : > { %465 = vst [vmem:[#allocation2 + $0xe8] sm:$0xff] %v2574_v0  ;;  %466 = vst [vmem:[#allocation2 + $0xb8] sm:$0xff] %v2574_v0 }
  0x56   : > { %467 = vst [vmem:[#allocation2 + $0x60] sm:$0xff] %v2574_v0  ;;  %468 = vst [vmem:[#allocation2 + $0xf0] sm:$0xff] %v2574_v0 }
  0x57   : > { %469 = vst [vmem:[#allocation2 + $0x8] sm:$0xff] %v2574_v0  ;;  %470 = vst [vmem:[#allocation2 + $0x78] sm:$0xff] %v2574_v0 }
  0x58   : > { %471 = vst [vmem:[#allocation2 + $0x38] sm:$0xff] %v2574_v0  ;;  %472 = vst [vmem:[#allocation2 + $0x58] sm:$0xff] %v2574_v0 }
  0x59   : > { %473 = vst [vmem:[#allocation2 + $0x40] sm:$0xff] %v2574_v0  ;;  %474 = vst [vmem:[#allocation2 + $0xc8] sm:$0xff] %v2574_v0 }
  0x5a   : > { %475 = vst [vmem:[#allocation2 + $0xe0] sm:$0xff] %v2574_v0  ;;  %476 = vst [vmem:[#allocation2 + $0x90] sm:$0xff] %v2574_v0 }
  0x5b   : > { %477 = vst [vmem:[#allocation2 + $0x70] sm:$0xff] %v2574_v0  ;;  %478 = vst [vmem:[#allocation2 + $0xc0] sm:$0xff] %v2574_v0 }
  0x5c   : > { %479 = vst [vmem:[#allocation2 + $0xa8] sm:$0xff] %v2574_v0  ;;  %480 = vst [vmem:[#allocation2 + $0xd0] sm:$0xff] %v2574_v0 }
  0x5d   : > { %481 = vst [vmem:[#allocation2 + $0x10] sm:$0xff] %v2574_v0  ;;  %482 = vst [vmem:[#allocation2 + $0x28] sm:$0xff] %v2574_v0 }
  0x5e   : > { %483 = vst [vmem:[#allocation2 + $0xa0] sm:$0xff] %v2574_v0  ;;  %484 = vst [vmem:[#allocation2 + $0xf8] sm:$0xff] %v2574_v0 }
  0x5f   : > { %485 = vst [vmem:[#allocation2 + $0x20] sm:$0xff] %v2574_v0  ;;  %486 = vst [vmem:[#allocation2 + $0x98] sm:$0xff] %v2574_v0 }
  0x60 PF: > { %v2430_v1 = vld [vmem:[%s2800_s30 + $0x78] sm:$0xff]   ;;  %v2432_v3 = vld [vmem:[%s2800_s30 + $0x70] sm:$0xff]   ;;  %v2434_v5 = vld [vmem:[%s2800_s30 + $0x68] sm:$0xff]   ;;  %p2006_p13 = scmp.ne.s32.totalorder %s2556_s17, 2 }
  0x61   : > { %v2431_v2 = vld [vmem:[%s2800_s30 + $0x38] sm:$0xff]   ;;  %2170 = vmatprep.subr.bf16.mxu0 %v2430_v1  ;;  %2354 = vmatprep.subr.bf16.mxu1 %v2430_v1  ;;  %v2433_v4 = vld [vmem:[%s2800_s30 + $0x30] sm:$0xff]   ;;  %v2435_v6 = vld [vmem:[%s2800_s30 + $0x28] sm:$0xff]  }
  0x62   : > { %2171 = vmatpush3.bf16.msra.mxu0 %v2431_v2  ;;  %2362 = vmatpush3.bf16.msra.mxu1 %v2431_v2  ;;  %v2436_v7 = vld [vmem:[%s2800_s30 + $0x60] sm:$0xff]   ;;  %v2438_v9 = vld [vmem:[%s2800_s30 + $0x58] sm:$0xff]   ;;  %v2440_v11 = vld [vmem:[%s2800_s30 + $0x50] sm:$0xff]  }
  0x63   : > { %2172 = vmatprep.subr.bf16.mxu0 %v2432_v3  ;;  %2355 = vmatprep.subr.bf16.mxu1 %v2432_v3  ;;  %v2437_v8 = vld [vmem:[%s2800_s30 + $0x20] sm:$0xff]   ;;  %v2439_v10 = vld [vmem:[%s2800_s30 + $0x18] sm:$0xff]   ;;  %v2441_v14 = vld [vmem:[%s2800_s30 + $0x10] sm:$0xff]  }
  0x64   : > { %v2448_v12 = vld [vmem:[%s2807_s15 + $0x4] ss:$12 sps:$4 sm:$0xff]   ;;  %v2442_v15 = vld [vmem:[%s2800_s30 + $0x48] sm:$0xff]   ;;  %v2452_v19 = vld [vmem:[%s2800_s30 + $0xb8] sm:$0xff]  }
  0x65   : > { %v2451_v13 = vld [vmem:[%s2807_s15 + $0x124] ss:$12 sps:$4 sm:$0xff]   ;;  %1063 = vmatprep.mubr.bf16.mxu0 %v2448_v12  ;;  %v2443_v16 = vld [vmem:[%s2800_s30 + $0x8] sm:$0xff]   ;;  %v2462_v29 = vld [vmem:[%s2807_s15 + $0x34] ss:$12 sps:$4 sm:$0xff]  }
  0x66   : > { %2173 = vmatpush3.bf16.msra.mxu0 %v2433_v4  ;;  %2363 = vmatpush3.bf16.msra.mxu1 %v2433_v4  ;;  %v2444_v17 = vld [vmem:[%s2800_s30 + $0x40] sm:$0xff]   ;;  %v2454_v22 = vld [vmem:[%s2807_s15 + $0x1c] ss:$12 sps:$4 sm:$0xff]   ;;  %v2453_v23 = vld [vmem:[%s2800_s30 + $0xb0] sm:$0xff]  }
  0x67   : > { %2174 = vmatprep.subr.bf16.mxu0 %v2434_v5  ;;  %2356 = vmatprep.subr.bf16.mxu1 %v2434_v5  ;;  %v2445_v18 = vld [vmem:[%s2800_s30] sm:$0xff]   ;;  %v2456_v24 = vld [vmem:[%s2807_s15 + $0x13c] ss:$12 sps:$4 sm:$0xff]   ;;  %v2469_v34 = vld [vmem:[%s2800_s30 + $0x90] sm:$0xff]  }
  0x68   : > { %1159 = vmatprep.mubr.bf16.mxu1 %v2451_v13  ;;  %v2446_v20 = vld [vmem:[%s2807_s15] ss:$12 sps:$4 sm:$0xff]   ;;  %v2458_v25 = vld [vmem:[%s2807_s15 + $0x18] ss:$12 sps:$4 sm:$0xff]   ;;  %v2466_v32 = vld [vmem:[%s2807_s15 + $0x30] ss:$12 sps:$4 sm:$0xff]  }
  0x69   : > { %v2449_v21 = vld [vmem:[%s2807_s15 + $0x120] ss:$12 sps:$4 sm:$0xff]   ;;  %v2459_v27 = vld [vmem:[%s2807_s15 + $0x138] ss:$12 sps:$4 sm:$0xff]   ;;  %v2467_v33 = vld [vmem:[%s2807_s15 + $0x150] ss:$12 sps:$4 sm:$0xff]  }
  0x6a   : > { %2175 = vmatpush3.bf16.msra.mxu0 %v2435_v6  ;;  %2364 = vmatpush3.bf16.msra.mxu1 %v2435_v6  ;;  %v2460_v26 = vld [vmem:[%s2800_s30 + $0xa8] sm:$0xff]   ;;  %v2461_v28 = vld [vmem:[%s2800_s30 + $0xa0] sm:$0xff]   ;;  %v2468_v31 = vld [vmem:[%s2800_s30 + $0x98] sm:$0xff]  }
  0x6b   : > { %2176 = vmatprep.subr.bf16.mxu0 %v2436_v7  ;;  %2357 = vmatprep.subr.bf16.mxu1 %v2436_v7  ;;  %v2464_v30 = vld [vmem:[%s2807_s15 + $0x154] ss:$12 sps:$4 sm:$0xff]   ;;  %v2470_v35 = vld [vmem:[%s2807_s15 + $0x4c] ss:$12 sps:$4 sm:$0xff]   ;;  %v2478_v40 = vld [vmem:[%s2807_s15 + $0x64] ss:$12 sps:$4 sm:$0xff]  }
  0x6c   : > { %v2472_v36 = vld [vmem:[%s2807_s15 + $0x16c] ss:$12 sps:$4 sm:$0xff]   ;;  %v2474_v38 = vld [vmem:[%s2807_s15 + $0x48] ss:$12 sps:$4 sm:$0xff]   ;;  %v2477_v41 = vld [vmem:[%s2800_s30 + $0x80] sm:$0xff]  }
  0x6d   : > { %v2476_v37 = vld [vmem:[%s2800_s30 + $0x88] sm:$0xff]   ;;  %v2485_v46 = vld [vmem:[%s2807_s15 + $0x38] ss:$12 sps:$4 sm:$0xff]   ;;  %v2487_v48 = vld [vmem:[%s2807_s15 + $0x50] ss:$12 sps:$4 sm:$0xff]  }
  0x6e   : > { %2177 = vmatpush3.bf16.msra.mxu0 %v2437_v8  ;;  %2365 = vmatpush3.bf16.msra.mxu1 %v2437_v8  ;;  %v2475_v39 = vld [vmem:[%s2807_s15 + $0x168] ss:$12 sps:$4 sm:$0xff]   ;;  %v2481_v43 = vld [vmem:[%s2807_s15 + $0x60] ss:$12 sps:$4 sm:$0xff]   ;;  %v2486_v47 = vld [vmem:[%s2807_s15 + $0x78] ss:$12 sps:$4 sm:$0xff]  }
  0x6f   : > { %2178 = vmatprep.subr.bf16.mxu0 %v2438_v9  ;;  %2358 = vmatprep.subr.bf16.mxu1 %v2438_v9  ;;  %v2480_v42 = vld [vmem:[%s2807_s15 + $0x8] ss:$12 sps:$4 sm:$0xff]   ;;  %v2482_v44 = vld [vmem:[%s2807_s15 + $0x20] ss:$12 sps:$4 sm:$0xff]   ;;  %v2491_v51 = vld [vmem:[%s2807_s15 + $0x90] ss:$12 sps:$4 sm:$0xff]  }
  0x70   : > { %v2483_v45 = vld [vmem:[%s2807_s15 + $0x7c] ss:$12 sps:$4 sm:$0xff]   ;;  %v2488_v49 = vld [vmem:[%s2807_s15 + $0x94] ss:$12 sps:$4 sm:$0xff]   ;;  %v2493_v53 = vld [vmem:[%s2807_s15 + $0xac] ss:$12 sps:$4 sm:$0xff]  }
  0x71   : > { %v2490_v50 = vld [vmem:[%s2807_s15 + $0x68] ss:$12 sps:$4 sm:$0xff]   ;;  %v2492_v52 = vld [vmem:[%s2807_s15 + $0x80] ss:$12 sps:$4 sm:$0xff]   ;;  %v2495_v54 = vld [vmem:[%s2807_s15 + $0x98] ss:$12 sps:$4 sm:$0xff]  }
  0x72   : > { %2179 = vmatpush3.bf16.msra.mxu0 %v2439_v10  ;;  %2366 = vmatpush3.bf16.msra.mxu1 %v2439_v10  ;;  %v2496_v55 = vld [vmem:[%s2807_s15 + $0xa8] ss:$12 sps:$4 sm:$0xff]   ;;  %v2497_v56 = vld [vmem:[%s2807_s15 + $0xb0] ss:$12 sps:$4 sm:$0xff]   ;;  %v2501_v59 = vld [vmem:[%s2807_s15 + $0xc0] ss:$12 sps:$4 sm:$0xff]  }
  0x73   : > { %2180 = vmatprep.subr.bf16.mxu0 %v2440_v11  ;;  %2359 = vmatprep.subr.bf16.mxu1 %v2440_v11  ;;  %v2498_v57 = vld [vmem:[%s2807_s15 + $0xc4] ss:$12 sps:$4 sm:$0xff]   ;;  %v2500_v58 = vld [vmem:[%s2807_s15 + $0xc8] ss:$12 sps:$4 sm:$0xff]   ;;  %v2502_v60 = vld [vmem:[%s2807_s15 + $0xe0] ss:$12 sps:$4 sm:$0xff]  }
  0x74   : > { %v2503_v61 = vld [vmem:[%s2807_s15 + $0xdc] ss:$12 sps:$4 sm:$0xff]   ;;  %v2505_v62 = vld [vmem:[%s2807_s15 + $0xf8] ss:$12 sps:$4 sm:$0xff]   ;;  %v2508_v1 = vld [vmem:[%s2807_s15 + $0xf4] ss:$12 sps:$4 sm:$0xff]  }
  0x75   : > { %v2506_v63 = vld [vmem:[%s2807_s15 + $0xd8] ss:$12 sps:$4 sm:$0xff]   ;;  %v2507_v0 = vld [vmem:[%s2807_s15 + $0x110] ss:$12 sps:$4 sm:$0xff]   ;;  %v2510_v2 = vld [vmem:[%s2807_s15 + $0x128] ss:$12 sps:$4 sm:$0xff]  }
  0x76   : > { %2181 = vmatpush3.bf16.msra.mxu0 %v2441_v14  ;;  %2367 = vmatpush3.bf16.msra.mxu1 %v2441_v14  ;;  %v2511_v3 = vld [vmem:[%s2807_s15 + $0xf0] ss:$12 sps:$4 sm:$0xff]   ;;  %v2512_v4 = vld [vmem:[%s2807_s15 + $0x140] ss:$12 sps:$4 sm:$0xff]   ;;  %v2515_v6 = vld [vmem:[%s2807_s15 + $0x158] ss:$12 sps:$4 sm:$0xff]  }
  0x77   : > { %2182 = vmatprep.subr.bf16.mxu0 %v2442_v15  ;;  %2360 = vmatprep.subr.bf16.mxu1 %v2442_v15  ;;  %v2513_v5 = vld [vmem:[%s2807_s15 + $0x10c] ss:$12 sps:$4 sm:$0xff]   ;;  %v2516_v7 = vld [vmem:[%s2807_s15 + $0x108] ss:$12 sps:$4 sm:$0xff]   ;;  %v2517_v8 = vld [vmem:[%s2807_s15 + $0x170] ss:$12 sps:$4 sm:$0xff]  }
  0x7a   : > { %2183 = vmatpush3.bf16.msra.mxu0 %v2443_v16  ;;  %2368 = vmatpush3.bf16.msra.mxu1 %v2443_v16 }
  0x7b   : > { %2184 = vmatprep.subr.bf16.mxu0 %v2444_v17  ;;  %2361 = vmatprep.subr.bf16.mxu1 %v2444_v17 }
  0x7e   : > { %2185 = vmatpush3.bf16.msra.mxu0 %v2445_v18  ;;  %2369 = vmatpush3.bf16.msra.mxu1 %v2445_v18 }
  0x7f   : > { %2306 = vmatprep.subr.bf16.mxu1 %v2452_v19 }
  0x81   : > { %1064 = vmatmul.mubr.bf16.vlgmr.msra.gmra.mxu0 %v2446_v20  ;;  %1160 = vmatmul.mubr.bf16.vlgmr.msra.gmra.mxu1 %v2449_v21 }
  0x82   : > { %2307 = vmatpush3.bf16.msra.mxu1 %v2452_v19  ;;  %1071 = vmatprep.mubr.bf16.mxu0 %v2454_v22 }
  0x83   : > { %2308 = vmatprep.subr.bf16.mxu1 %v2453_v23  ;;  %1167 = vmatprep.mubr.bf16.mxu1 %v2456_v24 }
  0x86   : > { %2309 = vmatpush3.bf16.msra.mxu1 %v2453_v23 }
  0x87   : > { %2310 = vmatprep.subr.bf16.mxu1 %v2460_v26 }
  0x89   : > { %1072 = vmatmul.mubr.bf16.gmra.mxu0 %v2458_v25  ;;  %1168 = vmatmul.mubr.bf16.gmra.mxu1 %v2459_v27 }
  0x8a   : > { %2311 = vmatpush3.bf16.msra.mxu1 %v2460_v26  ;;  %1079 = vmatprep.mubr.bf16.mxu0 %v2462_v29 }
  0x8b   : > { %2312 = vmatprep.subr.bf16.mxu1 %v2461_v28  ;;  %1175 = vmatprep.mubr.bf16.mxu1 %v2464_v30 }
  0x8e   : > { %2313 = vmatpush3.bf16.msra.mxu1 %v2461_v28 }
  0x8f   : > { %2314 = vmatprep.subr.bf16.mxu1 %v2468_v31 }
  0x91   : > { %1080 = vmatmul.mubr.bf16.gmra.mxu0 %v2466_v32  ;;  %1176 = vmatmul.mubr.bf16.gmra.mxu1 %v2467_v33 }
  0x92   : > { %2315 = vmatpush3.bf16.msra.mxu1 %v2468_v31  ;;  %1087 = vmatprep.mubr.bf16.mxu0 %v2470_v35 }
  0x93   : > { %2316 = vmatprep.subr.bf16.mxu1 %v2469_v34  ;;  %1183 = vmatprep.mubr.bf16.mxu1 %v2472_v36 }
  0x96   : > { %2317 = vmatpush3.bf16.msra.mxu1 %v2469_v34 }
  0x97   : > { %2318 = vmatprep.subr.bf16.mxu1 %v2476_v37 }
  0x99   : > { %1088 = vmatmul.mubr.bf16.gmra.mxu0 %v2474_v38  ;;  %1184 = vmatmul.mubr.bf16.gmra.mxu1 %v2475_v39 }
  0x9a   : > { %2319 = vmatpush3.bf16.msra.mxu1 %v2476_v37  ;;  %1095 = vmatprep.mubr.bf16.mxu0 %v2478_v40 }
  0x9b   : > { %2320 = vmatprep.subr.bf16.mxu1 %v2477_v41  ;;  %2322 = vmatprep.mubr.bf16.mxu1 %v2480_v42 }
  0x9e   : > { %2321 = vmatpush3.bf16.msra.mxu1 %v2477_v41 }
  0xa1   : > { %1096 = vmatmul.mubr.bf16.gmra.mxu0 %v2481_v43  ;;  %2323 = vmatmul.mubr.bf16.vlgmr.msra.gmra.mxu1 %v2482_v44 }
  0xa2   : > { %1103 = vmatprep.mubr.bf16.mxu0 %v2483_v45  ;;  %2326 = vmatprep.mubr.bf16.mxu1 %v2485_v46 }
  0xa9   : > { %1104 = vmatmul.mubr.bf16.gmra.mxu0 %v2486_v47  ;;  %2327 = vmatmul.mubr.bf16.gmra.mxu1 %v2487_v48 }
  0xaa   : > { %1111 = vmatprep.mubr.bf16.mxu0 %v2488_v49  ;;  %2330 = vmatprep.mubr.bf16.mxu1 %v2490_v50  ;;  %v489_v49 = vld [vmem:[#allocation2 + $0xd8] sm:$0xff] }
  0xb1   : > { %1112 = vmatmul.mubr.bf16.gmra.mxu0 %v2491_v51  ;;  %2331 = vmatmul.mubr.bf16.gmra.mxu1 %v2492_v52 }
  0xb2   : > { %1119 = vmatprep.mubr.bf16.mxu0 %v2493_v53  ;;  %2334 = vmatprep.mubr.bf16.mxu1 %v2495_v54  ;;  %v487_v54 = vld [vmem:[#allocation2 + $0xb0] sm:$0xff] }
  0xb9   : > { %1120 = vmatmul.mubr.bf16.gmra.mxu0 %v2496_v55  ;;  %2335 = vmatmul.mubr.bf16.gmra.mxu1 %v2497_v56 }
  0xba   : > { %1127 = vmatprep.mubr.bf16.mxu0 %v2498_v57  ;;  %2338 = vmatprep.mubr.bf16.mxu1 %v2500_v58 }
  0xc1   : > { %1128 = vmatmul.mubr.bf16.gmra.mxu0 %v2501_v59  ;;  %2339 = vmatmul.mubr.bf16.gmra.mxu1 %v2502_v60  ;;  %v490_v60 = vld [vmem:[#allocation2 + $0x18] sm:$0xff] }
  0xc2   : > { %1135 = vmatprep.mubr.bf16.mxu0 %v2503_v61  ;;  %2342 = vmatprep.mubr.bf16.mxu1 %v2505_v62 }
  0xc9   : > { %1136 = vmatmul.mubr.bf16.gmra.mxu0 %v2506_v63  ;;  %2343 = vmatmul.mubr.bf16.gmra.mxu1 %v2507_v0 }
  0xca   : > { %1143 = vmatprep.mubr.bf16.mxu0 %v2508_v1  ;;  %2346 = vmatprep.mubr.bf16.mxu1 %v2510_v2  ;;  %v488_v2 = vld [vmem:[#allocation2] sm:$0xff] }
  0xd1   : > { %1144 = vmatmul.mubr.bf16.gmra.mxu0 %v2511_v3  ;;  %2347 = vmatmul.mubr.bf16.gmra.mxu1 %v2512_v4 }
  0xd2   : > { %1151 = vmatprep.mubr.bf16.mxu0 %v2513_v5  ;;  %2350 = vmatprep.mubr.bf16.mxu1 %v2515_v6 }
  0xd9   : > { %1152 = vmatmul.mubr.bf16.gmra.mxu0 %v2516_v7  ;;  %2351 = vmatmul.mubr.bf16.gmra.mxu1 %v2517_v8  ;;  %v493_v8 = vld [vmem:[#allocation2 + $0x30] sm:$0xff] }
 0x141   : > { %v2186_v9 = vpop.f32.mrf.mxu0  ;;  %v2258_v10 = vpop.f32.mrf.mxu1 }
 0x143   : > { %v2187_v11 = vpop.f32.mrf.mxu0  ;;  %v2259_v12 = vpop.f32.mrf.mxu1 }
 0x144   : > { %v2882_v13 = vadd.f32 %v2259_v12, %v2258_v10  ;;  %v2188_v51 = vadd.f32 %v2187_v11, %v2186_v9 }
 0x145   : > { %v2189_v14 = vpop.f32.mrf.mxu0  ;;  %v2261_v15 = vpop.f32.mrf.mxu1 }
 0x147   : > { %v2190_v16 = vpop.f32.mrf.mxu0  ;;  %v2262_v17 = vpop.f32.mrf.mxu1 }
 0x148   : > { %v2884_v18 = vadd.f32 %v2262_v17, %v2261_v15  ;;  %v2191_v62 = vadd.f32 %v2190_v16, %v2189_v14  ;;  %v491_v17 = vld [vmem:[#allocation2 + $0x50] sm:$0xff] }
 0x149   : > { %v2192_v19 = vpop.f32.mrf.mxu0  ;;  %v2264_v20 = vpop.f32.mrf.mxu1 }
 0x14b   : > { %v2193_v21 = vpop.f32.mrf.mxu0  ;;  %v2265_v22 = vpop.f32.mrf.mxu1 }
 0x14c   : > { %v2886_v23 = vadd.f32 %v2265_v22, %v2264_v20  ;;  %v2194_v47 = vadd.f32 %v2193_v21, %v2192_v19  ;;  %v494_v22 = vld [vmem:[#allocation2 + $0x48] sm:$0xff] }
 0x14d   : > { %v2195_v24 = vpop.f32.mrf.mxu0  ;;  %v2267_v25 = vpop.f32.mrf.mxu1 }
 0x14f   : > { %v2196_v26 = vpop.f32.mrf.mxu0  ;;  %v2268_v27 = vpop.f32.mrf.mxu1 }
 0x150   : > { %v2888_v28 = vadd.f32 %v2268_v27, %v2267_v25  ;;  %v2197_v56 = vadd.f32 %v2196_v26, %v2195_v24 }
 0x151   : > { %v2198_v29 = vpop.f32.mrf.mxu0  ;;  %v2270_v30 = vpop.f32.mrf.mxu1 }
 0x153   : > { %v2199_v31 = vpop.f32.mrf.mxu0  ;;  %v2271_v32 = vpop.f32.mrf.mxu1 }
 0x154   : > { %v2890_v33 = vadd.f32 %v2271_v32, %v2270_v30  ;;  %v2200_v10 = vadd.f32 %v2199_v31, %v2198_v29  ;;  %v492_v32 = vld [vmem:[#allocation2 + $0x68] sm:$0xff] }
 0x155   : > { %v2201_v34 = vpop.f32.mrf.mxu0  ;;  %v2273_v35 = vpop.f32.mrf.mxu1 }
 0x157   : > { %v2202_v36 = vpop.f32.mrf.mxu0  ;;  %v2274_v37 = vpop.f32.mrf.mxu1 }
 0x158   : > { %v2892_v38 = vadd.f32 %v2274_v37, %v2273_v35  ;;  %v2203_v25 = vadd.f32 %v2202_v36, %v2201_v34 }
 0x159   : > { %v2204_v39 = vpop.f32.mrf.mxu0  ;;  %v2894_v40 = vpop.f32.mrf.mxu1 }
 0x15b   : > { %v2205_v41 = vpop.f32.mrf.mxu0  ;;  %v2896_v42 = vpop.f32.mrf.mxu1 }
 0x15c   : > { %v2206_v4 = vadd.f32 %v2205_v41, %v2204_v39  ;;  %v497_v41 = vld [vmem:[#allocation2 + $0xe8] sm:$0xff] }
 0x15d   : > { %v2207_v43 = vpop.f32.mrf.mxu0  ;;  %v2898_v44 = vpop.f32.mrf.mxu1 }
 0x15f   : > { %v2208_v45 = vpop.f32.mrf.mxu0  ;;  %v2900_v46 = vpop.f32.mrf.mxu1 }
 0x160   : > { %v2209_v16 = vadd.f32 %v2208_v45, %v2207_v43 }
 0x161   : > { %v2210_v48 = vpop.f32.mrf.mxu0  ;;  %v2324_v50 = vpop.f32.mrf.mxu1 }
 0x162   : > { %v1235_v52 = vadd.f32 %v2324_v50, %v2194_v47 }
 0x163   : > { %v2211_v53 = vpop.f32.mrf.mxu0  ;;  %v1226_v55 = vpop.f32.mrf.mxu1 }
 0x164   : > { %v1355_v57 = vadd.f32 %v1235_v52, %v489_v49  ;;  %v1227_v58 = vadd.f32 %v2188_v51, %v1226_v55  ;;  %v2212_v45 = vadd.f32 %v2211_v53, %v2210_v48  ;;  %v495_v51 = vld [vmem:[#allocation2 + $0x80] sm:$0xff] }
 0x165   : > { %v2213_v59 = vpop.f32.mrf.mxu0  ;;  %v2325_v61 = vpop.f32.mrf.mxu1 }
 0x166   : > { %1387 = vst [vmem:[#allocation2 + $0xd8] sm:$0xff] %v1355_v57  ;;  %v1353_v63 = vadd.f32 %v1227_v58, %v487_v54  ;;  %v1238_v0 = vadd.f32 %v2325_v61, %v2197_v56  ;;  %v498_v56 = vld [vmem:[#allocation2 + $0xb8] sm:$0xff] }
 0x167   : > { %v2214_v1 = vpop.f32.mrf.mxu0  ;;  %v1229_v3 = vpop.f32.mrf.mxu1 }
 0x168   : > { %1385 = vst [vmem:[#allocation2 + $0xb0] sm:$0xff] %v1353_v63  ;;  %v1356_v5 = vadd.f32 %v1238_v0, %v490_v60  ;;  %v1230_v6 = vadd.f32 %v2191_v62, %v1229_v3  ;;  %v2215_v58 = vadd.f32 %v2214_v1, %v2213_v59  ;;  %v496_v63 = vld [vmem:[#allocation2 + $0x88] sm:$0xff] }
 0x169   : > { %v2216_v7 = vpop.f32.mrf.mxu0  ;;  %v2328_v9 = vpop.f32.mrf.mxu1  ;;  %v501_v1 = vld [vmem:[#allocation2 + $0x8] sm:$0xff] }
 0x16a   : > { %1388 = vst [vmem:[#allocation2 + $0x18] sm:$0xff] %v1356_v5  ;;  %v1354_v11 = vadd.f32 %v1230_v6, %v488_v2  ;;  %v1251_v12 = vadd.f32 %v2328_v9, %v2206_v4 }
 0x16b   : > { %v2217_v15 = vpop.f32.mrf.mxu0  ;;  %v1242_v14 = vpop.f32.mrf.mxu1 }
 0x16c   : > { %1386 = vst [vmem:[#allocation2] sm:$0xff] %v1354_v11  ;;  %v1359_v19 = vadd.f32 %v1251_v12, %v493_v8  ;;  %v1243_v20 = vadd.f32 %v2200_v10, %v1242_v14  ;;  %v2218_v31 = vadd.f32 %v2217_v15, %v2216_v7  ;;  %v499_v7 = vld [vmem:[#allocation2 + $0x60] sm:$0xff] }
 0x16d   : > { %v2219_v21 = vpop.f32.mrf.mxu0  ;;  %v2329_v24 = vpop.f32.mrf.mxu1 }
 0x16e   : > { %1391 = vst [vmem:[#allocation2 + $0x30] sm:$0xff] %v1359_v19  ;;  %v1357_v26 = vadd.f32 %v1243_v20, %v491_v17  ;;  %v1254_v27 = vadd.f32 %v2329_v24, %v2209_v16  ;;  %v500_v16 = vld [vmem:[#allocation2 + $0xf0] sm:$0xff]  ;;  %v502_v24 = vld [vmem:[#allocation2 + $0x78] sm:$0xff] }
 0x16f   : > { %v2220_v30 = vpop.f32.mrf.mxu0  ;;  %v1245_v29 = vpop.f32.mrf.mxu1 }
 0x170   : > { %1389 = vst [vmem:[#allocation2 + $0x50] sm:$0xff] %v1357_v26  ;;  %v1360_v35 = vadd.f32 %v1254_v27, %v494_v22  ;;  %v1246_v37 = vadd.f32 %v2203_v25, %v1245_v29  ;;  %v2221_v36 = vadd.f32 %v2220_v30, %v2219_v21 }
 0x171   : > { %v2222_v39 = vpop.f32.mrf.mxu0  ;;  %v2332_v43 = vpop.f32.mrf.mxu1 }
 0x172   : > { %1392 = vst [vmem:[#allocation2 + $0x48] sm:$0xff] %v1360_v35  ;;  %v1358_v47 = vadd.f32 %v1246_v37, %v492_v32  ;;  %v1267_v49 = vadd.f32 %v2332_v43, %v2218_v31  ;;  %v503_v37 = vld [vmem:[#allocation2 + $0x38] sm:$0xff] }
 0x173   : > { %v2223_v50 = vpop.f32.mrf.mxu0  ;;  %v1258_v34 = vpop.f32.mrf.mxu1 }
 0x174   : > { %1390 = vst [vmem:[#allocation2 + $0x68] sm:$0xff] %v1358_v47  ;;  %v1363_v52 = vadd.f32 %v1267_v49, %v497_v41  ;;  %v1259_v54 = vadd.f32 %v2212_v45, %v1258_v34  ;;  %v2224_v4 = vadd.f32 %v2223_v50, %v2222_v39 }
 0x175   : > { %v2225_v55 = vpop.f32.mrf.mxu0  ;;  %v2333_v57 = vpop.f32.mrf.mxu1 }
 0x176   : > { %1395 = vst [vmem:[#allocation2 + $0xe8] sm:$0xff] %v1363_v52  ;;  %v1361_v60 = vadd.f32 %v1259_v54, %v495_v51  ;;  %v1270_v61 = vadd.f32 %v2333_v57, %v2221_v36  ;;  %v504_v51 = vld [vmem:[#allocation2 + $0x58] sm:$0xff] }
 0x177   : > { %v2226_v62 = vpop.f32.mrf.mxu0  ;;  %v1261_v48 = vpop.f32.mrf.mxu1 }
 0x178   : > { %1393 = vst [vmem:[#allocation2 + $0x80] sm:$0xff] %v1361_v60  ;;  %v1364_v53 = vadd.f32 %v1270_v61, %v498_v56  ;;  %v1262_v0 = vadd.f32 %v2215_v58, %v1261_v48  ;;  %v2227_v12 = vadd.f32 %v2226_v62, %v2225_v55  ;;  %v505_v58 = vld [vmem:[#allocation2 + $0x40] sm:$0xff] }
 0x179   : > { %v2228_v2 = vpop.f32.mrf.mxu0  ;;  %v2336_v3 = vpop.f32.mrf.mxu1 }
 0x17a   : > { %1396 = vst [vmem:[#allocation2 + $0xb8] sm:$0xff] %v1364_v53  ;;  %v1362_v5 = vadd.f32 %v1262_v0, %v496_v63 }
 0x17b   : > { %v2229_v6 = vpop.f32.mrf.mxu0  ;;  %v1274_v8 = vpop.f32.mrf.mxu1 }
 0x17c   : > { %1394 = vst [vmem:[#allocation2 + $0x88] sm:$0xff] %v1362_v5  ;;  %v2230_v9 = vadd.f32 %v2229_v6, %v2228_v2  ;;  %v1275_v59 = vadd.f32 %v2224_v4, %v1274_v8  ;;  %v506_v2 = vld [vmem:[#allocation2 + $0xc8] sm:$0xff]  ;;  %v513_v4 = vld [vmem:[#allocation2 + $0x10] sm:$0xff] }
 0x17d   : > { %v2231_v10 = vpop.f32.mrf.mxu0  ;;  %v2337_v11 = vpop.f32.mrf.mxu1 }
 0x17e   : > { %v1283_v15 = vadd.f32 %v2336_v3, %v2230_v9  ;;  %v1365_v17 = vadd.f32 %v1275_v59, %v499_v7  ;;  %v511_v9 = vld [vmem:[#allocation2 + $0xa8] sm:$0xff] }
 0x17f   : > { %v2232_v14 = vpop.f32.mrf.mxu0  ;;  %v1277_v19 = vpop.f32.mrf.mxu1 }
 0x180   : > { %v1367_v20 = vadd.f32 %v1283_v15, %v501_v1  ;;  %1397 = vst [vmem:[#allocation2 + $0x60] sm:$0xff] %v1365_v17  ;;  %v2233_v21 = vadd.f32 %v2232_v14, %v2231_v10  ;;  %v1278_v22 = vadd.f32 %v2227_v12, %v1277_v19  ;;  %v507_v15 = vld [vmem:[#allocation2 + $0xe0] sm:$0xff]  ;;  %v514_v14 = vld [vmem:[#allocation2 + $0x28] sm:$0xff] }
 0x181   : > { %v2234_v25 = vpop.f32.mrf.mxu0  ;;  %v2340_v26 = vpop.f32.mrf.mxu1 }
 0x182   : > { %1399 = vst [vmem:[#allocation2 + $0x8] sm:$0xff] %v1367_v20  ;;  %v1286_v27 = vadd.f32 %v2337_v11, %v2233_v21  ;;  %v1366_v30 = vadd.f32 %v1278_v22, %v500_v16 }
 0x183   : > { %v2235_v32 = vpop.f32.mrf.mxu0  ;;  %v1290_v29 = vpop.f32.mrf.mxu1 }
 0x184   : > { %v1368_v31 = vadd.f32 %v1286_v27, %v502_v24  ;;  %1398 = vst [vmem:[#allocation2 + $0xf0] sm:$0xff] %v1366_v30  ;;  %v2236_v35 = vadd.f32 %v2235_v32, %v2234_v25  ;;  %v512_v24 = vld [vmem:[#allocation2 + $0xd0] sm:$0xff] }
 0x185   : > { %v2237_v39 = vpop.f32.mrf.mxu0  ;;  %v2341_v41 = vpop.f32.mrf.mxu1  ;;  %v508_v32 = vld [vmem:[#allocation2 + $0x90] sm:$0xff] }
 0x186   : > { %1400 = vst [vmem:[#allocation2 + $0x78] sm:$0xff] %v1368_v31  ;;  %v1291_v43 = vadd.f32 %v2236_v35, %v1290_v29  ;;  %v517_v31 = vld [vmem:[#allocation2 + $0x20] sm:$0xff] }
 0x187   : > { %v2238_v45 = vpop.f32.mrf.mxu0  ;;  %v1293_v47 = vpop.f32.mrf.mxu1 }
 0x188   : > { %v1369_v49 = vadd.f32 %v1291_v43, %v503_v37  ;;  %v2239_v50 = vadd.f32 %v2238_v45, %v2237_v39 }
 0x189   : > { %v2240_v34 = vpop.f32.mrf.mxu0  ;;  %v2902_v36 = vpop.f32.mrf.mxu1 }
 0x18a   : > { %1401 = vst [vmem:[#allocation2 + $0x38] sm:$0xff] %v1369_v49  ;;  %v1294_v52 = vadd.f32 %v2239_v50, %v1293_v47  ;;  %v509_v50 = vld [vmem:[#allocation2 + $0x70] sm:$0xff] }
 0x18b   : > { %v2241_v54 = vpop.f32.mrf.mxu0  ;;  %v1306_v55 = vpop.f32.mrf.mxu1 }
 0x18c   : > { %v1370_v56 = vadd.f32 %v1294_v52, %v504_v51  ;;  %v2242_v57 = vadd.f32 %v2241_v54, %v2240_v34  ;;  %v518_v34 = vld [vmem:[#allocation2 + $0x98] sm:$0xff] }
 0x18d   : > { %v2243_v60 = vpop.f32.mrf.mxu0  ;;  %v2904_v61 = vpop.f32.mrf.mxu1 }
 0x18e   : > { %1402 = vst [vmem:[#allocation2 + $0x58] sm:$0xff] %v1370_v56  ;;  %v1299_v62 = vadd.f32 %v2340_v26, %v2242_v57 }
 0x18f   : > { %v2244_v63 = vpop.f32.mrf.mxu0  ;;  %v1309_v48 = vpop.f32.mrf.mxu1 }
 0x190   : > { %v1371_v53 = vadd.f32 %v1299_v62, %v505_v58  ;;  %v2245_v0 = vadd.f32 %v2244_v63, %v2243_v60 }
 0x191   : > { %v2246_v3 = vpop.f32.mrf.mxu0  ;;  %v2348_v5 = vpop.f32.mrf.mxu1 }
 0x192   : > { %1403 = vst [vmem:[#allocation2 + $0x40] sm:$0xff] %v1371_v53  ;;  %v1302_v6 = vadd.f32 %v2341_v41, %v2245_v0  ;;  %v1331_v7 = vadd.f32 %v2348_v5, %v2886_v23  ;;  %v2278_v23 = vadd.f32 %v2896_v42, %v2894_v40  ;;  %v2281_v40 = vadd.f32 %v2900_v46, %v2898_v44  ;;  %v515_v41 = vld [vmem:[#allocation2 + $0xa0] sm:$0xff]  ;;  %v516_v46 = vld [vmem:[#allocation2 + $0xf8] sm:$0xff] }
 0x193   : > { %v2247_v8 = vpop.f32.mrf.mxu0  ;;  %v1322_v59 = vpop.f32.mrf.mxu1 }
 0x194   : > { %v1372_v1 = vadd.f32 %v1302_v6, %v506_v2  ;;  %v1379_v10 = vadd.f32 %v1331_v7, %v513_v4  ;;  %v2248_v11 = vadd.f32 %v2247_v8, %v2246_v3  ;;  %v1323_v12 = vadd.f32 %v2882_v13, %v1322_v59 }
 0x195   : > { %v2249_v17 = vpop.f32.mrf.mxu0  ;;  %v2349_v16 = vpop.f32.mrf.mxu1 }
 0x196   : > { %1404 = vst [vmem:[#allocation2 + $0xc8] sm:$0xff] %v1372_v1  ;;  %1411 = vst [vmem:[#allocation2 + $0x10] sm:$0xff] %v1379_v10  ;;  %v1307_v19 = vadd.f32 %v2248_v11, %v1306_v55  ;;  %v1377_v20 = vadd.f32 %v1323_v12, %v511_v9  ;;  %v1334_v21 = vadd.f32 %v2349_v16, %v2888_v28 }
 0x197   : > { %v2250_v22 = vpop.f32.mrf.mxu0  ;;  %v1325_v25 = vpop.f32.mrf.mxu1 }
 0x198   : > { %v1373_v26 = vadd.f32 %v1307_v19, %v507_v15  ;;  %1409 = vst [vmem:[#allocation2 + $0xa8] sm:$0xff] %v1377_v20  ;;  %v1380_v27 = vadd.f32 %v1334_v21, %v514_v14  ;;  %v2251_v13 = vadd.f32 %v2250_v22, %v2249_v17  ;;  %v1326_v30 = vadd.f32 %v2884_v18, %v1325_v25 }
 0x199   : > { %v2252_v29 = vpop.f32.mrf.mxu0  ;;  %v2352_v35 = vpop.f32.mrf.mxu1 }
 0x19a   : > { %1405 = vst [vmem:[#allocation2 + $0xe0] sm:$0xff] %v1373_v26  ;;  %1412 = vst [vmem:[#allocation2 + $0x28] sm:$0xff] %v1380_v27  ;;  %v1310_v37 = vadd.f32 %v2251_v13, %v1309_v48  ;;  %v1378_v28 = vadd.f32 %v1326_v30, %v512_v24  ;;  %v1347_v39 = vadd.f32 %v2352_v35, %v2278_v23 }
 0x19b   : > { %v2253_v42 = vpop.f32.mrf.mxu0  ;;  %v1338_v43 = vpop.f32.mrf.mxu1 }
 0x19c   : > { %v1374_v45 = vadd.f32 %v1310_v37, %v508_v32  ;;  %1410 = vst [vmem:[#allocation2 + $0xd0] sm:$0xff] %v1378_v28  ;;  %v1383_v47 = vadd.f32 %v1347_v39, %v517_v31  ;;  %v2254_v49 = vadd.f32 %v2253_v42, %v2252_v29  ;;  %v1339_v18 = vadd.f32 %v2890_v33, %v1338_v43  ;;  %v510_v33 = vld [vmem:[#allocation2 + $0xc0] sm:$0xff] }
 0x19d   : > { %v2255_v51 = vpop.f32.mrf.mxu0  ;;  %v2353_v52 = vpop.f32.mrf.mxu1 }
 0x19e   : > { %1406 = vst [vmem:[#allocation2 + $0x90] sm:$0xff] %v1374_v45  ;;  %1415 = vst [vmem:[#allocation2 + $0x20] sm:$0xff] %v1383_v47  ;;  %v1315_v54 = vadd.f32 %v2902_v36, %v2254_v49  ;;  %v1381_v55 = vadd.f32 %v1339_v18, %v515_v41  ;;  %v1350_v56 = vadd.f32 %v2353_v52, %v2281_v40 }
 0x19f   : > { %v2256_v44 = vpop.f32.mrf.mxu0  ;;  %v1341_v57 = vpop.f32.mrf.mxu1 }
 0x1a0   : > { %v1375_v58 = vadd.f32 %v1315_v54, %v509_v50  ;;  %1413 = vst [vmem:[#allocation2 + $0xa0] sm:$0xff] %v1381_v55  ;;  %v1384_v60 = vadd.f32 %v1350_v56, %v518_v34  ;;  %v2257_v62 = vadd.f32 %v2256_v44, %v2255_v51  ;;  %v1342_v63 = vadd.f32 %v2892_v38, %v1341_v57 }
 0x1a2   : > { %1407 = vst [vmem:[#allocation2 + $0x70] sm:$0xff] %v1375_v58  ;;  %1416 = vst [vmem:[#allocation2 + $0x98] sm:$0xff] %v1384_v60  ;;  %v1318_v48 = vadd.f32 %v2904_v61, %v2257_v62  ;;  %v1382_v53 = vadd.f32 %v1342_v63, %v516_v46  ;;  %1420 = sbr.rel (%p2006_p13) target bundleno = 459 (0x1cb), region = 70 }
 0x1a4   : > { %v1376_v0 = vadd.f32 %v1318_v48, %v510_v33  ;;  %1414 = vst [vmem:[#allocation2 + $0xf8] sm:$0xff] %v1382_v53 }
 0x1a6   : > { %1408 = vst [vmem:[#allocation2 + $0xc0] sm:$0xff] %v1376_v0 }
 0x1a7   : > { %v1421_v36 = vld [vmem:[#allocation2 + $0xb0] sm:$0xff]  ;;  %v1422_v2 = vld [vmem:[#allocation2] sm:$0xff]  ;;  %v1423_v5 = vld [vmem:[#allocation2 + $0xd8] sm:$0xff] }
 0x1a8   : > { %v2922_v3 = vld [vmem:[%s3032_s2] ss:$0 sm:$0xff]  ;;  %v1424_v6 = vld [vmem:[#allocation2 + $0x18] sm:$0xff]  ;;  %v1425_v9 = vld [vmem:[#allocation2 + $0x50] sm:$0xff] }
 0x1a9   : > { %v1460_v38 = vmul.f32 %v2922_v3, %v1421_v36  ;;  %v1461_v4 = vmul.f32 %v2922_v3, %v1422_v2  ;;  %v2929_v61 = vld [vmem:[%s3033_s3] ss:$0 sm:$0xff]  ;;  %v1462_v7 = vmul.f32 %v2922_v3, %v1423_v5  ;;  %v1463_v8 = vmul.f32 %v2922_v3, %v1424_v6  ;;  %v1426_v59 = vld [vmem:[#allocation2 + $0x68] sm:$0xff]  ;;  %v1427_v1 = vld [vmem:[#allocation2 + $0x30] sm:$0xff] }
 0x1aa   : > { %v1464_v12 = vmul.f32 %v2922_v3, %v1425_v9  ;;  %v1465_v15 = vmul.f32 %v2922_v3, %v1426_v59  ;;  %v1428_v17 = vld [vmem:[#allocation2 + $0x48] sm:$0xff]  ;;  %v1466_v19 = vmul.f32 %v2922_v3, %v1427_v1  ;;  %v1429_v21 = vld [vmem:[#allocation2 + $0x80] sm:$0xff]  ;;  %v1432_v31 = vld [vmem:[#allocation2 + $0xb8] sm:$0xff] }
 0x1ab   : > { %v1499_v10 = vadd.f32 %v2929_v61, %v1460_v38  ;;  %v1500_v11 = vadd.f32 %v2929_v61, %v1461_v4  ;;  %v1501_v14 = vadd.f32 %v2929_v61, %v1462_v7  ;;  %v1502_v16 = vadd.f32 %v2929_v61, %v1463_v8  ;;  %v1430_v26 = vld [vmem:[#allocation2 + $0x88] sm:$0xff]  ;;  %v1433_v40 = vld [vmem:[#allocation2 + $0x60] sm:$0xff]  ;;  %v1434_v42 = vld [vmem:[#allocation2 + $0xf0] sm:$0xff] }
 0x1ac   : > { %v1467_v20 = vmul.f32 %v2922_v3, %v1428_v17  ;;  %v1503_v24 = vadd.f32 %v2929_v61, %v1464_v12  ;;  %v1504_v25 = vadd.f32 %v2929_v61, %v1465_v15  ;;  %v1505_v30 = vadd.f32 %v2929_v61, %v1466_v19  ;;  %v1431_v29 = vld [vmem:[#allocation2 + $0xe8] sm:$0xff]  ;;  %v1436_v52 = vld [vmem:[#allocation2 + $0x78] sm:$0xff]  ;;  %v1439_v5 = vld [vmem:[#allocation2 + $0x40] sm:$0xff] }
 0x1ad   : > { %v1531_v23 = vmax.f32 %v1499_v10, 0.0  ;;  %v1532_v22 = vmax.f32 %v1500_v11, 0.0  ;;  %v1533_v27 = vmax.f32 %v1501_v14, 0.0  ;;  %v1534_v13 = vmax.f32 %v1502_v16, 0.0  ;;  %v1435_v49 = vld [vmem:[#allocation2 + $0x8] sm:$0xff]  ;;  %v1437_v46 = vld [vmem:[#allocation2 + $0x38] sm:$0xff] }
 0x1ae   : > { %v1506_v32 = vadd.f32 %v2929_v61, %v1467_v20  ;;  %v1535_v37 = vmax.f32 %v1503_v24, 0.0  ;;  %v1536_v28 = vmax.f32 %v1504_v25, 0.0  ;;  %v1468_v39 = vmul.f32 %v2922_v3, %v1429_v21  ;;  %v1438_v0 = vld [vmem:[#allocation2 + $0x58] sm:$0xff]  ;;  %v1440_v6 = vld [vmem:[#allocation2 + $0xc8] sm:$0xff]  ;;  %v1441_v1 = vld [vmem:[#allocation2 + $0xe0] sm:$0xff] }
 0x1af   : > { %v2078_v35 = vpack.c.bf16 %v1532_v22, %v1531_v23  ;;  %v2083_v41 = vpack.c.bf16 %v1534_v13, %v1533_v27  ;;  %v1537_v43 = vmax.f32 %v1505_v30, 0.0  ;;  %v1469_v47 = vmul.f32 %v2922_v3, %v1430_v26  ;;  %v1442_v10 = vld [vmem:[#allocation2 + $0x90] sm:$0xff]  ;;  %v1444_v23 = vld [vmem:[#allocation2 + $0xc0] sm:$0xff]  ;;  %v1445_v27 = vld [vmem:[#allocation2 + $0xa8] sm:$0xff] }
 0x1b0   : > { %v1538_v45 = vmax.f32 %v1506_v32, 0.0  ;;  %v2088_v18 = vpack.c.bf16 %v1536_v28, %v1535_v37  ;;  %v1507_v50 = vadd.f32 %v2929_v61, %v1468_v39  ;;  %v1470_v51 = vmul.f32 %v2922_v3, %v1431_v29  ;;  %v1443_v14 = vld [vmem:[#allocation2 + $0x70] sm:$0xff] }
 0x1b1   : > { %2079 = vst [vmem:[%s2805_s8] sm:$0xff] %v2078_v35   ;;  %v1471_v34 = vmul.f32 %v2922_v3, %v1432_v31  ;;  %2155 = vst [vmem:[%s2805_s8 + $0x8] sm:$0xff] %v2083_v41   ;;  %v1508_v55 = vadd.f32 %v2929_v61, %v1469_v47  ;;  %v1472_v56 = vmul.f32 %v2922_v3, %v1433_v40  ;;  %v1446_v39 = vld [vmem:[#allocation2 + $0xd0] sm:$0xff]  ;;  %v1448_v47 = vld [vmem:[#allocation2 + $0x28] sm:$0xff] }
 0x1b2   : > { %v2093_v54 = vpack.c.bf16 %v1538_v45, %v1537_v43  ;;  %v1473_v44 = vmul.f32 %v2922_v3, %v1434_v42  ;;  %2156 = vst [vmem:[%s2805_s8 + $0x10] sm:$0xff] %v2088_v18   ;;  %v1539_v57 = vmax.f32 %v1507_v50, 0.0  ;;  %v1509_v58 = vadd.f32 %v2929_v61, %v1470_v51  ;;  %v1447_v45 = vld [vmem:[#allocation2 + $0x10] sm:$0xff] }
 0x1b3   : > { %v1510_v60 = vadd.f32 %v2929_v61, %v1471_v34  ;;  %v1474_v62 = vmul.f32 %v2922_v3, %v1435_v49  ;;  %v1540_v63 = vmax.f32 %v1508_v55, 0.0  ;;  %v1511_v33 = vadd.f32 %v2929_v61, %v1472_v56  ;;  %v1449_v34 = vld [vmem:[#allocation2 + $0xa0] sm:$0xff] }
 0x1b4   : > { %2157 = vst [vmem:[%s2805_s8 + $0x18] sm:$0xff] %v2093_v54   ;;  %v1512_v48 = vadd.f32 %v2929_v61, %v1473_v44  ;;  %v1475_v53 = vmul.f32 %v2922_v3, %v1436_v52  ;;  %v1541_v36 = vmax.f32 %v1509_v58, 0.0  ;;  %v1476_v4 = vmul.f32 %v2922_v3, %v1437_v46  ;;  %v1450_v52 = vld [vmem:[#allocation2 + $0xf8] sm:$0xff]  ;;  %v1451_v46 = vld [vmem:[#allocation2 + $0x20] sm:$0xff] }
 0x1b5   : > { %v1542_v2 = vmax.f32 %v1510_v60, 0.0  ;;  %v1513_v38 = vadd.f32 %v2929_v61, %v1474_v62  ;;  %v2098_v7 = vpack.c.bf16 %v1540_v63, %v1539_v57  ;;  %v1543_v8 = vmax.f32 %v1511_v33, 0.0  ;;  %v1452_v63 = vld [vmem:[#allocation2 + $0x98] sm:$0xff] }
 0x1b6   : > { %v1544_v9 = vmax.f32 %v1512_v48, 0.0  ;;  %v1514_v59 = vadd.f32 %v2929_v61, %v1475_v53  ;;  %v1477_v15 = vmul.f32 %v2922_v3, %v1438_v0  ;;  %v1515_v17 = vadd.f32 %v2929_v61, %v1476_v4 }
 0x1b7   : > { %v2103_v11 = vpack.c.bf16 %v1542_v2, %v1541_v36  ;;  %v1545_v12 = vmax.f32 %v1513_v38, 0.0  ;;  %2158 = vst [vmem:[%s2805_s8 + $0x20] sm:$0xff] %v2098_v7   ;;  %v1478_v20 = vmul.f32 %v2922_v3, %v1439_v5  ;;  %v1479_v21 = vmul.f32 %v2922_v3, %v1440_v6 }
 0x1b8   : > { %v2108_v16 = vpack.c.bf16 %v1544_v9, %v1543_v8  ;;  %v1546_v19 = vmax.f32 %v1514_v59, 0.0  ;;  %v1516_v22 = vadd.f32 %v2929_v61, %v1477_v15  ;;  %v1547_v24 = vmax.f32 %v1515_v17, 0.0 }
 0x1b9   : > { %2159 = vst [vmem:[%s2805_s8 + $0x28] sm:$0xff] %v2103_v11   ;;  %v1480_v25 = vmul.f32 %v2922_v3, %v1441_v1  ;;  %v1481_v26 = vmul.f32 %v2922_v3, %v1442_v10  ;;  %v1517_v30 = vadd.f32 %v2929_v61, %v1478_v20  ;;  %v1518_v32 = vadd.f32 %v2929_v61, %v1479_v21 }
 0x1ba   : > { %2160 = vst [vmem:[%s2805_s8 + $0x30] sm:$0xff] %v2108_v16   ;;  %v2113_v13 = vpack.c.bf16 %v1546_v19, %v1545_v12  ;;  %v1482_v29 = vmul.f32 %v2922_v3, %v1443_v14  ;;  %v1548_v31 = vmax.f32 %v1516_v22, 0.0  ;;  %v1483_v28 = vmul.f32 %v2922_v3, %v1444_v23 }
 0x1bb   : > { %v1519_v35 = vadd.f32 %v2929_v61, %v1480_v25  ;;  %v1520_v37 = vadd.f32 %v2929_v61, %v1481_v26  ;;  %v1549_v40 = vmax.f32 %v1517_v30, 0.0  ;;  %v1550_v42 = vmax.f32 %v1518_v32, 0.0 }
 0x1bc   : > { %2161 = vst [vmem:[%s2805_s8 + $0x38] sm:$0xff] %v2113_v13   ;;  %v1521_v41 = vadd.f32 %v2929_v61, %v1482_v29  ;;  %v1484_v43 = vmul.f32 %v2922_v3, %v1445_v27  ;;  %v2118_v49 = vpack.c.bf16 %v1548_v31, %v1547_v24  ;;  %v1522_v51 = vadd.f32 %v2929_v61, %v1483_v28 }
 0x1bd   : > { %v1551_v18 = vmax.f32 %v1519_v35, 0.0  ;;  %v1552_v50 = vmax.f32 %v1520_v37, 0.0  ;;  %v2123_v54 = vpack.c.bf16 %v1550_v42, %v1549_v40  ;;  %v1485_v56 = vmul.f32 %v2922_v3, %v1446_v39 }
 0x1be   : > { %v1553_v55 = vmax.f32 %v1521_v41, 0.0  ;;  %v1523_v44 = vadd.f32 %v2929_v61, %v1484_v43  ;;  %2162 = vst [vmem:[%s2805_s8 + $0x40] sm:$0xff] %v2118_v49   ;;  %v1554_v58 = vmax.f32 %v1522_v51, 0.0  ;;  %v1486_v60 = vmul.f32 %v2922_v3, %v1447_v45 }
 0x1bf   : > { %v2128_v57 = vpack.c.bf16 %v1552_v50, %v1551_v18  ;;  %v1487_v62 = vmul.f32 %v2922_v3, %v1448_v47  ;;  %2163 = vst [vmem:[%s2805_s8 + $0x48] sm:$0xff] %v2123_v54   ;;  %v1524_v33 = vadd.f32 %v2929_v61, %v1485_v56  ;;  %v1488_v53 = vmul.f32 %v2922_v3, %v1449_v34 }
 0x1c0   : > { %v1555_v48 = vmax.f32 %v1523_v44, 0.0  ;;  %v1489_v0 = vmul.f32 %v2922_v3, %v1450_v52  ;;  %v2133_v36 = vpack.c.bf16 %v1554_v58, %v1553_v55  ;;  %v1525_v2 = vadd.f32 %v2929_v61, %v1486_v60 }
 0x1c1   : > { %2164 = vst [vmem:[%s2805_s8 + $0x50] sm:$0xff] %v2128_v57   ;;  %v1526_v38 = vadd.f32 %v2929_v61, %v1487_v62  ;;  %v1490_v4 = vmul.f32 %v2922_v3, %v1451_v46  ;;  %v1556_v5 = vmax.f32 %v1524_v33, 0.0  ;;  %v1527_v6 = vadd.f32 %v2929_v61, %v1488_v53 }
 0x1c2   : > { %v1528_v7 = vadd.f32 %v2929_v61, %v1489_v0  ;;  %v1491_v8 = vmul.f32 %v2922_v3, %v1452_v63  ;;  %2165 = vst [vmem:[%s2805_s8 + $0x58] sm:$0xff] %v2133_v36   ;;  %v1557_v9 = vmax.f32 %v1525_v2, 0.0 }
 0x1c3   : > { %v1558_v59 = vmax.f32 %v1526_v38, 0.0  ;;  %v1529_v1 = vadd.f32 %v2929_v61, %v1490_v4  ;;  %v2138_v10 = vpack.c.bf16 %v1556_v5, %v1555_v48  ;;  %v1559_v11 = vmax.f32 %v1527_v6, 0.0 }
 0x1c4   : > { %v1560_v12 = vmax.f32 %v1528_v7, 0.0  ;;  %v1530_v15 = vadd.f32 %v2929_v61, %v1491_v8 }
 0x1c5   : > { %v2143_v17 = vpack.c.bf16 %v1558_v59, %v1557_v9  ;;  %v1561_v14 = vmax.f32 %v1529_v1, 0.0  ;;  %2166 = vst [vmem:[%s2805_s8 + $0x60] sm:$0xff] %v2138_v10  }
 0x1c6   : > { %v2148_v16 = vpack.c.bf16 %v1560_v12, %v1559_v11  ;;  %v1562_v19 = vmax.f32 %v1530_v15, 0.0 }
 0x1c7   : > { %2167 = vst [vmem:[%s2805_s8 + $0x68] sm:$0xff] %v2143_v17  }
 0x1c8   : > { %2168 = vst [vmem:[%s2805_s8 + $0x70] sm:$0xff] %v2148_v16   ;;  %v2153_v20 = vpack.c.bf16 %v1562_v19, %v1561_v14 }
 0x1ca   : > { %2169 = vst [vmem:[%s2805_s8 + $0x78] sm:$0xff] %v2153_v20  }
 0x1cb PF: > { %s14_s21 = sadd.s32 1, %s2572_s21   ;;  %s3035_s15 = smov %s2552_s16 }
 0x1cc   : > { %p11_p0 = scmp.ge.s32.totalorder %s14_s21, 8   ;;  %s3036_s16 = smov %s2651_s28 }
 0x1cd   : > { %s3037_s17 = smov %s2564_s19  ;;  %s3038_s18 = smov %s2568_s20 }
 0x1ce   : > { %s3039_s19 = smov %s3042_s22  ;;  %s3040_s20 = smov %s3046_s23 }
 0x1cf   :  { %13 = sbr.rel (!%p11_p0) target bundleno = 4 (0x4), region = 120 }

// kernel: _lambda_.30
= control target key start
LH: loop header
LB: loop body
LE: loop exit
PB: predicated region body
PF: predicated region fallthrough
CT: control target
= control target key end

     0   :  { %s1598_s15 = smov 0   ;;  %s1600_s16 = smov 0   ;;  %s1772_s0 = inlined_call_operand.vmem [shape: bf16[512,128], index: 0, kind: input, shape index: {}]   ;;  %s1773_s1 = inlined_call_operand.vmem [shape: bf16[128,128], index: 1, kind: input, shape index: {}]   ;;  %s1774_s2 = inlined_call_operand.vmem [shape: f32[1,128], index: 2, kind: input, shape index: {}]   ;;  %s1775_s3 = inlined_call_operand.vmem [shape: f32[1,128], index: 3, kind: input, shape index: {}]   ;;  %s1776_s4 = inlined_call_operand.vmem [shape: bf16[512,128], index: 4, kind: output, shape index: {}]  }
   0x1   :  { %s1602_s17 = smov 0  }
   0x2 LB: > { %s33_s18 = sadd.s32 1, %s1567_s16  ;;  %p1221_p0 = scmp.ge.s32.totalorder %s1571_s17, 1  ;;  %s1571_s17 = sphi %s1602_s17, %s14_s17   ;;  %s1567_s16 = sphi %s1600_s16, %s1778_s16   ;;  %s1563_s15 = sphi %s1598_s15, %s1777_s15  }
   0x3   : > { %p35_p1 = scmp.ge.s32.totalorder %s33_s18, 2  ;;  %p221_p2 = scmp.lt.s32.totalorder %s1571_s17, 3 }
   0x5   : > { %s1780_s18 = smov (%p35_p1, %s33_s18), 0  ;;  %p222_p3 = pnand %p1221_p0, %p221_p2 }
   0x6   : > { %s1222_s21 = sshll.u32 (!%p222_p3), %s1563_s15, 5 }
   0x7   : > { %225 = sbr.rel (%p222_p3) target bundleno = 277 (0x115), region = 36  ;;  %p268_p4 = scmp.lt.s32.totalorder (!%p222_p3), %s1222_s21, 63 }
   0xc   : > { %v1525_v0 = vld [vmem:[%s1773_s1 + $0x38] sm:$0xff]   ;;  %v1526_v1 = vld [vmem:[%s1773_s1 + $0x30] sm:$0xff]   ;;  %s1782_s21 = smov (!%p268_p4, %s1222_s21), 63  ;;  %v1527_v2 = vld [vmem:[%s1773_s1 + $0x28] sm:$0xff]  }
   0xd   : > { %1437 = vmatprep.subr.bf16.mxu0 %v1525_v0  ;;  %1485 = vmatprep.subr.bf16.mxu1 %v1525_v0  ;;  %s1223_s26 = sshll.u32 %s1782_s21, 2  ;;  %v1528_v3 = vld [vmem:[%s1773_s1 + $0x20] sm:$0xff]   ;;  %v1529_v6 = vld [vmem:[%s1773_s1 + $0x18] sm:$0xff]   ;;  %v1530_v7 = vld [vmem:[%s1773_s1 + $0x10] sm:$0xff]  }
   0xe   : > { %1438 = vmatpush3.bf16.msra.mxu0 %v1525_v0  ;;  %1493 = vmatpush3.bf16.msra.mxu1 %v1525_v0  ;;  %s1633_s29 = scalar_lea.vmem %s1772_s0, %s1223_s26  ;;  %v1531_v8 = vld [vmem:[%s1773_s1 + $0x8] sm:$0xff]   ;;  %v1532_v9 = vld [vmem:[%s1773_s1] sm:$0xff]   ;;  %s1699_s24 = scalar_lea.vmem %s1776_s4, %s1223_s26 }
   0xf   : > { %1439 = vmatprep.subr.bf16.mxu0 %v1526_v1  ;;  %1486 = vmatprep.subr.bf16.mxu1 %v1526_v1  ;;  %v1533_v4 = vld [vmem:[%s1633_s29] sm:$0xff]   ;;  %v1535_v10 = vld [vmem:[%s1633_s29 + $0x8] sm:$0xff]   ;;  %v1537_v12 = vld [vmem:[%s1633_s29 + $0x10] sm:$0xff]  }
  0x10   : > { %v1534_v5 = vld [vmem:[%s1633_s29 + $0x40] sm:$0xff]   ;;  %1453 = vmatprep.mubr.bf16.mxu0 %v1533_v4  ;;  %v1536_v11 = vld [vmem:[%s1633_s29 + $0x48] sm:$0xff]   ;;  %v1538_v13 = vld [vmem:[%s1633_s29 + $0x50] sm:$0xff]  }
  0x11   : > { %1469 = vmatprep.mubr.bf16.mxu1 %v1534_v5  ;;  %v1539_v14 = vld [vmem:[%s1633_s29 + $0x18] sm:$0xff]   ;;  %v1541_v16 = vld [vmem:[%s1633_s29 + $0x20] sm:$0xff]   ;;  %v1543_v18 = vld [vmem:[%s1633_s29 + $0x28] sm:$0xff]  }
  0x12   : > { %1440 = vmatpush3.bf16.msra.mxu0 %v1526_v1  ;;  %1494 = vmatpush3.bf16.msra.mxu1 %v1526_v1  ;;  %v1540_v15 = vld [vmem:[%s1633_s29 + $0x58] sm:$0xff]   ;;  %v1542_v17 = vld [vmem:[%s1633_s29 + $0x60] sm:$0xff]   ;;  %v1544_v19 = vld [vmem:[%s1633_s29 + $0x68] sm:$0xff]  }
  0x13   : > { %1441 = vmatprep.subr.bf16.mxu0 %v1527_v2  ;;  %1487 = vmatprep.subr.bf16.mxu1 %v1527_v2  ;;  %v1545_v20 = vld [vmem:[%s1633_s29 + $0x30] sm:$0xff]   ;;  %v1547_v22 = vld [vmem:[%s1633_s29 + $0x38] sm:$0xff]   ;;  %v1669_v24 = vld [vmem:[%s1774_s2] ss:$0 sm:$0xff] }
  0x14   : > { %v1546_v21 = vld [vmem:[%s1633_s29 + $0x70] sm:$0xff]   ;;  %v1548_v23 = vld [vmem:[%s1633_s29 + $0x78] sm:$0xff]   ;;  %v1676_v29 = vld [vmem:[%s1775_s3] ss:$0 sm:$0xff] }
  0x16   : > { %1442 = vmatpush3.bf16.msra.mxu0 %v1527_v2  ;;  %1495 = vmatpush3.bf16.msra.mxu1 %v1527_v2 }
  0x17   : > { %1443 = vmatprep.subr.bf16.mxu0 %v1528_v3  ;;  %1488 = vmatprep.subr.bf16.mxu1 %v1528_v3 }
  0x1a   : > { %1444 = vmatpush3.bf16.msra.mxu0 %v1528_v3  ;;  %1496 = vmatpush3.bf16.msra.mxu1 %v1528_v3 }
  0x1b   : > { %1445 = vmatprep.subr.bf16.mxu0 %v1529_v6  ;;  %1489 = vmatprep.subr.bf16.mxu1 %v1529_v6 }
  0x1e   : > { %1446 = vmatpush3.bf16.msra.mxu0 %v1529_v6  ;;  %1497 = vmatpush3.bf16.msra.mxu1 %v1529_v6 }
  0x1f   : > { %1447 = vmatprep.subr.bf16.mxu0 %v1530_v7  ;;  %1490 = vmatprep.subr.bf16.mxu1 %v1530_v7 }
  0x22   : > { %1448 = vmatpush3.bf16.msra.mxu0 %v1530_v7  ;;  %1498 = vmatpush3.bf16.msra.mxu1 %v1530_v7 }
  0x23   : > { %1449 = vmatprep.subr.bf16.mxu0 %v1531_v8  ;;  %1491 = vmatprep.subr.bf16.mxu1 %v1531_v8 }
  0x26   : > { %1450 = vmatpush3.bf16.msra.mxu0 %v1531_v8  ;;  %1499 = vmatpush3.bf16.msra.mxu1 %v1531_v8 }
  0x27   : > { %1451 = vmatprep.subr.bf16.mxu0 %v1532_v9  ;;  %1492 = vmatprep.subr.bf16.mxu1 %v1532_v9 }
  0x2a   : > { %1452 = vmatpush3.bf16.msra.mxu0 %v1532_v9  ;;  %1500 = vmatpush3.bf16.msra.mxu1 %v1532_v9 }
  0x2d   : > { %1454 = vmatmul.mubr.bf16.vlgmr.msra.gmra.mxu0 %v1535_v10  ;;  %1470 = vmatmul.mubr.bf16.vlgmr.msra.gmra.mxu1 %v1536_v11 }
  0x2e   : > { %1457 = vmatprep.mubr.bf16.mxu0 %v1537_v12  ;;  %1473 = vmatprep.mubr.bf16.mxu1 %v1538_v13 }
  0x35   : > { %1458 = vmatmul.mubr.bf16.gmra.mxu0 %v1539_v14  ;;  %1474 = vmatmul.mubr.bf16.gmra.mxu1 %v1540_v15 }
  0x36   : > { %1461 = vmatprep.mubr.bf16.mxu0 %v1541_v16  ;;  %1477 = vmatprep.mubr.bf16.mxu1 %v1542_v17 }
  0x3d   : > { %1462 = vmatmul.mubr.bf16.gmra.mxu0 %v1543_v18  ;;  %1478 = vmatmul.mubr.bf16.gmra.mxu1 %v1544_v19 }
  0x3e   : > { %1465 = vmatprep.mubr.bf16.mxu0 %v1545_v20  ;;  %1481 = vmatprep.mubr.bf16.mxu1 %v1546_v21 }
  0x45   : > { %1466 = vmatmul.mubr.bf16.gmra.mxu0 %v1547_v22  ;;  %1482 = vmatmul.mubr.bf16.gmra.mxu1 %v1548_v23 }
  0xed   : > { %v1455_v25 = vpop.f32.mrf.mxu0  ;;  %v1471_v26 = vpop.f32.mrf.mxu1 }
  0xee   : > { %v830_v27 = vmul.f32 %v1455_v25, %v1669_v24  ;;  %v846_v28 = vmul.f32 %v1471_v26, %v1669_v24 }
  0xef   : > { %v595_v30 = vpop.f32.mrf.mxu0  ;;  %v659_v31 = vpop.f32.mrf.mxu1 }
  0xf0   : > { %v828_v32 = vmul.f32 %v1669_v24, %v595_v30  ;;  %v844_v33 = vmul.f32 %v1669_v24, %v659_v31  ;;  %v869_v36 = vadd.f32 %v1676_v29, %v830_v27  ;;  %v885_v37 = vadd.f32 %v1676_v29, %v846_v28 }
  0xf1   : > { %v1456_v34 = vpop.f32.mrf.mxu0  ;;  %v1472_v35 = vpop.f32.mrf.mxu1 }
  0xf2   : > { %v831_v38 = vmul.f32 %v1456_v34, %v1669_v24  ;;  %v847_v39 = vmul.f32 %v1472_v35, %v1669_v24  ;;  %v867_v42 = vadd.f32 %v1676_v29, %v828_v32  ;;  %v883_v43 = vadd.f32 %v1676_v29, %v844_v33 }
  0xf3   : > { %v598_v40 = vpop.f32.mrf.mxu0  ;;  %v662_v41 = vpop.f32.mrf.mxu1  ;;  %v901_v50 = vmax.f32 %v869_v36, 0.0  ;;  %v917_v51 = vmax.f32 %v885_v37, 0.0 }
  0xf4   : > { %v829_v44 = vmul.f32 %v1669_v24, %v598_v40  ;;  %v845_v45 = vmul.f32 %v1669_v24, %v662_v41  ;;  %v870_v46 = vadd.f32 %v1676_v29, %v831_v38  ;;  %v886_v47 = vadd.f32 %v1676_v29, %v847_v39 }
  0xf5   : > { %v1459_v48 = vpop.f32.mrf.mxu0  ;;  %v1475_v49 = vpop.f32.mrf.mxu1  ;;  %v899_v60 = vmax.f32 %v867_v42, 0.0  ;;  %v915_v61 = vmax.f32 %v883_v43, 0.0 }
  0xf6   : > { %v868_v52 = vadd.f32 %v1676_v29, %v829_v44  ;;  %v884_v53 = vadd.f32 %v1676_v29, %v845_v45  ;;  %v902_v54 = vmax.f32 %v870_v46, 0.0  ;;  %v918_v55 = vmax.f32 %v886_v47, 0.0 }
  0xf7   : > { %v834_v56 = vmul.f32 %v1459_v48, %v1669_v24  ;;  %v850_v57 = vmul.f32 %v1475_v49, %v1669_v24  ;;  %v611_v58 = vpop.f32.mrf.mxu0  ;;  %v675_v59 = vpop.f32.mrf.mxu1 }
  0xf8   : > { %v900_v62 = vmax.f32 %v868_v52, 0.0  ;;  %v916_v63 = vmax.f32 %v884_v53, 0.0  ;;  %v1326_v0 = vpack.c.bf16 %v902_v54, %v901_v50  ;;  %v1366_v1 = vpack.c.bf16 %v918_v55, %v917_v51 }
  0xf9   : > { %v832_v2 = vmul.f32 %v1669_v24, %v611_v58  ;;  %v848_v3 = vmul.f32 %v1669_v24, %v675_v59  ;;  %v1460_v4 = vpop.f32.mrf.mxu0  ;;  %v1476_v5 = vpop.f32.mrf.mxu1  ;;  %v873_v8 = vadd.f32 %v1676_v29, %v834_v56  ;;  %v889_v9 = vadd.f32 %v1676_v29, %v850_v57 }
  0xfa   : > { %v1321_v6 = vpack.c.bf16 %v900_v62, %v899_v60  ;;  %v1361_v7 = vpack.c.bf16 %v916_v63, %v915_v61  ;;  %1398 = vst [vmem:[%s1699_s24 + $0x8] sm:$0xff] %v1326_v0   ;;  %1406 = vst [vmem:[%s1699_s24 + $0x48] sm:$0xff] %v1366_v1   ;;  %v835_v10 = vmul.f32 %v1460_v4, %v1669_v24 }
  0xfb   : > { %v851_v11 = vmul.f32 %v1476_v5, %v1669_v24  ;;  %v614_v12 = vpop.f32.mrf.mxu0  ;;  %v678_v13 = vpop.f32.mrf.mxu1  ;;  %v871_v14 = vadd.f32 %v1676_v29, %v832_v2  ;;  %v887_v15 = vadd.f32 %v1676_v29, %v848_v3  ;;  %v905_v27 = vmax.f32 %v873_v8, 0.0 }
  0xfc   : > { %1322 = vst [vmem:[%s1699_s24] sm:$0xff] %v1321_v6   ;;  %1405 = vst [vmem:[%s1699_s24 + $0x40] sm:$0xff] %v1361_v7   ;;  %v833_v16 = vmul.f32 %v1669_v24, %v614_v12  ;;  %v849_v17 = vmul.f32 %v1669_v24, %v678_v13  ;;  %v874_v18 = vadd.f32 %v1676_v29, %v835_v10  ;;  %v921_v28 = vmax.f32 %v889_v9, 0.0 }
  0xfd   : > { %v890_v19 = vadd.f32 %v1676_v29, %v851_v11  ;;  %v1463_v20 = vpop.f32.mrf.mxu0  ;;  %v1479_v21 = vpop.f32.mrf.mxu1  ;;  %v903_v34 = vmax.f32 %v871_v14, 0.0  ;;  %v919_v35 = vmax.f32 %v887_v15, 0.0 }
  0xfe   : > { %v872_v22 = vadd.f32 %v1676_v29, %v833_v16  ;;  %v888_v23 = vadd.f32 %v1676_v29, %v849_v17  ;;  %v838_v25 = vmul.f32 %v1463_v20, %v1669_v24  ;;  %v854_v26 = vmul.f32 %v1479_v21, %v1669_v24 }
  0xff   : > { %v906_v30 = vmax.f32 %v874_v18, 0.0  ;;  %v922_v31 = vmax.f32 %v890_v19, 0.0  ;;  %v627_v32 = vpop.f32.mrf.mxu0  ;;  %v691_v33 = vpop.f32.mrf.mxu1 }
 0x100   : > { %v904_v36 = vmax.f32 %v872_v22, 0.0  ;;  %v920_v37 = vmax.f32 %v888_v23, 0.0  ;;  %v836_v40 = vmul.f32 %v1669_v24, %v627_v32  ;;  %v852_v41 = vmul.f32 %v1669_v24, %v691_v33 }
 0x101   : > { %v1336_v38 = vpack.c.bf16 %v906_v30, %v905_v27  ;;  %v1376_v39 = vpack.c.bf16 %v922_v31, %v921_v28  ;;  %v1464_v42 = vpop.f32.mrf.mxu0  ;;  %v1480_v43 = vpop.f32.mrf.mxu1  ;;  %v877_v46 = vadd.f32 %v1676_v29, %v838_v25  ;;  %v893_v47 = vadd.f32 %v1676_v29, %v854_v26 }
 0x102   : > { %v1331_v44 = vpack.c.bf16 %v904_v36, %v903_v34  ;;  %v1371_v45 = vpack.c.bf16 %v920_v37, %v919_v35  ;;  %v839_v48 = vmul.f32 %v1464_v42, %v1669_v24  ;;  %v855_v49 = vmul.f32 %v1480_v43, %v1669_v24 }
 0x103   : > { %1400 = vst [vmem:[%s1699_s24 + $0x18] sm:$0xff] %v1336_v38   ;;  %1408 = vst [vmem:[%s1699_s24 + $0x58] sm:$0xff] %v1376_v39   ;;  %v630_v50 = vpop.f32.mrf.mxu0  ;;  %v694_v51 = vpop.f32.mrf.mxu1  ;;  %v875_v52 = vadd.f32 %v1676_v29, %v836_v40  ;;  %v891_v53 = vadd.f32 %v1676_v29, %v852_v41  ;;  %v909_v60 = vmax.f32 %v877_v46, 0.0  ;;  %v925_v61 = vmax.f32 %v893_v47, 0.0 }
 0x104   : > { %1399 = vst [vmem:[%s1699_s24 + $0x10] sm:$0xff] %v1331_v44   ;;  %1407 = vst [vmem:[%s1699_s24 + $0x50] sm:$0xff] %v1371_v45   ;;  %v837_v54 = vmul.f32 %v1669_v24, %v630_v50  ;;  %v853_v55 = vmul.f32 %v1669_v24, %v694_v51  ;;  %v878_v56 = vadd.f32 %v1676_v29, %v839_v48 }
 0x105   : > { %v894_v57 = vadd.f32 %v1676_v29, %v855_v49  ;;  %v1467_v58 = vpop.f32.mrf.mxu0  ;;  %v1483_v59 = vpop.f32.mrf.mxu1  ;;  %v907_v6 = vmax.f32 %v875_v52, 0.0  ;;  %v923_v7 = vmax.f32 %v891_v53, 0.0 }
 0x106   : > { %v876_v62 = vadd.f32 %v1676_v29, %v837_v54  ;;  %v892_v63 = vadd.f32 %v1676_v29, %v853_v55  ;;  %v910_v0 = vmax.f32 %v878_v56, 0.0  ;;  %v842_v2 = vmul.f32 %v1467_v58, %v1669_v24 }
 0x107   : > { %v926_v1 = vmax.f32 %v894_v57, 0.0  ;;  %v858_v3 = vmul.f32 %v1483_v59, %v1669_v24  ;;  %v643_v4 = vpop.f32.mrf.mxu0  ;;  %v707_v5 = vpop.f32.mrf.mxu1 }
 0x108   : > { %v908_v8 = vmax.f32 %v876_v62, 0.0  ;;  %v924_v9 = vmax.f32 %v892_v63, 0.0  ;;  %v1346_v10 = vpack.c.bf16 %v910_v0, %v909_v60  ;;  %v840_v12 = vmul.f32 %v1669_v24, %v643_v4 }
 0x109   : > { %v1386_v11 = vpack.c.bf16 %v926_v1, %v925_v61  ;;  %v856_v13 = vmul.f32 %v1669_v24, %v707_v5  ;;  %v1468_v14 = vpop.f32.mrf.mxu0  ;;  %v1484_v15 = vpop.f32.mrf.mxu1  ;;  %v881_v18 = vadd.f32 %v1676_v29, %v842_v2  ;;  %v897_v19 = vadd.f32 %v1676_v29, %v858_v3 }
 0x10a   : > { %v1341_v16 = vpack.c.bf16 %v908_v8, %v907_v6  ;;  %v1381_v17 = vpack.c.bf16 %v924_v9, %v923_v7  ;;  %1402 = vst [vmem:[%s1699_s24 + $0x28] sm:$0xff] %v1346_v10   ;;  %v843_v20 = vmul.f32 %v1468_v14, %v1669_v24  ;;  %v859_v21 = vmul.f32 %v1484_v15, %v1669_v24 }
 0x10b   : > { %1410 = vst [vmem:[%s1699_s24 + $0x68] sm:$0xff] %v1386_v11   ;;  %v646_v22 = vpop.f32.mrf.mxu0  ;;  %v710_v23 = vpop.f32.mrf.mxu1  ;;  %v879_v25 = vadd.f32 %v1676_v29, %v840_v12  ;;  %v895_v26 = vadd.f32 %v1676_v29, %v856_v13  ;;  %v913_v34 = vmax.f32 %v881_v18, 0.0  ;;  %v929_v35 = vmax.f32 %v897_v19, 0.0 }
 0x10c   : > { %1401 = vst [vmem:[%s1699_s24 + $0x20] sm:$0xff] %v1341_v16   ;;  %1409 = vst [vmem:[%s1699_s24 + $0x60] sm:$0xff] %v1381_v17   ;;  %v841_v27 = vmul.f32 %v1669_v24, %v646_v22  ;;  %v857_v28 = vmul.f32 %v1669_v24, %v710_v23  ;;  %v882_v30 = vadd.f32 %v1676_v29, %v843_v20 }
 0x10d   : > { %v898_v31 = vadd.f32 %v1676_v29, %v859_v21  ;;  %v911_v38 = vmax.f32 %v879_v25, 0.0  ;;  %v927_v39 = vmax.f32 %v895_v26, 0.0 }
 0x10e   : > { %v880_v32 = vadd.f32 %v1676_v29, %v841_v27  ;;  %v896_v33 = vadd.f32 %v1676_v29, %v857_v28  ;;  %v914_v36 = vmax.f32 %v882_v30, 0.0 }
 0x10f   : > { %v930_v37 = vmax.f32 %v898_v31, 0.0 }
 0x110   : > { %v912_v40 = vmax.f32 %v880_v32, 0.0  ;;  %v928_v24 = vmax.f32 %v896_v33, 0.0  ;;  %v1356_v41 = vpack.c.bf16 %v914_v36, %v913_v34 }
 0x111   : > { %v1396_v42 = vpack.c.bf16 %v930_v37, %v929_v35 }
 0x112   : > { %v1351_v43 = vpack.c.bf16 %v912_v40, %v911_v38  ;;  %v1391_v44 = vpack.c.bf16 %v928_v24, %v927_v39  ;;  %1404 = vst [vmem:[%s1699_s24 + $0x38] sm:$0xff] %v1356_v41  }
 0x113   : > { %1412 = vst [vmem:[%s1699_s24 + $0x78] sm:$0xff] %v1396_v42  }
 0x114   : > { %1403 = vst [vmem:[%s1699_s24 + $0x30] sm:$0xff] %v1351_v43   ;;  %1411 = vst [vmem:[%s1699_s24 + $0x70] sm:$0xff] %v1391_v44  }
 0x115 PF: > { %s14_s17 = sadd.s32 1, %s1571_s17   ;;  %s1777_s15 = smov %s1567_s16 }
 0x116   : > { %p11_p5 = scmp.ge.s32.totalorder %s14_s17, 4   ;;  %s1778_s16 = smov %s1780_s18 }
 0x118   :  { %13 = sbr.rel (!%p11_p5) target bundleno = 2 (0x2), region = 83 }

// kernel: _lambda_.31
= control target key start
LH: loop header
LB: loop body
LE: loop exit
PB: predicated region body
PF: predicated region fallthrough
CT: control target
= control target key end

     0   :  { %s1743_s15 = smov 0   ;;  %s1745_s16 = smov 0   ;;  %s1996_s0 = inlined_call_operand.vmem [shape: bf16[128,1152], index: 0, kind: input, shape index: {}]   ;;  %s1997_s1 = inlined_call_operand.vmem [shape: bf16[1152,128], index: 1, kind: input, shape index: {}]   ;;  %s1998_s2 = inlined_call_operand.vmem [shape: f32[1,128], index: 2, kind: input, shape index: {}]   ;;  %s1999_s3 = inlined_call_operand.vmem [shape: f32[1,128], index: 3, kind: input, shape index: {}]   ;;  %s2000_s4 = inlined_call_operand.vmem [shape: bf16[128,128], index: 4, kind: output, shape index: {}]  }
   0x1   :  { %s1747_s17 = smov 0   ;;  %s1749_s18 = smov 0  }
   0x2   :  { %s1751_s19 = smov 0  }
   0x3 LB: > { %s26_s20 = sadd.s32 1, %s1711_s18  ;;  %p49_p1 = scmp.ne.s32.totalorder %s1703_s16, %s1699_s15  ;;  %s1715_s19 = sphi %s1751_s19, %s14_s19   ;;  %s1711_s18 = sphi %s1749_s18, %s2004_s18   ;;  %s1707_s17 = sphi %s1747_s17, %s2003_s17   ;;  %s1703_s16 = sphi %s1745_s16, %s2002_s16   ;;  %s1699_s15 = sphi %s1743_s15, %s2001_s15  }
   0x4   : > { %p27_p0 = scmp.ge.s32.totalorder %s26_s20, 3  ;;  %p50_p2 = scmp.eq.s32.totalorder %s1715_s19, 0 }
   0x5   : > { %s42_s22 = sadd.s32 1, %s1703_s16  ;;  %p1294_p5 = scmp.ge.s32.totalorder %s1715_s19, 3 }
   0x6   : > { %s2006_s20 = smov (%p27_p0, %s26_s20), 0  ;;  %p51_p3 = por %p50_p2, %p49_p1 }
   0x7   : > { %s38_s21 = ssub.s32 %s1711_s18, %s2006_s20  ;;  %195 = sbr.rel (%p1294_p5) target bundleno = 35 (0x23), region = 24 }
   0x8   : > { %p40_p4 = scmp.eq.s32.totalorder %s38_s21, 0 }
   0xa   : > { %s1778_s23 = scalar_select %p40_p4, %s1703_s16, %s42_s22  }
   0xc   : > { %198 = sbr.rel (!%p51_p3) target bundleno = 35 (0x23), region = 28  ;;  %s200_s24 = sand.u32 (%p51_p3), 1, %s1703_s16  }
   0xd   : > { %s1402_s25 = smul.u32 (%p51_p3), 12, %s1711_s18 }
   0xe   : > { %s1578_s26 = smul.u32 (%p51_p3), 192, %s200_s24 }
   0xf   : > { %s1786_s29 = scalar_lea.vmem (%p51_p3), %s1996_s0, %s1402_s25 }
  0x10   : > { %v223_v0 = vld [vmem:[%s1786_s29] sm:$0xff] (%p51_p3)  ;;  %v227_v2 = vld [vmem:[%s1786_s29 + $0x48] sm:$0xff] (%p51_p3)  ;;  %s1791_s30 = scalar_lea.vmem (%p51_p3), [#allocation3], %s1578_s26  ;;  %v231_v4 = vld [vmem:[%s1786_s29 + $0x90] sm:$0xff] (%p51_p3) }
  0x11   : > { %v225_v1 = vld [vmem:[%s1786_s29 + $0x24] sm:$0xff]  ;;  %224 = vst [vmem:[%s1791_s30] sm:$0xff] %v223_v0  ;;  %228 = vst [vmem:[%s1791_s30 + $0x18] sm:$0xff] %v227_v2  ;;  %v229_v3 = vld [vmem:[%s1786_s29 + $0x6c] sm:$0xff] }
  0x12   : > { %226 = vst [vmem:[%s1791_s30 + $0xc] sm:$0xff] %v225_v1  ;;  %v233_v5 = vld [vmem:[%s1786_s29 + $0xb4] sm:$0xff]  ;;  %230 = vst [vmem:[%s1791_s30 + $0x24] sm:$0xff] %v229_v3  ;;  %v237_v7 = vld [vmem:[%s1786_s29 + $0xfc] sm:$0xff] }
  0x13   : > { %232 = vst [vmem:[%s1791_s30 + $0x30] sm:$0xff] %v231_v4  ;;  %234 = vst [vmem:[%s1791_s30 + $0x3c] sm:$0xff] %v233_v5  ;;  %v235_v6 = vld [vmem:[%s1786_s29 + $0xd8] sm:$0xff]  ;;  %v239_v8 = vld [vmem:[%s1786_s29 + $0x120] sm:$0xff] }
  0x14   : > { %236 = vst [vmem:[%s1791_s30 + $0x48] sm:$0xff] %v235_v6  ;;  %238 = vst [vmem:[%s1791_s30 + $0x54] sm:$0xff] %v237_v7  ;;  %v241_v9 = vld [vmem:[%s1786_s29 + $0x144] sm:$0xff]  ;;  %v245_v11 = vld [vmem:[%s1786_s29 + $0x18c] sm:$0xff] }
  0x15   : > { %240 = vst [vmem:[%s1791_s30 + $0x60] sm:$0xff] %v239_v8  ;;  %v243_v10 = vld [vmem:[%s1786_s29 + $0x168] sm:$0xff]  ;;  %242 = vst [vmem:[%s1791_s30 + $0x6c] sm:$0xff] %v241_v9  ;;  %v247_v12 = vld [vmem:[%s1786_s29 + $0x1b0] sm:$0xff] }
  0x16   : > { %244 = vst [vmem:[%s1791_s30 + $0x78] sm:$0xff] %v243_v10  ;;  %246 = vst [vmem:[%s1791_s30 + $0x84] sm:$0xff] %v245_v11  ;;  %v249_v13 = vld [vmem:[%s1786_s29 + $0x1d4] sm:$0xff]  ;;  %v253_v15 = vld [vmem:[%s1786_s29 + $0x21c] sm:$0xff] }
  0x17   : > { %v251_v14 = vld [vmem:[%s1786_s29 + $0x1f8] sm:$0xff]  ;;  %248 = vst [vmem:[%s1791_s30 + $0x90] sm:$0xff] %v247_v12  ;;  %250 = vst [vmem:[%s1791_s30 + $0x9c] sm:$0xff] %v249_v13  ;;  %v1296_v16 = vld [vmem:[%s1786_s29 + $0x8] sm:$0xf] }
  0x18   : > { %252 = vst [vmem:[%s1791_s30 + $0xa8] sm:$0xff] %v251_v14  ;;  %v1298_v17 = vld [vmem:[%s1786_s29 + $0x2c] sm:$0xf]  ;;  %254 = vst [vmem:[%s1791_s30 + $0xb4] sm:$0xff] %v253_v15  ;;  %v1300_v18 = vld [vmem:[%s1786_s29 + $0x50] sm:$0xf] }
  0x19   : > { %1297 = vst [vmem:[%s1791_s30 + $0x8] sm:$0xf] %v1296_v16  ;;  %1299 = vst [vmem:[%s1791_s30 + $0x14] sm:$0xf] %v1298_v17  ;;  %v1302_v19 = vld [vmem:[%s1786_s29 + $0x74] sm:$0xf] }
  0x1a   : > { %v1304_v20 = vld [vmem:[%s1786_s29 + $0x98] sm:$0xf]  ;;  %1301 = vst [vmem:[%s1791_s30 + $0x20] sm:$0xf] %v1300_v18  ;;  %1303 = vst [vmem:[%s1791_s30 + $0x2c] sm:$0xf] %v1302_v19 }
  0x1b   : > { %1305 = vst [vmem:[%s1791_s30 + $0x38] sm:$0xf] %v1304_v20  ;;  %v1306_v21 = vld [vmem:[%s1786_s29 + $0xbc] sm:$0xf]  ;;  %v1308_v22 = vld [vmem:[%s1786_s29 + $0xe0] sm:$0xf] }
  0x1c   : > { %v1310_v23 = vld [vmem:[%s1786_s29 + $0x104] sm:$0xf]  ;;  %1307 = vst [vmem:[%s1791_s30 + $0x44] sm:$0xf] %v1306_v21  ;;  %1309 = vst [vmem:[%s1791_s30 + $0x50] sm:$0xf] %v1308_v22 }
  0x1d   : > { %1311 = vst [vmem:[%s1791_s30 + $0x5c] sm:$0xf] %v1310_v23  ;;  %v1312_v24 = vld [vmem:[%s1786_s29 + $0x128] sm:$0xf]  ;;  %v1314_v25 = vld [vmem:[%s1786_s29 + $0x14c] sm:$0xf] }
  0x1e   : > { %v1316_v26 = vld [vmem:[%s1786_s29 + $0x170] sm:$0xf]  ;;  %1313 = vst [vmem:[%s1791_s30 + $0x68] sm:$0xf] %v1312_v24  ;;  %1315 = vst [vmem:[%s1791_s30 + $0x74] sm:$0xf] %v1314_v25 }
  0x1f   : > { %1317 = vst [vmem:[%s1791_s30 + $0x80] sm:$0xf] %v1316_v26  ;;  %v1318_v27 = vld [vmem:[%s1786_s29 + $0x194] sm:$0xf]  ;;  %v1320_v28 = vld [vmem:[%s1786_s29 + $0x1b8] sm:$0xf] }
  0x20   : > { %v1322_v29 = vld [vmem:[%s1786_s29 + $0x1dc] sm:$0xf]  ;;  %1319 = vst [vmem:[%s1791_s30 + $0x8c] sm:$0xf] %v1318_v27  ;;  %1321 = vst [vmem:[%s1791_s30 + $0x98] sm:$0xf] %v1320_v28 }
  0x21   : > { %1323 = vst [vmem:[%s1791_s30 + $0xa4] sm:$0xf] %v1322_v29  ;;  %v1324_v30 = vld [vmem:[%s1786_s29 + $0x200] sm:$0xf]  ;;  %v1326_v31 = vld [vmem:[%s1786_s29 + $0x224] sm:$0xf] }
  0x22   : > { %1325 = vst [vmem:[%s1791_s30 + $0xb0] sm:$0xf] %v1324_v30  ;;  %1327 = vst [vmem:[%s1791_s30 + $0xbc] sm:$0xf] %v1326_v31 }
  0x23 PF: > { %p1328_p6 = scmp.ge.s32.totalorder %s1715_s19, 1  ;;  %p311_p7 = scmp.lt.s32.totalorder %s1715_s19, 4 }
  0x25   : > { %p312_p8 = pnand %p1328_p6, %p311_p7 }
  0x26   : > { %s318_s5 = sand.u32 (!%p312_p8), 1, %s1699_s15   ;;  %s362_s6 = smul.u32 (!%p312_p8), 48, %s1707_s17 }
  0x27   : > { %315 = sbr.rel (%p312_p8) target bundleno = 375 (0x177), region = 58  ;;  %p1330_p10 = scmp.ne.s32.totalorder (!%p312_p8), %s1707_s17, 0 }
  0x28   : > { %s1579_s7 = smul.u32 (!%p312_p8), 192, %s318_s5  ;;  %p363_p9 = scmp.lt.s32.totalorder (!%p312_p8), %s362_s6, 143 }
  0x2a   : > { %s1863_s12 = scalar_lea.vmem (!%p312_p8), [#allocation3], %s1579_s7 }
  0x2c   : > { %s2008_s6 = smov (!%p363_p9, %s362_s6), 143  ;;  %390 = sbr.rel (%p1330_p10) target bundleno = 58 (0x3a), region = 66 }
  0x2d   : > { %s1329_s8 = sshll.u32 %s2008_s6, 2 }
  0x2e   : > { %s1861_s11 = scalar_lea.vmem %s1997_s1, %s1329_s8 }
  0x31   : > { %v1717_v32 = vmov 0.0  }
  0x32   : > { %391 = vst [vmem:[#allocation2 + $0x30] sm:$0xff] %v1717_v32  ;;  %392 = vst [vmem:[#allocation2] sm:$0xff] %v1717_v32 }
  0x33   : > { %393 = vst [vmem:[#allocation2 + $0x58] sm:$0xff] %v1717_v32  ;;  %394 = vst [vmem:[#allocation2 + $0x18] sm:$0xff] %v1717_v32 }
  0x34   : > { %395 = vst [vmem:[#allocation2 + $0x50] sm:$0xff] %v1717_v32  ;;  %396 = vst [vmem:[#allocation2 + $0x68] sm:$0xff] %v1717_v32 }
  0x35   : > { %397 = vst [vmem:[#allocation2 + $0x8] sm:$0xff] %v1717_v32  ;;  %398 = vst [vmem:[#allocation2 + $0x48] sm:$0xff] %v1717_v32 }
  0x36   : > { %399 = vst [vmem:[#allocation2 + $0x40] sm:$0xff] %v1717_v32  ;;  %400 = vst [vmem:[#allocation2 + $0x20] sm:$0xff] %v1717_v32 }
  0x37   : > { %401 = vst [vmem:[#allocation2 + $0x10] sm:$0xff] %v1717_v32  ;;  %402 = vst [vmem:[#allocation2 + $0x38] sm:$0xff] %v1717_v32 }
  0x38   : > { %403 = vst [vmem:[#allocation2 + $0x60] sm:$0xff] %v1717_v32  ;;  %404 = vst [vmem:[#allocation2 + $0x70] sm:$0xff] %v1717_v32 }
  0x39   : > { %405 = vst [vmem:[#allocation2 + $0x78] sm:$0xff] %v1717_v32  ;;  %406 = vst [vmem:[#allocation2 + $0x28] sm:$0xff] %v1717_v32 }
  0x3a PF: > { %v1621_v33 = vld [vmem:[%s1861_s11 + $0x78] sm:$0xff]   ;;  %v1624_v36 = vld [vmem:[%s1861_s11 + $0x70] sm:$0xff]   ;;  %v1627_v39 = vld [vmem:[%s1861_s11 + $0x68] sm:$0xff]   ;;  %p1379_p11 = scmp.ne.s32.totalorder %s1707_s17, 2 }
  0x3b   : > { %v1622_v34 = vld [vmem:[%s1861_s11 + $0x38] sm:$0xff]   ;;  %1466 = vmatprep.subr.bf16.mxu0 %v1621_v33  ;;  %v1625_v37 = vld [vmem:[%s1861_s11 + $0x30] sm:$0xff]   ;;  %v1628_v40 = vld [vmem:[%s1861_s11 + $0x28] sm:$0xff]  }
  0x3c   : > { %v1623_v35 = vld [vmem:[%s1861_s11 + $0xb8] sm:$0xff]   ;;  %1467 = vmatpush3.bf16.msra.mxu0 %v1622_v34  ;;  %v1626_v38 = vld [vmem:[%s1861_s11 + $0xb0] sm:$0xff]   ;;  %v1629_v41 = vld [vmem:[%s1861_s11 + $0xa8] sm:$0xff]  }
  0x3d   : > { %1546 = vmatprep.subr.bf16.mxu1 %v1623_v35  ;;  %1468 = vmatprep.subr.bf16.mxu0 %v1624_v36  ;;  %v1630_v42 = vld [vmem:[%s1861_s11 + $0x60] sm:$0xff]   ;;  %v1633_v45 = vld [vmem:[%s1861_s11 + $0x58] sm:$0xff]   ;;  %v1636_v48 = vld [vmem:[%s1861_s11 + $0x50] sm:$0xff]  }
  0x3e   : > { %1547 = vmatpush3.bf16.msra.mxu1 %v1623_v35  ;;  %v1631_v43 = vld [vmem:[%s1861_s11 + $0x20] sm:$0xff]   ;;  %v1635_v46 = vld [vmem:[%s1861_s11 + $0x98] sm:$0xff]   ;;  %v1638_v49 = vld [vmem:[%s1861_s11 + $0x90] sm:$0xff]  }
  0x3f   : > { %1548 = vmatprep.subr.bf16.mxu1 %v1626_v38  ;;  %v1632_v44 = vld [vmem:[%s1861_s11 + $0xa0] sm:$0xff]   ;;  %v1634_v47 = vld [vmem:[%s1861_s11 + $0x18] sm:$0xff]   ;;  %v1637_v50 = vld [vmem:[%s1861_s11 + $0x10] sm:$0xff]  }
  0x40   : > { %1469 = vmatpush3.bf16.msra.mxu0 %v1625_v37  ;;  %v1639_v51 = vld [vmem:[%s1861_s11 + $0x48] sm:$0xff]   ;;  %v1642_v54 = vld [vmem:[%s1861_s11 + $0x40] sm:$0xff]   ;;  %v1657_v1 = vld [vmem:[%s1863_s12 + $0x50] ss:$12 sps:$4 sm:$0xff]  }
  0x41   : > { %1470 = vmatprep.subr.bf16.mxu0 %v1627_v39  ;;  %v1640_v52 = vld [vmem:[%s1861_s11 + $0x8] sm:$0xff]   ;;  %v1644_v55 = vld [vmem:[%s1861_s11 + $0x80] sm:$0xff]   ;;  %v1655_v3 = vld [vmem:[%s1863_s12 + $0x30] ss:$12 sps:$4 sm:$0xff]  }
  0x42   : > { %1549 = vmatpush3.bf16.msra.mxu1 %v1626_v38  ;;  %v1641_v53 = vld [vmem:[%s1861_s11 + $0x88] sm:$0xff]   ;;  %v1647_v56 = vld [vmem:[%s1863_s12 + $0x4] ss:$12 sps:$4 sm:$0xff]   ;;  %v1653_v0 = vld [vmem:[%s1863_s12 + $0x34] ss:$12 sps:$4 sm:$0xff]  }
  0x43   : > { %1550 = vmatprep.subr.bf16.mxu1 %v1629_v41  ;;  %v1648_v57 = vld [vmem:[%s1863_s12 + $0x8] ss:$12 sps:$4 sm:$0xff]   ;;  %v1643_v58 = vld [vmem:[%s1861_s11] sm:$0xff]   ;;  %807 = vmatprep.mubr.bf16.mxu0 %v1647_v56  ;;  %v1658_v4 = vld [vmem:[%s1863_s12 + $0x4c] ss:$12 sps:$4 sm:$0xff]  }
  0x44   : > { %1471 = vmatpush3.bf16.msra.mxu0 %v1628_v40  ;;  %1562 = vmatprep.mubr.bf16.mxu1 %v1648_v57  ;;  %v1645_v59 = vld [vmem:[%s1863_s12] ss:$12 sps:$4 sm:$0xff]   ;;  %v1650_v60 = vld [vmem:[%s1863_s12 + $0x1c] ss:$12 sps:$4 sm:$0xff]   ;;  %v1656_v62 = vld [vmem:[%s1863_s12 + $0x38] ss:$12 sps:$4 sm:$0xff]  }
  0x45   : > { %1472 = vmatprep.subr.bf16.mxu0 %v1630_v42  ;;  %v1649_v61 = vld [vmem:[%s1863_s12 + $0x20] ss:$12 sps:$4 sm:$0xff]   ;;  %v1652_v63 = vld [vmem:[%s1863_s12 + $0x18] ss:$12 sps:$4 sm:$0xff]   ;;  %v1664_v2 = vld [vmem:[%s1863_s12 + $0x68] ss:$12 sps:$4 sm:$0xff]  }
  0x46   : > { %1551 = vmatpush3.bf16.msra.mxu1 %v1629_v41  ;;  %v1665_v5 = vld [vmem:[%s1863_s12 + $0x80] ss:$12 sps:$4 sm:$0xff]   ;;  %v1672_v6 = vld [vmem:[%s1863_s12 + $0x98] ss:$12 sps:$4 sm:$0xff]   ;;  %v1660_v7 = vld [vmem:[%s1863_s12 + $0x48] ss:$12 sps:$4 sm:$0xff]  }
  0x47   : > { %1552 = vmatprep.subr.bf16.mxu1 %v1632_v44  ;;  %v1661_v8 = vld [vmem:[%s1863_s12 + $0x64] ss:$12 sps:$4 sm:$0xff]   ;;  %v1663_v10 = vld [vmem:[%s1863_s12 + $0x60] ss:$12 sps:$4 sm:$0xff]   ;;  %v1666_v11 = vld [vmem:[%s1863_s12 + $0x7c] ss:$12 sps:$4 sm:$0xff]  }
  0x48   : > { %1473 = vmatpush3.bf16.msra.mxu0 %v1631_v43  ;;  %v1673_v9 = vld [vmem:[%s1863_s12 + $0xb0] ss:$12 sps:$4 sm:$0xff]   ;;  %v1668_v12 = vld [vmem:[%s1863_s12 + $0x78] ss:$12 sps:$4 sm:$0xff]   ;;  %v1669_v13 = vld [vmem:[%s1863_s12 + $0x94] ss:$12 sps:$4 sm:$0xff]  }
  0x49   : > { %1474 = vmatprep.subr.bf16.mxu0 %v1633_v45  ;;  %v1671_v14 = vld [vmem:[%s1863_s12 + $0x90] ss:$12 sps:$4 sm:$0xff]   ;;  %v1674_v15 = vld [vmem:[%s1863_s12 + $0xac] ss:$12 sps:$4 sm:$0xff]   ;;  %v1676_v16 = vld [vmem:[%s1863_s12 + $0xa8] ss:$12 sps:$4 sm:$0xff]  }
  0x4a   : > { %1553 = vmatpush3.bf16.msra.mxu1 %v1632_v44  ;;  %v407_v22 = vld [vmem:[#allocation2 + $0x30] sm:$0xff]  ;;  %v408_v30 = vld [vmem:[#allocation2] sm:$0xff]  ;;  %v409_v37 = vld [vmem:[#allocation2 + $0x58] sm:$0xff] }
  0x4b   : > { %1554 = vmatprep.subr.bf16.mxu1 %v1635_v46  ;;  %v410_v44 = vld [vmem:[#allocation2 + $0x18] sm:$0xff] }
  0x4c   : > { %1475 = vmatpush3.bf16.msra.mxu0 %v1634_v47 }
  0x4d   : > { %1476 = vmatprep.subr.bf16.mxu0 %v1636_v48 }
  0x4e   : > { %1555 = vmatpush3.bf16.msra.mxu1 %v1635_v46 }
  0x4f   : > { %1556 = vmatprep.subr.bf16.mxu1 %v1638_v49 }
  0x50   : > { %1477 = vmatpush3.bf16.msra.mxu0 %v1637_v50 }
  0x51   : > { %1478 = vmatprep.subr.bf16.mxu0 %v1639_v51 }
  0x52   : > { %1557 = vmatpush3.bf16.msra.mxu1 %v1638_v49 }
  0x53   : > { %1558 = vmatprep.subr.bf16.mxu1 %v1641_v53 }
  0x54   : > { %1479 = vmatpush3.bf16.msra.mxu0 %v1640_v52  ;;  %v411_v52 = vld [vmem:[#allocation2 + $0x50] sm:$0xff] }
  0x55   : > { %1480 = vmatprep.subr.bf16.mxu0 %v1642_v54 }
  0x56   : > { %1559 = vmatpush3.bf16.msra.mxu1 %v1641_v53 }
  0x57   : > { %1560 = vmatprep.subr.bf16.mxu1 %v1644_v55 }
  0x58   : > { %1481 = vmatpush3.bf16.msra.mxu0 %v1643_v58 }
  0x5a   : > { %1561 = vmatpush3.bf16.msra.mxu1 %v1644_v55 }
  0x5b   : > { %808 = vmatmul.mubr.bf16.vlgmr.msra.gmra.mxu0 %v1645_v59  ;;  %v412_v59 = vld [vmem:[#allocation2 + $0x68] sm:$0xff] }
  0x5c   : > { %815 = vmatprep.mubr.bf16.mxu0 %v1650_v60 }
  0x5d   : > { %1563 = vmatmul.mubr.bf16.vlgmr.msra.gmra.mxu1 %v1649_v61 }
  0x5e   : > { %1566 = vmatprep.mubr.bf16.mxu1 %v1656_v62 }
  0x63   : > { %816 = vmatmul.mubr.bf16.gmra.mxu0 %v1652_v63 }
  0x64   : > { %823 = vmatprep.mubr.bf16.mxu0 %v1653_v0 }
  0x65   : > { %1567 = vmatmul.mubr.bf16.gmra.mxu1 %v1657_v1  ;;  %v413_v1 = vld [vmem:[#allocation2 + $0x8] sm:$0xff] }
  0x66   : > { %1570 = vmatprep.mubr.bf16.mxu1 %v1664_v2 }
  0x6b   : > { %824 = vmatmul.mubr.bf16.gmra.mxu0 %v1655_v3 }
  0x6c   : > { %831 = vmatprep.mubr.bf16.mxu0 %v1658_v4 }
  0x6d   : > { %1571 = vmatmul.mubr.bf16.gmra.mxu1 %v1665_v5 }
  0x6e   : > { %1574 = vmatprep.mubr.bf16.mxu1 %v1672_v6 }
  0x73   : > { %832 = vmatmul.mubr.bf16.gmra.mxu0 %v1660_v7 }
  0x74   : > { %839 = vmatprep.mubr.bf16.mxu0 %v1661_v8  ;;  %v414_v8 = vld [vmem:[#allocation2 + $0x48] sm:$0xff] }
  0x75   : > { %1575 = vmatmul.mubr.bf16.gmra.mxu1 %v1673_v9 }
  0x7b   : > { %840 = vmatmul.mubr.bf16.gmra.mxu0 %v1663_v10 }
  0x7c   : > { %847 = vmatprep.mubr.bf16.mxu0 %v1666_v11 }
  0x83   : > { %848 = vmatmul.mubr.bf16.gmra.mxu0 %v1668_v12 }
  0x84   : > { %855 = vmatprep.mubr.bf16.mxu0 %v1669_v13 }
  0x8b   : > { %856 = vmatmul.mubr.bf16.gmra.mxu0 %v1671_v14 }
  0x8c   : > { %863 = vmatprep.mubr.bf16.mxu0 %v1674_v15 }
  0x93   : > { %864 = vmatmul.mubr.bf16.gmra.mxu0 %v1676_v16  ;;  %v415_v16 = vld [vmem:[#allocation2 + $0x40] sm:$0xff] }
 0x11b   : > { %v1482_v17 = vpop.f32.mrf.mxu0 }
 0x11d   : > { %v1483_v18 = vpop.f32.mrf.mxu0  ;;  %v1564_v19 = vpop.f32.mrf.mxu1 }
 0x11e   : > { %v1484_v20 = vadd.f32 %v1483_v18, %v1482_v17 }
 0x11f   : > { %v1485_v21 = vpop.f32.mrf.mxu0  ;;  %v906_v23 = vpop.f32.mrf.mxu1 }
 0x120   : > { %v907_v24 = vadd.f32 %v1484_v20, %v906_v23  ;;  %v416_v23 = vld [vmem:[#allocation2 + $0x20] sm:$0xff] }
 0x121   : > { %v1486_v25 = vpop.f32.mrf.mxu0  ;;  %v1565_v26 = vpop.f32.mrf.mxu1 }
 0x122   : > { %v969_v27 = vadd.f32 %v907_v24, %v407_v22  ;;  %v1487_v28 = vadd.f32 %v1486_v25, %v1485_v21 }
 0x123   : > { %v1488_v29 = vpop.f32.mrf.mxu0  ;;  %v909_v31 = vpop.f32.mrf.mxu1 }
 0x124   : > { %985 = vst [vmem:[#allocation2 + $0x30] sm:$0xff] %v969_v27  ;;  %v910_v32 = vadd.f32 %v1487_v28, %v909_v31 }
 0x125   : > { %v1489_v33 = vpop.f32.mrf.mxu0  ;;  %v1568_v34 = vpop.f32.mrf.mxu1 }
 0x126   : > { %v970_v35 = vadd.f32 %v910_v32, %v408_v30  ;;  %v1490_v36 = vadd.f32 %v1489_v33, %v1488_v29  ;;  %v417_v29 = vld [vmem:[#allocation2 + $0x10] sm:$0xff] }
 0x127   : > { %v1491_v38 = vpop.f32.mrf.mxu0  ;;  %v922_v41 = vpop.f32.mrf.mxu1 }
 0x128   : > { %986 = vst [vmem:[#allocation2] sm:$0xff] %v970_v35  ;;  %v915_v39 = vadd.f32 %v1564_v19, %v1490_v36  ;;  %v418_v36 = vld [vmem:[#allocation2 + $0x38] sm:$0xff] }
 0x129   : > { %v1492_v40 = vpop.f32.mrf.mxu0  ;;  %v1569_v48 = vpop.f32.mrf.mxu1 }
 0x12a   : > { %v971_v42 = vadd.f32 %v915_v39, %v409_v37  ;;  %v1493_v43 = vadd.f32 %v1492_v40, %v1491_v38 }
 0x12b   : > { %v1494_v45 = vpop.f32.mrf.mxu0  ;;  %v925_v55 = vpop.f32.mrf.mxu1 }
 0x12c   : > { %987 = vst [vmem:[#allocation2 + $0x58] sm:$0xff] %v971_v42  ;;  %v918_v46 = vadd.f32 %v1565_v26, %v1493_v43 }
 0x12d   : > { %v1495_v47 = vpop.f32.mrf.mxu0  ;;  %v1572_v62 = vpop.f32.mrf.mxu1 }
 0x12e   : > { %v972_v49 = vadd.f32 %v918_v46, %v410_v44  ;;  %v1496_v50 = vadd.f32 %v1495_v47, %v1494_v45  ;;  %v419_v44 = vld [vmem:[#allocation2 + $0x60] sm:$0xff] }
 0x12f   : > { %v1497_v51 = vpop.f32.mrf.mxu0  ;;  %v938_v5 = vpop.f32.mrf.mxu1 }
 0x130   : > { %988 = vst [vmem:[#allocation2 + $0x18] sm:$0xff] %v972_v49  ;;  %v923_v53 = vadd.f32 %v1496_v50, %v922_v41 }
 0x131   : > { %v1498_v54 = vpop.f32.mrf.mxu0  ;;  %v1573_v12 = vpop.f32.mrf.mxu1 }
 0x132   : > { %v973_v56 = vadd.f32 %v923_v53, %v411_v52  ;;  %v1499_v57 = vadd.f32 %v1498_v54, %v1497_v51  ;;  %v420_v51 = vld [vmem:[#allocation2 + $0x70] sm:$0xff] }
 0x133   : > { %v1500_v58 = vpop.f32.mrf.mxu0  ;;  %v941_v19 = vpop.f32.mrf.mxu1 }
 0x134   : > { %989 = vst [vmem:[#allocation2 + $0x50] sm:$0xff] %v973_v56  ;;  %v926_v60 = vadd.f32 %v1499_v57, %v925_v55  ;;  %v421_v56 = vld [vmem:[#allocation2 + $0x78] sm:$0xff] }
 0x135   : > { %v1501_v61 = vpop.f32.mrf.mxu0  ;;  %v1576_v26 = vpop.f32.mrf.mxu1 }
 0x136   : > { %v974_v63 = vadd.f32 %v926_v60, %v412_v59  ;;  %v1502_v0 = vadd.f32 %v1501_v61, %v1500_v58 }
 0x137   : > { %v1503_v2 = vpop.f32.mrf.mxu0  ;;  %v954_v33 = vpop.f32.mrf.mxu1 }
 0x138   : > { %990 = vst [vmem:[#allocation2 + $0x68] sm:$0xff] %v974_v63  ;;  %v931_v3 = vadd.f32 %v1568_v34, %v1502_v0 }
 0x139   : > { %v1504_v4 = vpop.f32.mrf.mxu0  ;;  %v1577_v40 = vpop.f32.mrf.mxu1 }
 0x13a   : > { %v975_v6 = vadd.f32 %v931_v3, %v413_v1  ;;  %v1505_v7 = vadd.f32 %v1504_v4, %v1503_v2 }
 0x13b   : > { %v1506_v9 = vpop.f32.mrf.mxu0  ;;  %v957_v47 = vpop.f32.mrf.mxu1 }
 0x13c   : > { %991 = vst [vmem:[#allocation2 + $0x8] sm:$0xff] %v975_v6  ;;  %v934_v10 = vadd.f32 %v1569_v48, %v1505_v7 }
 0x13d   : > { %v1507_v11 = vpop.f32.mrf.mxu0 }
 0x13e   : > { %v976_v13 = vadd.f32 %v934_v10, %v414_v8  ;;  %v1508_v14 = vadd.f32 %v1507_v11, %v1506_v9 }
 0x13f   : > { %v1509_v15 = vpop.f32.mrf.mxu0 }
 0x140   : > { %992 = vst [vmem:[#allocation2 + $0x48] sm:$0xff] %v976_v13  ;;  %v939_v17 = vadd.f32 %v1508_v14, %v938_v5 }
 0x141   : > { %v1510_v18 = vpop.f32.mrf.mxu0 }
 0x142   : > { %v977_v20 = vadd.f32 %v939_v17, %v415_v16  ;;  %v1511_v21 = vadd.f32 %v1510_v18, %v1509_v15 }
 0x143   : > { %v1512_v22 = vpop.f32.mrf.mxu0 }
 0x144   : > { %993 = vst [vmem:[#allocation2 + $0x40] sm:$0xff] %v977_v20  ;;  %v942_v24 = vadd.f32 %v1511_v21, %v941_v19 }
 0x145   : > { %v1513_v25 = vpop.f32.mrf.mxu0 }
 0x146   : > { %v978_v27 = vadd.f32 %v942_v24, %v416_v23  ;;  %v1514_v28 = vadd.f32 %v1513_v25, %v1512_v22 }
 0x147   : > { %v1515_v30 = vpop.f32.mrf.mxu0 }
 0x148   : > { %994 = vst [vmem:[#allocation2 + $0x20] sm:$0xff] %v978_v27  ;;  %v947_v31 = vadd.f32 %v1572_v62, %v1514_v28  ;;  %v422_v62 = vld [vmem:[#allocation2 + $0x28] sm:$0xff] }
 0x149   : > { %v1516_v32 = vpop.f32.mrf.mxu0 }
 0x14a   : > { %v979_v34 = vadd.f32 %v947_v31, %v417_v29  ;;  %v1517_v35 = vadd.f32 %v1516_v32, %v1515_v30 }
 0x14b   : > { %v1518_v37 = vpop.f32.mrf.mxu0 }
 0x14c   : > { %995 = vst [vmem:[#allocation2 + $0x10] sm:$0xff] %v979_v34  ;;  %v950_v38 = vadd.f32 %v1573_v12, %v1517_v35 }
 0x14d   : > { %v1519_v39 = vpop.f32.mrf.mxu0 }
 0x14e   : > { %v980_v41 = vadd.f32 %v950_v38, %v418_v36  ;;  %v1520_v42 = vadd.f32 %v1519_v39, %v1518_v37 }
 0x14f   : > { %v1521_v43 = vpop.f32.mrf.mxu0 }
 0x150   : > { %996 = vst [vmem:[#allocation2 + $0x38] sm:$0xff] %v980_v41  ;;  %v955_v45 = vadd.f32 %v1520_v42, %v954_v33 }
 0x151   : > { %v1522_v46 = vpop.f32.mrf.mxu0 }
 0x152   : > { %v981_v48 = vadd.f32 %v955_v45, %v419_v44  ;;  %v1523_v49 = vadd.f32 %v1522_v46, %v1521_v43 }
 0x153   : > { %v1524_v50 = vpop.f32.mrf.mxu0 }
 0x154   : > { %997 = vst [vmem:[#allocation2 + $0x60] sm:$0xff] %v981_v48  ;;  %v958_v52 = vadd.f32 %v1523_v49, %v957_v47 }
 0x155   : > { %v1525_v53 = vpop.f32.mrf.mxu0 }
 0x156   : > { %v982_v54 = vadd.f32 %v958_v52, %v420_v51  ;;  %v1526_v55 = vadd.f32 %v1525_v53, %v1524_v50 }
 0x157   : > { %v1527_v57 = vpop.f32.mrf.mxu0 }
 0x158   : > { %998 = vst [vmem:[#allocation2 + $0x70] sm:$0xff] %v982_v54  ;;  %v963_v58 = vadd.f32 %v1576_v26, %v1526_v55 }
 0x159   : > { %v1528_v59 = vpop.f32.mrf.mxu0 }
 0x15a   : > { %v983_v60 = vadd.f32 %v963_v58, %v421_v56  ;;  %v1529_v61 = vadd.f32 %v1528_v59, %v1527_v57 }
 0x15c   : > { %999 = vst [vmem:[#allocation2 + $0x78] sm:$0xff] %v983_v60  ;;  %v966_v63 = vadd.f32 %v1577_v40, %v1529_v61  ;;  %1004 = sbr.rel (%p1379_p11) target bundleno = 375 (0x177), region = 70 }
 0x15e   : > { %v984_v0 = vadd.f32 %v966_v63, %v422_v62 }
 0x160   : > { %1000 = vst [vmem:[#allocation2 + $0x28] sm:$0xff] %v984_v0 }
 0x161   : > { %v1005_v1 = vld [vmem:[#allocation2 + $0x30] sm:$0xff]  ;;  %v1006_v2 = vld [vmem:[#allocation2] sm:$0xff]  ;;  %v1007_v7 = vld [vmem:[#allocation2 + $0x58] sm:$0xff] }
 0x162   : > { %v1918_v3 = vld [vmem:[%s1998_s2] ss:$0 sm:$0xff]  ;;  %v1008_v8 = vld [vmem:[#allocation2 + $0x18] sm:$0xff]  ;;  %v1009_v11 = vld [vmem:[#allocation2 + $0x50] sm:$0xff] }
 0x163   : > { %v1028_v4 = vmul.f32 %v1918_v3, %v1005_v1  ;;  %v1029_v5 = vmul.f32 %v1918_v3, %v1006_v2  ;;  %v1925_v6 = vld [vmem:[%s1999_s3] ss:$0 sm:$0xff]  ;;  %v1030_v9 = vmul.f32 %v1918_v3, %v1007_v7  ;;  %v1031_v10 = vmul.f32 %v1918_v3, %v1008_v8  ;;  %v1010_v12 = vld [vmem:[#allocation2 + $0x68] sm:$0xff]  ;;  %v1015_v33 = vld [vmem:[#allocation2 + $0x10] sm:$0xff] }
 0x164   : > { %v1011_v13 = vld [vmem:[#allocation2 + $0x8] sm:$0xff]  ;;  %v1032_v16 = vmul.f32 %v1918_v3, %v1009_v11  ;;  %v1033_v17 = vmul.f32 %v1918_v3, %v1010_v12  ;;  %v1013_v23 = vld [vmem:[#allocation2 + $0x40] sm:$0xff]  ;;  %v1016_v34 = vld [vmem:[#allocation2 + $0x38] sm:$0xff]  ;;  %v1038_v48 = vmul.f32 %v1918_v3, %v1015_v33 }
 0x165   : > { %v1051_v14 = vadd.f32 %v1925_v6, %v1028_v4  ;;  %v1052_v15 = vadd.f32 %v1925_v6, %v1029_v5  ;;  %v1012_v18 = vld [vmem:[#allocation2 + $0x48] sm:$0xff]  ;;  %v1053_v19 = vadd.f32 %v1925_v6, %v1030_v9  ;;  %v1054_v20 = vadd.f32 %v1925_v6, %v1031_v10  ;;  %v1014_v28 = vld [vmem:[#allocation2 + $0x20] sm:$0xff]  ;;  %v1018_v40 = vld [vmem:[#allocation2 + $0x70] sm:$0xff] }
 0x166   : > { %v1034_v21 = vmul.f32 %v1918_v3, %v1011_v13  ;;  %v1035_v22 = vmul.f32 %v1918_v3, %v1012_v18  ;;  %v1055_v26 = vadd.f32 %v1925_v6, %v1032_v16  ;;  %v1056_v27 = vadd.f32 %v1925_v6, %v1033_v17  ;;  %v1017_v39 = vld [vmem:[#allocation2 + $0x60] sm:$0xff]  ;;  %v1019_v45 = vld [vmem:[#allocation2 + $0x78] sm:$0xff] }
 0x167   : > { %v1067_v24 = vmax.f32 %v1051_v14, 0.0  ;;  %v1068_v25 = vmax.f32 %v1052_v15, 0.0  ;;  %v1069_v29 = vmax.f32 %v1053_v19, 0.0  ;;  %v1070_v30 = vmax.f32 %v1054_v20, 0.0  ;;  %v1020_v50 = vld [vmem:[#allocation2 + $0x28] sm:$0xff] }
 0x168   : > { %v1057_v31 = vadd.f32 %v1925_v6, %v1034_v21  ;;  %v1058_v32 = vadd.f32 %v1925_v6, %v1035_v22  ;;  %v1071_v36 = vmax.f32 %v1055_v26, 0.0  ;;  %v1072_v37 = vmax.f32 %v1056_v27, 0.0 }
 0x169   : > { %v1422_v35 = vpack.c.bf16 %v1068_v25, %v1067_v24  ;;  %v1036_v38 = vmul.f32 %v1918_v3, %v1013_v23  ;;  %v1427_v41 = vpack.c.bf16 %v1070_v30, %v1069_v29  ;;  %v1037_v44 = vmul.f32 %v1918_v3, %v1014_v28 }
 0x16a   : > { %v1073_v42 = vmax.f32 %v1057_v31, 0.0  ;;  %v1074_v43 = vmax.f32 %v1058_v32, 0.0  ;;  %v1432_v46 = vpack.c.bf16 %v1072_v37, %v1071_v36  ;;  %v1039_v49 = vmul.f32 %v1918_v3, %v1016_v34 }
 0x16b   : > { %1423 = vst [vmem:[%s2000_s4] sm:$0xff] %v1422_v35   ;;  %v1059_v47 = vadd.f32 %v1925_v6, %v1036_v38  ;;  %1459 = vst [vmem:[%s2000_s4 + $0x8] sm:$0xff] %v1427_v41   ;;  %v1060_v52 = vadd.f32 %v1925_v6, %v1037_v44  ;;  %v1040_v53 = vmul.f32 %v1918_v3, %v1017_v39 }
 0x16c   : > { %v1437_v51 = vpack.c.bf16 %v1074_v43, %v1073_v42  ;;  %v1041_v54 = vmul.f32 %v1918_v3, %v1018_v40  ;;  %1460 = vst [vmem:[%s2000_s4 + $0x10] sm:$0xff] %v1432_v46   ;;  %v1061_v56 = vadd.f32 %v1925_v6, %v1038_v48  ;;  %v1062_v57 = vadd.f32 %v1925_v6, %v1039_v49 }
 0x16d   : > { %v1075_v55 = vmax.f32 %v1059_v47, 0.0  ;;  %v1042_v58 = vmul.f32 %v1918_v3, %v1019_v45  ;;  %v1076_v59 = vmax.f32 %v1060_v52, 0.0  ;;  %v1063_v60 = vadd.f32 %v1925_v6, %v1040_v53 }
 0x16e   : > { %1461 = vst [vmem:[%s2000_s4 + $0x18] sm:$0xff] %v1437_v51   ;;  %v1064_v61 = vadd.f32 %v1925_v6, %v1041_v54  ;;  %v1043_v62 = vmul.f32 %v1918_v3, %v1020_v50  ;;  %v1077_v63 = vmax.f32 %v1061_v56, 0.0  ;;  %v1078_v0 = vmax.f32 %v1062_v57, 0.0 }
 0x16f   : > { %v1065_v1 = vadd.f32 %v1925_v6, %v1042_v58  ;;  %v1442_v2 = vpack.c.bf16 %v1076_v59, %v1075_v55  ;;  %v1079_v4 = vmax.f32 %v1063_v60, 0.0 }
 0x170   : > { %v1080_v5 = vmax.f32 %v1064_v61, 0.0  ;;  %v1066_v7 = vadd.f32 %v1925_v6, %v1043_v62  ;;  %v1447_v8 = vpack.c.bf16 %v1078_v0, %v1077_v63 }
 0x171   : > { %v1081_v9 = vmax.f32 %v1065_v1, 0.0  ;;  %1462 = vst [vmem:[%s2000_s4 + $0x20] sm:$0xff] %v1442_v2  }
 0x172   : > { %v1452_v10 = vpack.c.bf16 %v1080_v5, %v1079_v4  ;;  %v1082_v11 = vmax.f32 %v1066_v7, 0.0  ;;  %1463 = vst [vmem:[%s2000_s4 + $0x28] sm:$0xff] %v1447_v8  }
 0x174   : > { %1464 = vst [vmem:[%s2000_s4 + $0x30] sm:$0xff] %v1452_v10   ;;  %v1457_v3 = vpack.c.bf16 %v1082_v11, %v1081_v9 }
 0x176   : > { %1465 = vst [vmem:[%s2000_s4 + $0x38] sm:$0xff] %v1457_v3  }
 0x177 PF: > { %s14_s19 = sadd.s32 1, %s1715_s19   ;;  %s2001_s15 = smov %s1703_s16 }
 0x178   : > { %p11_p12 = scmp.ge.s32.totalorder %s14_s19, 5   ;;  %s2002_s16 = smov %s1778_s23 }
 0x179   : > { %s2003_s17 = smov %s1711_s18  ;;  %s2004_s18 = smov %s2006_s20 }
 0x17a   :  { %13 = sbr.rel (!%p11_p12) target bundleno = 3 (0x3), region = 120 }

// kernel: _lambda_.33
= control target key start
LH: loop header
LB: loop body
LE: loop exit
PB: predicated region body
PF: predicated region fallthrough
CT: control target
= control target key end

     0   :  { %s927_s1 = inlined_call_operand.vmem [shape: bf16[128,128], index: 1, kind: input, shape index: {}]   ;;  %s928_s0 = inlined_call_operand.vmem [shape: bf16[128,128], index: 0, kind: input, shape index: {}]   ;;  %s929_s2 = inlined_call_operand.vmem [shape: f32[1,128], index: 2, kind: input, shape index: {}]   ;;  %s930_s4 = inlined_call_operand.vmem [shape: bf16[128,128], index: 4, kind: input, shape index: {}]   ;;  %s931_s3 = inlined_call_operand.vmem [shape: f32[1,128], index: 3, kind: input, shape index: {}]   ;;  %s932_s5 = inlined_call_operand.vmem [shape: bf16[128,128], index: 5, kind: output, shape index: {}]  }
   0x1   :  { %v727_v0 = vld [vmem:[%s927_s1 + $0x38] sm:$0xff]   ;;  %v728_v1 = vld [vmem:[%s927_s1 + $0x30] sm:$0xff]   ;;  %v729_v2 = vld [vmem:[%s927_s1 + $0x28] sm:$0xff]  }
   0x2   :  { %679 = vmatprep.subr.bf16.mxu0 %v727_v0  ;;  %711 = vmatprep.subr.bf16.mxu1 %v727_v0  ;;  %v730_v3 = vld [vmem:[%s927_s1 + $0x20] sm:$0xff]   ;;  %v731_v6 = vld [vmem:[%s927_s1 + $0x18] sm:$0xff]   ;;  %v732_v7 = vld [vmem:[%s927_s1 + $0x10] sm:$0xff]  }
   0x3   :  { %680 = vmatpush3.bf16.msra.mxu0 %v727_v0  ;;  %719 = vmatpush3.bf16.msra.mxu1 %v727_v0  ;;  %v735_v4 = vld [vmem:[%s928_s0] sm:$0xff]   ;;  %v733_v8 = vld [vmem:[%s927_s1 + $0x8] sm:$0xff]   ;;  %v739_v12 = vld [vmem:[%s928_s0 + $0x10] sm:$0xff]  }
   0x4   :  { %681 = vmatprep.subr.bf16.mxu0 %v728_v1  ;;  %712 = vmatprep.subr.bf16.mxu1 %v728_v1  ;;  %v736_v5 = vld [vmem:[%s928_s0 + $0x20] sm:$0xff]   ;;  %v737_v10 = vld [vmem:[%s928_s0 + $0x8] sm:$0xff]   ;;  %v740_v13 = vld [vmem:[%s928_s0 + $0x30] sm:$0xff]  }
   0x5   :  { %695 = vmatprep.mubr.bf16.mxu0 %v735_v4  ;;  %703 = vmatprep.mubr.bf16.mxu1 %v736_v5  ;;  %v734_v9 = vld [vmem:[%s927_s1] sm:$0xff]   ;;  %v738_v11 = vld [vmem:[%s928_s0 + $0x28] sm:$0xff]   ;;  %v741_v14 = vld [vmem:[%s928_s0 + $0x18] sm:$0xff]  }
   0x6   :  { %v742_v15 = vld [vmem:[%s928_s0 + $0x38] sm:$0xff]   ;;  %v824_v16 = vld [vmem:[%s929_s2] ss:$0 sm:$0xff]  ;;  %v649_v17 = vld [vmem:[%s930_s4 + $0x8] sm:$0xff]  }
   0x7   :  { %682 = vmatpush3.bf16.msra.mxu0 %v728_v1  ;;  %720 = vmatpush3.bf16.msra.mxu1 %v728_v1  ;;  %v653_v18 = vld [vmem:[%s930_s4 + $0x28] sm:$0xff]   ;;  %v835_v20 = vld [vmem:[%s931_s3] ss:$0 sm:$0xff]  ;;  %v583_v26 = vunpack.c.l.bf16 %v649_v17  ;;  %v852_v34 = vld [vmem:[%s930_s4 + $0x18] sm:$0xff]   ;;  %v584_v39 = vunpack.c.h.bf16 %v649_v17 }
   0x8   :  { %683 = vmatprep.subr.bf16.mxu0 %v729_v2  ;;  %713 = vmatprep.subr.bf16.mxu1 %v729_v2  ;;  %v578_v24 = vld [vmem:[%s930_s4] sm:$0xff]   ;;  %v599_v27 = vunpack.c.l.bf16 %v653_v18  ;;  %v857_v35 = vld [vmem:[%s930_s4 + $0x38] sm:$0xff]   ;;  %v600_v41 = vunpack.c.h.bf16 %v653_v18  ;;  %v862_v42 = vld [vmem:[%s930_s4 + $0x10] sm:$0xff]   ;;  %v591_v52 = vunpack.c.l.bf16 %v852_v34 }
   0x9   :  { %v652_v25 = vld [vmem:[%s930_s4 + $0x20] sm:$0xff]   ;;  %v579_v36 = vunpack.c.l.bf16 %v578_v24  ;;  %v867_v43 = vld [vmem:[%s930_s4 + $0x30] sm:$0xff]   ;;  %v580_v46 = vunpack.c.h.bf16 %v578_v24  ;;  %v607_v53 = vunpack.c.l.bf16 %v857_v35  ;;  %v587_v56 = vunpack.c.l.bf16 %v862_v42 }
   0xa   :  { %v595_v37 = vunpack.c.l.bf16 %v652_v25  ;;  %v596_v47 = vunpack.c.h.bf16 %v652_v25  ;;  %v603_v57 = vunpack.c.l.bf16 %v867_v43 }
   0xb   :  { %684 = vmatpush3.bf16.msra.mxu0 %v729_v2  ;;  %721 = vmatpush3.bf16.msra.mxu1 %v729_v2 }
   0xc   :  { %685 = vmatprep.subr.bf16.mxu0 %v730_v3  ;;  %714 = vmatprep.subr.bf16.mxu1 %v730_v3 }
   0xf   :  { %686 = vmatpush3.bf16.msra.mxu0 %v730_v3  ;;  %722 = vmatpush3.bf16.msra.mxu1 %v730_v3 }
  0x10   :  { %687 = vmatprep.subr.bf16.mxu0 %v731_v6  ;;  %715 = vmatprep.subr.bf16.mxu1 %v731_v6 }
  0x13   :  { %688 = vmatpush3.bf16.msra.mxu0 %v731_v6  ;;  %723 = vmatpush3.bf16.msra.mxu1 %v731_v6 }
  0x14   :  { %689 = vmatprep.subr.bf16.mxu0 %v732_v7  ;;  %716 = vmatprep.subr.bf16.mxu1 %v732_v7 }
  0x17   :  { %690 = vmatpush3.bf16.msra.mxu0 %v732_v7  ;;  %724 = vmatpush3.bf16.msra.mxu1 %v732_v7 }
  0x18   :  { %691 = vmatprep.subr.bf16.mxu0 %v733_v8  ;;  %717 = vmatprep.subr.bf16.mxu1 %v733_v8 }
  0x1b   :  { %692 = vmatpush3.bf16.msra.mxu0 %v733_v8  ;;  %725 = vmatpush3.bf16.msra.mxu1 %v733_v8 }
  0x1c   :  { %693 = vmatprep.subr.bf16.mxu0 %v734_v9  ;;  %718 = vmatprep.subr.bf16.mxu1 %v734_v9 }
  0x1f   :  { %694 = vmatpush3.bf16.msra.mxu0 %v734_v9  ;;  %726 = vmatpush3.bf16.msra.mxu1 %v734_v9 }
  0x22   :  { %696 = vmatmul.mubr.bf16.vlgmr.msra.gmra.mxu0 %v737_v10  ;;  %704 = vmatmul.mubr.bf16.vlgmr.msra.gmra.mxu1 %v738_v11 }
  0x23   :  { %699 = vmatprep.mubr.bf16.mxu0 %v739_v12  ;;  %707 = vmatprep.mubr.bf16.mxu1 %v740_v13 }
  0x2a   :  { %700 = vmatmul.mubr.bf16.gmra.mxu0 %v741_v14  ;;  %708 = vmatmul.mubr.bf16.gmra.mxu1 %v742_v15 }
  0xe2   :  { %v697_v19 = vpop.f32.mrf.mxu0  ;;  %v705_v21 = vpop.f32.mrf.mxu1 }
  0xe3   :  { %v342_v22 = vmul.f32 %v697_v19, %v824_v16  ;;  %v350_v23 = vmul.f32 %v705_v21, %v824_v16 }
  0xe4   :  { %v219_v28 = vpop.f32.mrf.mxu0  ;;  %v251_v29 = vpop.f32.mrf.mxu1 }
  0xe5   :  { %v365_v30 = vadd.f32 %v835_v20, %v342_v22  ;;  %v373_v31 = vadd.f32 %v835_v20, %v350_v23  ;;  %v340_v32 = vmul.f32 %v824_v16, %v219_v28  ;;  %v348_v33 = vmul.f32 %v824_v16, %v251_v29 }
  0xe6   :  { %v698_v38 = vpop.f32.mrf.mxu0  ;;  %v706_v40 = vpop.f32.mrf.mxu1 }
  0xe7   :  { %v363_v44 = vadd.f32 %v835_v20, %v340_v32  ;;  %v371_v45 = vadd.f32 %v835_v20, %v348_v33  ;;  %v343_v48 = vmul.f32 %v698_v38, %v824_v16  ;;  %v351_v49 = vmul.f32 %v706_v40, %v824_v16 }
  0xe8   :  { %v222_v50 = vpop.f32.mrf.mxu0  ;;  %v254_v51 = vpop.f32.mrf.mxu1  ;;  %v413_v54 = vadd.f32 %v583_v26, %v365_v30  ;;  %v421_v55 = vadd.f32 %v599_v27, %v373_v31 }
  0xe9   :  { %v366_v58 = vadd.f32 %v835_v20, %v343_v48  ;;  %v374_v59 = vadd.f32 %v835_v20, %v351_v49  ;;  %v341_v60 = vmul.f32 %v824_v16, %v222_v50  ;;  %v349_v61 = vmul.f32 %v824_v16, %v254_v51 }
  0xea   :  { %v701_v62 = vpop.f32.mrf.mxu0  ;;  %v709_v63 = vpop.f32.mrf.mxu1  ;;  %v411_v0 = vadd.f32 %v579_v36, %v363_v44  ;;  %v419_v1 = vadd.f32 %v595_v37, %v371_v45  ;;  %v429_v10 = vmax.f32 %v413_v54, 0.0  ;;  %v437_v11 = vmax.f32 %v421_v55, 0.0 }
  0xeb   :  { %v346_v2 = vmul.f32 %v701_v62, %v824_v16  ;;  %v354_v3 = vmul.f32 %v709_v63, %v824_v16  ;;  %v414_v4 = vadd.f32 %v584_v39, %v366_v58  ;;  %v422_v5 = vadd.f32 %v600_v41, %v374_v59 }
  0xec   :  { %v364_v6 = vadd.f32 %v835_v20, %v341_v60  ;;  %v372_v7 = vadd.f32 %v835_v20, %v349_v61  ;;  %v235_v8 = vpop.f32.mrf.mxu0  ;;  %v267_v9 = vpop.f32.mrf.mxu1  ;;  %v427_v22 = vmax.f32 %v411_v0, 0.0  ;;  %v435_v23 = vmax.f32 %v419_v1, 0.0 }
  0xed   :  { %v344_v12 = vmul.f32 %v824_v16, %v235_v8  ;;  %v352_v13 = vmul.f32 %v824_v16, %v267_v9  ;;  %v430_v14 = vmax.f32 %v414_v4, 0.0  ;;  %v438_v15 = vmax.f32 %v422_v5, 0.0 }
  0xee   :  { %v412_v17 = vadd.f32 %v580_v46, %v364_v6  ;;  %v420_v18 = vadd.f32 %v596_v47, %v372_v7  ;;  %v702_v19 = vpop.f32.mrf.mxu0  ;;  %v710_v21 = vpop.f32.mrf.mxu1  ;;  %v369_v24 = vadd.f32 %v835_v20, %v346_v2  ;;  %v377_v25 = vadd.f32 %v835_v20, %v354_v3 }
  0xef   :  { %v617_v26 = vpack.c.bf16 %v430_v14, %v429_v10  ;;  %v637_v27 = vpack.c.bf16 %v438_v15, %v437_v11  ;;  %v367_v32 = vadd.f32 %v835_v20, %v344_v12  ;;  %v375_v33 = vadd.f32 %v835_v20, %v352_v13 }
  0xf0   :  { %v428_v28 = vmax.f32 %v412_v17, 0.0  ;;  %v436_v29 = vmax.f32 %v420_v18, 0.0  ;;  %v238_v30 = vpop.f32.mrf.mxu0  ;;  %v270_v31 = vpop.f32.mrf.mxu1  ;;  %v592_v36 = vunpack.c.h.bf16 %v852_v34  ;;  %v608_v37 = vunpack.c.h.bf16 %v857_v35 }
  0xf1   :  { %656 = vst [vmem:[%s932_s5 + $0x8] sm:$0xff] %v617_v26   ;;  %660 = vst [vmem:[%s932_s5 + $0x28] sm:$0xff] %v637_v27   ;;  %v347_v40 = vmul.f32 %v702_v19, %v824_v16  ;;  %v355_v41 = vmul.f32 %v710_v21, %v824_v16  ;;  %v345_v44 = vmul.f32 %v824_v16, %v238_v30  ;;  %v588_v34 = vunpack.c.h.bf16 %v862_v42 }
  0xf2   :  { %v612_v38 = vpack.c.bf16 %v428_v28, %v427_v22  ;;  %v632_v39 = vpack.c.bf16 %v436_v29, %v435_v23  ;;  %v353_v35 = vmul.f32 %v824_v16, %v270_v31  ;;  %v604_v45 = vunpack.c.h.bf16 %v867_v43 }
  0xf3   :  { %v417_v46 = vadd.f32 %v591_v52, %v369_v24  ;;  %v425_v47 = vadd.f32 %v607_v53, %v377_v25  ;;  %v370_v48 = vadd.f32 %v835_v20, %v347_v40  ;;  %v378_v49 = vadd.f32 %v835_v20, %v355_v41 }
  0xf4   :  { %613 = vst [vmem:[%s932_s5] sm:$0xff] %v612_v38   ;;  %659 = vst [vmem:[%s932_s5 + $0x20] sm:$0xff] %v632_v39   ;;  %v415_v50 = vadd.f32 %v587_v56, %v367_v32  ;;  %v423_v42 = vadd.f32 %v603_v57, %v375_v33  ;;  %v368_v16 = vadd.f32 %v835_v20, %v345_v44 }
  0xf5   :  { %v376_v43 = vadd.f32 %v835_v20, %v353_v35  ;;  %v418_v51 = vadd.f32 %v592_v36, %v370_v48  ;;  %v426_v54 = vadd.f32 %v608_v37, %v378_v49  ;;  %v433_v59 = vmax.f32 %v417_v46, 0.0 }
  0xf6   :  { %v416_v55 = vadd.f32 %v588_v34, %v368_v16  ;;  %v441_v60 = vmax.f32 %v425_v47, 0.0  ;;  %v431_v52 = vmax.f32 %v415_v50, 0.0  ;;  %v439_v53 = vmax.f32 %v423_v42, 0.0 }
  0xf7   :  { %v424_v58 = vadd.f32 %v604_v45, %v376_v43  ;;  %v434_v61 = vmax.f32 %v418_v51, 0.0  ;;  %v442_v62 = vmax.f32 %v426_v54, 0.0 }
  0xf8   :  { %v432_v63 = vmax.f32 %v416_v55, 0.0 }
  0xf9   :  { %v440_v0 = vmax.f32 %v424_v58, 0.0  ;;  %v627_v1 = vpack.c.bf16 %v434_v61, %v433_v59  ;;  %v647_v2 = vpack.c.bf16 %v442_v62, %v441_v60 }
  0xfa   :  { %v622_v56 = vpack.c.bf16 %v432_v63, %v431_v52 }
  0xfb   :  { %v642_v57 = vpack.c.bf16 %v440_v0, %v439_v53  ;;  %658 = vst [vmem:[%s932_s5 + $0x18] sm:$0xff] %v627_v1   ;;  %662 = vst [vmem:[%s932_s5 + $0x38] sm:$0xff] %v647_v2  }
  0xfc   :  { %657 = vst [vmem:[%s932_s5 + $0x10] sm:$0xff] %v622_v56  }
  0xfd   :  { %661 = vst [vmem:[%s932_s5 + $0x30] sm:$0xff] %v642_v57  }

// kernel: _lambda_.34
= control target key start
LH: loop header
LB: loop body
LE: loop exit
PB: predicated region body
PF: predicated region fallthrough
CT: control target
= control target key end

     0   :  { %s774_s1 = inlined_call_operand.vmem [shape: bf16[128,128], index: 1, kind: input, shape index: {}]   ;;  %s775_s0 = inlined_call_operand.vmem [shape: bf16[128,128], index: 0, kind: input, shape index: {}]   ;;  %s776_s2 = inlined_call_operand.vmem [shape: f32[1,128], index: 2, kind: input, shape index: {}]   ;;  %s777_s3 = inlined_call_operand.vmem [shape: f32[1,128], index: 3, kind: input, shape index: {}]   ;;  %s778_s4 = inlined_call_operand.vmem [shape: bf16[128,128], index: 4, kind: output, shape index: {}]  }
   0x1   :  { %v637_v0 = vld [vmem:[%s774_s1 + $0x38] sm:$0xff]   ;;  %v638_v1 = vld [vmem:[%s774_s1 + $0x30] sm:$0xff]   ;;  %v639_v2 = vld [vmem:[%s774_s1 + $0x28] sm:$0xff]  }
   0x2   :  { %589 = vmatprep.subr.bf16.mxu0 %v637_v0  ;;  %621 = vmatprep.subr.bf16.mxu1 %v637_v0  ;;  %v640_v3 = vld [vmem:[%s774_s1 + $0x20] sm:$0xff]   ;;  %v641_v6 = vld [vmem:[%s774_s1 + $0x18] sm:$0xff]   ;;  %v642_v7 = vld [vmem:[%s774_s1 + $0x10] sm:$0xff]  }
   0x3   :  { %590 = vmatpush3.bf16.msra.mxu0 %v637_v0  ;;  %629 = vmatpush3.bf16.msra.mxu1 %v637_v0  ;;  %v645_v4 = vld [vmem:[%s775_s0] sm:$0xff]   ;;  %v643_v8 = vld [vmem:[%s774_s1 + $0x8] sm:$0xff]   ;;  %v649_v12 = vld [vmem:[%s775_s0 + $0x10] sm:$0xff]  }
   0x4   :  { %591 = vmatprep.subr.bf16.mxu0 %v638_v1  ;;  %622 = vmatprep.subr.bf16.mxu1 %v638_v1  ;;  %v646_v5 = vld [vmem:[%s775_s0 + $0x20] sm:$0xff]   ;;  %v647_v10 = vld [vmem:[%s775_s0 + $0x8] sm:$0xff]   ;;  %v650_v13 = vld [vmem:[%s775_s0 + $0x30] sm:$0xff]  }
   0x5   :  { %605 = vmatprep.mubr.bf16.mxu0 %v645_v4  ;;  %613 = vmatprep.mubr.bf16.mxu1 %v646_v5  ;;  %v644_v9 = vld [vmem:[%s774_s1] sm:$0xff]   ;;  %v648_v11 = vld [vmem:[%s775_s0 + $0x28] sm:$0xff]   ;;  %v651_v14 = vld [vmem:[%s775_s0 + $0x18] sm:$0xff]  }
   0x6   :  { %v652_v15 = vld [vmem:[%s775_s0 + $0x38] sm:$0xff]   ;;  %v729_v16 = vld [vmem:[%s776_s2] ss:$0 sm:$0xff] }
   0x7   :  { %592 = vmatpush3.bf16.msra.mxu0 %v638_v1  ;;  %630 = vmatpush3.bf16.msra.mxu1 %v638_v1  ;;  %v493_v21 = vld [vmem:[%s777_s3] ss:$0 sm:$0xff] }
   0x8   :  { %593 = vmatprep.subr.bf16.mxu0 %v639_v2  ;;  %623 = vmatprep.subr.bf16.mxu1 %v639_v2 }
   0xb   :  { %594 = vmatpush3.bf16.msra.mxu0 %v639_v2  ;;  %631 = vmatpush3.bf16.msra.mxu1 %v639_v2 }
   0xc   :  { %595 = vmatprep.subr.bf16.mxu0 %v640_v3  ;;  %624 = vmatprep.subr.bf16.mxu1 %v640_v3 }
   0xf   :  { %596 = vmatpush3.bf16.msra.mxu0 %v640_v3  ;;  %632 = vmatpush3.bf16.msra.mxu1 %v640_v3 }
  0x10   :  { %597 = vmatprep.subr.bf16.mxu0 %v641_v6  ;;  %625 = vmatprep.subr.bf16.mxu1 %v641_v6 }
  0x13   :  { %598 = vmatpush3.bf16.msra.mxu0 %v641_v6  ;;  %633 = vmatpush3.bf16.msra.mxu1 %v641_v6 }
  0x14   :  { %599 = vmatprep.subr.bf16.mxu0 %v642_v7  ;;  %626 = vmatprep.subr.bf16.mxu1 %v642_v7 }
  0x17   :  { %600 = vmatpush3.bf16.msra.mxu0 %v642_v7  ;;  %634 = vmatpush3.bf16.msra.mxu1 %v642_v7 }
  0x18   :  { %601 = vmatprep.subr.bf16.mxu0 %v643_v8  ;;  %627 = vmatprep.subr.bf16.mxu1 %v643_v8 }
  0x1b   :  { %602 = vmatpush3.bf16.msra.mxu0 %v643_v8  ;;  %635 = vmatpush3.bf16.msra.mxu1 %v643_v8 }
  0x1c   :  { %603 = vmatprep.subr.bf16.mxu0 %v644_v9  ;;  %628 = vmatprep.subr.bf16.mxu1 %v644_v9 }
  0x1f   :  { %604 = vmatpush3.bf16.msra.mxu0 %v644_v9  ;;  %636 = vmatpush3.bf16.msra.mxu1 %v644_v9 }
  0x22   :  { %606 = vmatmul.mubr.bf16.vlgmr.msra.gmra.mxu0 %v647_v10  ;;  %614 = vmatmul.mubr.bf16.vlgmr.msra.gmra.mxu1 %v648_v11 }
  0x23   :  { %609 = vmatprep.mubr.bf16.mxu0 %v649_v12  ;;  %617 = vmatprep.mubr.bf16.mxu1 %v650_v13 }
  0x2a   :  { %610 = vmatmul.mubr.bf16.gmra.mxu0 %v651_v14  ;;  %618 = vmatmul.mubr.bf16.gmra.mxu1 %v652_v15 }
  0xe2   :  { %v607_v17 = vpop.f32.mrf.mxu0  ;;  %v615_v18 = vpop.f32.mrf.mxu1 }
  0xe3   :  { %v339_v19 = vmul.f32 %v607_v17, %v729_v16  ;;  %v347_v20 = vmul.f32 %v615_v18, %v729_v16 }
  0xe4   :  { %v216_v22 = vpop.f32.mrf.mxu0  ;;  %v248_v23 = vpop.f32.mrf.mxu1 }
  0xe5   :  { %v337_v24 = vmul.f32 %v729_v16, %v216_v22  ;;  %v345_v25 = vmul.f32 %v729_v16, %v248_v23  ;;  %v362_v28 = vadd.f32 %v493_v21, %v339_v19  ;;  %v370_v29 = vadd.f32 %v493_v21, %v347_v20 }
  0xe6   :  { %v608_v26 = vpop.f32.mrf.mxu0  ;;  %v616_v27 = vpop.f32.mrf.mxu1 }
  0xe7   :  { %v340_v30 = vmul.f32 %v608_v26, %v729_v16  ;;  %v348_v31 = vmul.f32 %v616_v27, %v729_v16  ;;  %v360_v34 = vadd.f32 %v493_v21, %v337_v24  ;;  %v368_v35 = vadd.f32 %v493_v21, %v345_v25 }
  0xe8   :  { %v219_v32 = vpop.f32.mrf.mxu0  ;;  %v251_v33 = vpop.f32.mrf.mxu1  ;;  %v378_v42 = vmax.f32 %v362_v28, 0.0  ;;  %v386_v43 = vmax.f32 %v370_v29, 0.0 }
  0xe9   :  { %v338_v36 = vmul.f32 %v729_v16, %v219_v32  ;;  %v346_v37 = vmul.f32 %v729_v16, %v251_v33  ;;  %v363_v38 = vadd.f32 %v493_v21, %v340_v30  ;;  %v371_v39 = vadd.f32 %v493_v21, %v348_v31 }
  0xea   :  { %v611_v40 = vpop.f32.mrf.mxu0  ;;  %v619_v41 = vpop.f32.mrf.mxu1  ;;  %v376_v52 = vmax.f32 %v360_v34, 0.0  ;;  %v384_v53 = vmax.f32 %v368_v35, 0.0 }
  0xeb   :  { %v361_v44 = vadd.f32 %v493_v21, %v338_v36  ;;  %v369_v45 = vadd.f32 %v493_v21, %v346_v37  ;;  %v379_v46 = vmax.f32 %v363_v38, 0.0  ;;  %v387_v47 = vmax.f32 %v371_v39, 0.0 }
  0xec   :  { %v343_v48 = vmul.f32 %v611_v40, %v729_v16  ;;  %v351_v49 = vmul.f32 %v619_v41, %v729_v16  ;;  %v232_v50 = vpop.f32.mrf.mxu0  ;;  %v264_v51 = vpop.f32.mrf.mxu1 }
  0xed   :  { %v377_v54 = vmax.f32 %v361_v44, 0.0  ;;  %v385_v55 = vmax.f32 %v369_v45, 0.0  ;;  %v534_v56 = vpack.c.bf16 %v379_v46, %v378_v42  ;;  %v554_v57 = vpack.c.bf16 %v387_v47, %v386_v43 }
  0xee   :  { %v341_v58 = vmul.f32 %v729_v16, %v232_v50  ;;  %v349_v59 = vmul.f32 %v729_v16, %v264_v51  ;;  %v612_v60 = vpop.f32.mrf.mxu0  ;;  %v620_v61 = vpop.f32.mrf.mxu1  ;;  %v366_v0 = vadd.f32 %v493_v21, %v343_v48  ;;  %v374_v1 = vadd.f32 %v493_v21, %v351_v49 }
  0xef   :  { %v529_v62 = vpack.c.bf16 %v377_v54, %v376_v52  ;;  %v549_v63 = vpack.c.bf16 %v385_v55, %v384_v53  ;;  %566 = vst [vmem:[%s778_s4 + $0x8] sm:$0xff] %v534_v56   ;;  %570 = vst [vmem:[%s778_s4 + $0x28] sm:$0xff] %v554_v57   ;;  %v344_v2 = vmul.f32 %v612_v60, %v729_v16 }
  0xf0   :  { %v352_v3 = vmul.f32 %v620_v61, %v729_v16  ;;  %v235_v4 = vpop.f32.mrf.mxu0  ;;  %v267_v5 = vpop.f32.mrf.mxu1  ;;  %v364_v6 = vadd.f32 %v493_v21, %v341_v58  ;;  %v372_v7 = vadd.f32 %v493_v21, %v349_v59  ;;  %v382_v14 = vmax.f32 %v366_v0, 0.0 }
  0xf1   :  { %530 = vst [vmem:[%s778_s4] sm:$0xff] %v529_v62   ;;  %569 = vst [vmem:[%s778_s4 + $0x20] sm:$0xff] %v549_v63   ;;  %v342_v8 = vmul.f32 %v729_v16, %v235_v4  ;;  %v350_v9 = vmul.f32 %v729_v16, %v267_v5  ;;  %v367_v10 = vadd.f32 %v493_v21, %v344_v2  ;;  %v390_v15 = vmax.f32 %v374_v1, 0.0 }
  0xf2   :  { %v375_v11 = vadd.f32 %v493_v21, %v352_v3  ;;  %v380_v19 = vmax.f32 %v364_v6, 0.0  ;;  %v388_v20 = vmax.f32 %v372_v7, 0.0 }
  0xf3   :  { %v365_v12 = vadd.f32 %v493_v21, %v342_v8  ;;  %v373_v13 = vadd.f32 %v493_v21, %v350_v9  ;;  %v383_v17 = vmax.f32 %v367_v10, 0.0 }
  0xf4   :  { %v391_v18 = vmax.f32 %v375_v11, 0.0 }
  0xf5   :  { %v381_v22 = vmax.f32 %v365_v12, 0.0  ;;  %v389_v23 = vmax.f32 %v373_v13, 0.0  ;;  %v544_v24 = vpack.c.bf16 %v383_v17, %v382_v14 }
  0xf6   :  { %v564_v25 = vpack.c.bf16 %v391_v18, %v390_v15 }
  0xf7   :  { %v539_v26 = vpack.c.bf16 %v381_v22, %v380_v19  ;;  %v559_v27 = vpack.c.bf16 %v389_v23, %v388_v20  ;;  %568 = vst [vmem:[%s778_s4 + $0x18] sm:$0xff] %v544_v24  }
  0xf8   :  { %572 = vst [vmem:[%s778_s4 + $0x38] sm:$0xff] %v564_v25  }
  0xf9   :  { %567 = vst [vmem:[%s778_s4 + $0x10] sm:$0xff] %v539_v26   ;;  %571 = vst [vmem:[%s778_s4 + $0x30] sm:$0xff] %v559_v27  }

// kernel: _lambda_.39
= control target key start
LH: loop header
LB: loop body
LE: loop exit
PB: predicated region body
PF: predicated region fallthrough
CT: control target
= control target key end

     0   :  { %s358_s1 = inlined_call_operand.vmem [shape: bf16[128,128], index: 1, kind: input, shape index: {}]   ;;  %s359_s0 = inlined_call_operand.vmem [shape: bf16[32,128], index: 0, kind: input, shape index: {}]   ;;  %s360_s2 = inlined_call_operand.vmem [shape: f32[1,128], index: 2, kind: input, shape index: {}]   ;;  %s361_s3 = inlined_call_operand.vmem [shape: f32[1,128], index: 3, kind: input, shape index: {}]   ;;  %s362_s4 = inlined_call_operand.vmem [shape: bf16[32,128], index: 4, kind: output, shape index: {}]  }
   0x1   :  { %v281_v0 = vld [vmem:[%s358_s1 + $0x38] sm:$0xff]   ;;  %v282_v1 = vld [vmem:[%s358_s1 + $0x30] sm:$0xff]   ;;  %v283_v2 = vld [vmem:[%s358_s1 + $0x28] sm:$0xff]  }
   0x2   :  { %261 = vmatprep.subr.bf16.mxu0 %v281_v0  ;;  %v284_v3 = vld [vmem:[%s358_s1 + $0x20] sm:$0xff]   ;;  %v285_v5 = vld [vmem:[%s358_s1 + $0x18] sm:$0xff]   ;;  %v286_v6 = vld [vmem:[%s358_s1 + $0x10] sm:$0xff]  }
   0x3   :  { %262 = vmatpush3.bf16.msra.mxu0 %v281_v0  ;;  %v289_v4 = vld [vmem:[%s359_s0] sm:$0xff]   ;;  %v287_v7 = vld [vmem:[%s358_s1 + $0x8] sm:$0xff]  }
   0x4   :  { %263 = vmatprep.subr.bf16.mxu0 %v282_v1  ;;  %277 = vmatprep.mubr.bf16.mxu0 %v289_v4  ;;  %v288_v8 = vld [vmem:[%s358_s1] sm:$0xff]   ;;  %v290_v9 = vld [vmem:[%s359_s0 + $0x8] sm:$0xff]  }
   0x5   :  { %v230_v11 = vld [vmem:[%s360_s2] ss:$0 sm:$0xff] }
   0x6   :  { %v231_v14 = vld [vmem:[%s361_s3] ss:$0 sm:$0xff] }
   0x7   :  { %264 = vmatpush3.bf16.msra.mxu0 %v282_v1 }
   0x8   :  { %265 = vmatprep.subr.bf16.mxu0 %v283_v2 }
   0xb   :  { %266 = vmatpush3.bf16.msra.mxu0 %v283_v2 }
   0xc   :  { %267 = vmatprep.subr.bf16.mxu0 %v284_v3 }
   0xf   :  { %268 = vmatpush3.bf16.msra.mxu0 %v284_v3 }
  0x10   :  { %269 = vmatprep.subr.bf16.mxu0 %v285_v5 }
  0x13   :  { %270 = vmatpush3.bf16.msra.mxu0 %v285_v5 }
  0x14   :  { %271 = vmatprep.subr.bf16.mxu0 %v286_v6 }
  0x17   :  { %272 = vmatpush3.bf16.msra.mxu0 %v286_v6 }
  0x18   :  { %273 = vmatprep.subr.bf16.mxu0 %v287_v7 }
  0x1b   :  { %274 = vmatpush3.bf16.msra.mxu0 %v287_v7 }
  0x1c   :  { %275 = vmatprep.subr.bf16.mxu0 %v288_v8 }
  0x1f   :  { %276 = vmatpush3.bf16.msra.mxu0 %v288_v8 }
  0x22   :  { %278 = vmatmul.mubr.bf16.vlgmr.msra.gmra.mxu0 %v290_v9 }
  0xe2   :  { %v279_v10 = vpop.f32.mrf.mxu0 }
  0xe3   :  { %v183_v13 = vmul.f32 %v279_v10, %v230_v11 }
  0xe4   :  { %v144_v12 = vpop.f32.mrf.mxu0 }
  0xe5   :  { %v181_v16 = vmul.f32 %v230_v11, %v144_v12  ;;  %v194_v19 = vadd.f32 %v231_v14, %v183_v13 }
  0xe6   :  { %v280_v15 = vpop.f32.mrf.mxu0 }
  0xe7   :  { %v184_v17 = vmul.f32 %v280_v15, %v230_v11  ;;  %v192_v22 = vadd.f32 %v231_v14, %v181_v16 }
  0xe8   :  { %v147_v18 = vpop.f32.mrf.mxu0 }
  0xe9   :  { %v195_v20 = vadd.f32 %v231_v14, %v184_v17  ;;  %v182_v21 = vmul.f32 %v230_v11, %v147_v18 }
  0xeb   :  { %v248_v23 = vpack.c.bf16 %v195_v20, %v194_v19  ;;  %v193_v24 = vadd.f32 %v231_v14, %v182_v21 }
  0xed   :  { %250 = vst [vmem:[%s362_s4 + $0x8] sm:$0xff] %v248_v23   ;;  %v243_v25 = vpack.c.bf16 %v193_v24, %v192_v22 }
  0xef   :  { %244 = vst [vmem:[%s362_s4] sm:$0xff] %v243_v25  }

// kernel: _lambda_.40
= control target key start
LH: loop header
LB: loop body
LE: loop exit
PB: predicated region body
PF: predicated region fallthrough
CT: control target
= control target key end

     0   :  { %s397_s1 = inlined_call_operand.vmem [shape: bf16[128,128], index: 1, kind: input, shape index: {}]   ;;  %s398_s0 = inlined_call_operand.vmem [shape: bf16[32,128], index: 0, kind: input, shape index: {}]   ;;  %s399_s2 = inlined_call_operand.vmem [shape: f32[1,128], index: 2, kind: input, shape index: {}]   ;;  %s400_s3 = inlined_call_operand.vmem [shape: f32[1,128], index: 3, kind: input, shape index: {}]   ;;  %s401_s4 = inlined_call_operand.vmem [shape: bf16[32,128], index: 4, kind: input, shape index: {}]   ;;  %s402_s5 = inlined_call_operand.vmem [shape: bf16[32,128], index: 5, kind: output, shape index: {}]  }
   0x1   :  { %v309_v0 = vld [vmem:[%s397_s1 + $0x38] sm:$0xff]   ;;  %v310_v1 = vld [vmem:[%s397_s1 + $0x30] sm:$0xff]   ;;  %v311_v2 = vld [vmem:[%s397_s1 + $0x28] sm:$0xff]  }
   0x2   :  { %289 = vmatprep.subr.bf16.mxu0 %v309_v0  ;;  %v312_v3 = vld [vmem:[%s397_s1 + $0x20] sm:$0xff]   ;;  %v313_v5 = vld [vmem:[%s397_s1 + $0x18] sm:$0xff]   ;;  %v314_v6 = vld [vmem:[%s397_s1 + $0x10] sm:$0xff]  }
   0x3   :  { %290 = vmatpush3.bf16.msra.mxu0 %v309_v0  ;;  %v317_v4 = vld [vmem:[%s398_s0] sm:$0xff]   ;;  %v315_v7 = vld [vmem:[%s397_s1 + $0x8] sm:$0xff]  }
   0x4   :  { %291 = vmatprep.subr.bf16.mxu0 %v310_v1  ;;  %305 = vmatprep.mubr.bf16.mxu0 %v317_v4  ;;  %v316_v8 = vld [vmem:[%s397_s1] sm:$0xff]   ;;  %v318_v9 = vld [vmem:[%s398_s0 + $0x8] sm:$0xff]  }
   0x5   :  { %v249_v10 = vld [vmem:[%s399_s2] ss:$0 sm:$0xff]  ;;  %v277_v13 = vld [vmem:[%s401_s4 + $0x8] sm:$0xff]  }
   0x6   :  { %v250_v12 = vld [vmem:[%s400_s3] ss:$0 sm:$0xff]  ;;  %v265_v18 = vunpack.c.l.bf16 %v277_v13  ;;  %v266_v24 = vunpack.c.h.bf16 %v277_v13 }
   0x7   :  { %292 = vmatpush3.bf16.msra.mxu0 %v310_v1  ;;  %v260_v16 = vld [vmem:[%s401_s4] sm:$0xff]  }
   0x8   :  { %293 = vmatprep.subr.bf16.mxu0 %v311_v2  ;;  %v261_v22 = vunpack.c.l.bf16 %v260_v16  ;;  %v262_v29 = vunpack.c.h.bf16 %v260_v16 }
   0xb   :  { %294 = vmatpush3.bf16.msra.mxu0 %v311_v2 }
   0xc   :  { %295 = vmatprep.subr.bf16.mxu0 %v312_v3 }
   0xf   :  { %296 = vmatpush3.bf16.msra.mxu0 %v312_v3 }
  0x10   :  { %297 = vmatprep.subr.bf16.mxu0 %v313_v5 }
  0x13   :  { %298 = vmatpush3.bf16.msra.mxu0 %v313_v5 }
  0x14   :  { %299 = vmatprep.subr.bf16.mxu0 %v314_v6 }
  0x17   :  { %300 = vmatpush3.bf16.msra.mxu0 %v314_v6 }
  0x18   :  { %301 = vmatprep.subr.bf16.mxu0 %v315_v7 }
  0x1b   :  { %302 = vmatpush3.bf16.msra.mxu0 %v315_v7 }
  0x1c   :  { %303 = vmatprep.subr.bf16.mxu0 %v316_v8 }
  0x1f   :  { %304 = vmatpush3.bf16.msra.mxu0 %v316_v8 }
  0x22   :  { %306 = vmatmul.mubr.bf16.vlgmr.msra.gmra.mxu0 %v318_v9 }
  0xe2   :  { %v307_v11 = vpop.f32.mrf.mxu0 }
  0xe3   :  { %v186_v14 = vmul.f32 %v307_v11, %v249_v10 }
  0xe4   :  { %v147_v15 = vpop.f32.mrf.mxu0 }
  0xe5   :  { %v197_v17 = vadd.f32 %v250_v12, %v186_v14  ;;  %v184_v19 = vmul.f32 %v249_v10, %v147_v15 }
  0xe6   :  { %v308_v20 = vpop.f32.mrf.mxu0 }
  0xe7   :  { %v195_v21 = vadd.f32 %v250_v12, %v184_v19  ;;  %v187_v23 = vmul.f32 %v308_v20, %v249_v10  ;;  %v209_v26 = vadd.f32 %v265_v18, %v197_v17 }
  0xe8   :  { %v150_v25 = vpop.f32.mrf.mxu0 }
  0xe9   :  { %v198_v27 = vadd.f32 %v250_v12, %v187_v23  ;;  %v185_v28 = vmul.f32 %v249_v10, %v150_v25  ;;  %v207_v30 = vadd.f32 %v261_v22, %v195_v21  ;;  %v213_v33 = vmax.f32 %v209_v26, 0.0 }
  0xeb   :  { %v210_v31 = vadd.f32 %v266_v24, %v198_v27  ;;  %v196_v32 = vadd.f32 %v250_v12, %v185_v28  ;;  %v211_v36 = vmax.f32 %v207_v30, 0.0 }
  0xed   :  { %v214_v34 = vmax.f32 %v210_v31, 0.0  ;;  %v208_v35 = vadd.f32 %v262_v29, %v196_v32 }
  0xef   :  { %v275_v37 = vpack.c.bf16 %v214_v34, %v213_v33  ;;  %v212_v38 = vmax.f32 %v208_v35, 0.0 }
  0xf1   :  { %278 = vst [vmem:[%s402_s5 + $0x8] sm:$0xff] %v275_v37   ;;  %v270_v39 = vpack.c.bf16 %v212_v38, %v211_v36 }
  0xf3   :  { %271 = vst [vmem:[%s402_s5] sm:$0xff] %v270_v39  }

// kernel: _lambda_.38
= control target key start
LH: loop header
LB: loop body
LE: loop exit
PB: predicated region body
PF: predicated region fallthrough
CT: control target
= control target key end

     0   :  { %s1143_s15 = smov 0   ;;  %s1145_s16 = smov 0   ;;  %s1256_s0 = inlined_call_operand.vmem [shape: bf16[32,1152], index: 0, kind: input, shape index: {}]   ;;  %s1257_s1 = inlined_call_operand.vmem [shape: bf16[1152,128], index: 1, kind: input, shape index: {}]   ;;  %s1258_s2 = inlined_call_operand.vmem [shape: f32[1,128], index: 2, kind: input, shape index: {}]   ;;  %s1259_s3 = inlined_call_operand.vmem [shape: f32[1,128], index: 3, kind: input, shape index: {}]   ;;  %s1260_s4 = inlined_call_operand.vmem [shape: bf16[32,128], index: 4, kind: output, shape index: {}]  }
   0x1   :  { %s1147_s17 = smov 0   ;;  %s1149_s18 = smov 0  }
   0x2   :  { %s1151_s19 = smov 0  }
   0x3 LB: > { %s26_s20 = sadd.s32 1, %s1111_s18  ;;  %p49_p1 = scmp.ne.s32.totalorder %s1103_s16, %s1099_s15  ;;  %s1115_s19 = sphi %s1151_s19, %s14_s19   ;;  %s1111_s18 = sphi %s1149_s18, %s1264_s18   ;;  %s1107_s17 = sphi %s1147_s17, %s1263_s17   ;;  %s1103_s16 = sphi %s1145_s16, %s1262_s16   ;;  %s1099_s15 = sphi %s1143_s15, %s1261_s15  }
   0x4   : > { %p27_p0 = scmp.ge.s32.totalorder %s26_s20, 3  ;;  %p50_p2 = scmp.eq.s32.totalorder %s1115_s19, 0 }
   0x5   : > { %s42_s22 = sadd.s32 1, %s1103_s16  ;;  %p874_p5 = scmp.ge.s32.totalorder %s1115_s19, 3 }
   0x6   : > { %s1266_s20 = smov (%p27_p0, %s26_s20), 0  ;;  %p51_p3 = por %p50_p2, %p49_p1 }
   0x7   : > { %s38_s21 = ssub.s32 %s1111_s18, %s1266_s20  ;;  %195 = sbr.rel (%p874_p5) target bundleno = 21 (0x15), region = 24 }
   0x8   : > { %p40_p4 = scmp.eq.s32.totalorder %s38_s21, 0 }
   0xa   : > { %s1178_s23 = scalar_select %p40_p4, %s1103_s16, %s42_s22  }
   0xc   : > { %198 = sbr.rel (!%p51_p3) target bundleno = 21 (0x15), region = 28  ;;  %s200_s24 = sand.u32 (%p51_p3), 1, %s1103_s16  }
   0xd   : > { %s928_s25 = smul.u32 (%p51_p3), 12, %s1111_s18 }
   0xe   : > { %s1002_s26 = smul.u32 (%p51_p3), 48, %s200_s24 }
   0xf   : > { %s208_s29 = scalar_lea.vmem (%p51_p3), %s1256_s0, %s928_s25 }
  0x10   : > { %v223_v0 = vld [vmem:[%s208_s29] sm:$0xff] (%p51_p3)  ;;  %v227_v2 = vld [vmem:[%s208_s29 + $0x48] sm:$0xff] (%p51_p3)  ;;  %s202_s30 = scalar_lea.vmem (%p51_p3), [#allocation3], %s1002_s26  ;;  %v880_v6 = vld [vmem:[%s208_s29 + $0x50] sm:$0xf] (%p51_p3) }
  0x11   : > { %v225_v1 = vld [vmem:[%s208_s29 + $0x24] sm:$0xff]  ;;  %224 = vst [vmem:[%s202_s30] sm:$0xff] %v223_v0  ;;  %228 = vst [vmem:[%s202_s30 + $0x18] sm:$0xff] %v227_v2  ;;  %v229_v3 = vld [vmem:[%s208_s29 + $0x6c] sm:$0xff] }
  0x12   : > { %226 = vst [vmem:[%s202_s30 + $0xc] sm:$0xff] %v225_v1  ;;  %v876_v4 = vld [vmem:[%s208_s29 + $0x8] sm:$0xf]  ;;  %v878_v5 = vld [vmem:[%s208_s29 + $0x2c] sm:$0xf]  ;;  %230 = vst [vmem:[%s202_s30 + $0x24] sm:$0xff] %v229_v3 }
  0x13   : > { %877 = vst [vmem:[%s202_s30 + $0x8] sm:$0xf] %v876_v4  ;;  %879 = vst [vmem:[%s202_s30 + $0x14] sm:$0xf] %v878_v5  ;;  %v882_v7 = vld [vmem:[%s208_s29 + $0x74] sm:$0xf] }
  0x14   : > { %881 = vst [vmem:[%s202_s30 + $0x20] sm:$0xf] %v880_v6  ;;  %883 = vst [vmem:[%s202_s30 + $0x2c] sm:$0xf] %v882_v7 }
  0x15 PF: > { %p884_p6 = scmp.ge.s32.totalorder %s1115_s19, 1  ;;  %p263_p7 = scmp.lt.s32.totalorder %s1115_s19, 4 }
  0x17   : > { %p264_p8 = pnand %p884_p6, %p263_p7 }
  0x18   : > { %s270_s5 = sand.u32 (!%p264_p8), 1, %s1099_s15   ;;  %s314_s6 = smul.u32 (!%p264_p8), 48, %s1107_s17 }
  0x19   : > { %267 = sbr.rel (%p264_p8) target bundleno = 301 (0x12d), region = 58  ;;  %p886_p10 = scmp.ne.s32.totalorder (!%p264_p8), %s1107_s17, 0 }
  0x1a   : > { %s1003_s7 = smul.u32 (!%p264_p8), 48, %s270_s5  ;;  %p315_p9 = scmp.lt.s32.totalorder (!%p264_p8), %s314_s6, 143 }
  0x1c   : > { %s1195_s12 = scalar_lea.vmem (!%p264_p8), [#allocation3], %s1003_s7 }
  0x1e   : > { %s1268_s6 = smov (!%p315_p9, %s314_s6), 143  ;;  %342 = sbr.rel (%p886_p10) target bundleno = 38 (0x26), region = 66 }
  0x1f   : > { %s885_s8 = sshll.u32 %s1268_s6, 2 }
  0x20   : > { %s1193_s11 = scalar_lea.vmem %s1257_s1, %s885_s8 }
  0x23   : > { %v1117_v8 = vmov 0.0  }
  0x24   : > { %343 = vst [vmem:[#allocation2 + $0x10] sm:$0xff] %v1117_v8  ;;  %344 = vst [vmem:[#allocation2] sm:$0xff] %v1117_v8 }
  0x25   : > { %345 = vst [vmem:[#allocation2 + $0x18] sm:$0xff] %v1117_v8  ;;  %346 = vst [vmem:[#allocation2 + $0x8] sm:$0xff] %v1117_v8 }
  0x26 PF: > { %v1045_v9 = vld [vmem:[%s1193_s11 + $0x78] sm:$0xff]   ;;  %v1048_v12 = vld [vmem:[%s1193_s11 + $0x70] sm:$0xff]   ;;  %v1051_v15 = vld [vmem:[%s1193_s11 + $0x68] sm:$0xff]   ;;  %p917_p11 = scmp.ne.s32.totalorder %s1107_s17, 2 }
  0x27   : > { %v1046_v10 = vld [vmem:[%s1193_s11 + $0x38] sm:$0xff]   ;;  %944 = vmatprep.subr.bf16.mxu0 %v1045_v9  ;;  %v1049_v13 = vld [vmem:[%s1193_s11 + $0x30] sm:$0xff]   ;;  %v1052_v16 = vld [vmem:[%s1193_s11 + $0x28] sm:$0xff]  }
  0x28   : > { %v1047_v11 = vld [vmem:[%s1193_s11 + $0xb8] sm:$0xff]   ;;  %945 = vmatpush3.bf16.msra.mxu0 %v1046_v10  ;;  %v1050_v14 = vld [vmem:[%s1193_s11 + $0xb0] sm:$0xff]   ;;  %v1053_v17 = vld [vmem:[%s1193_s11 + $0xa8] sm:$0xff]  }
  0x29   : > { %982 = vmatprep.subr.bf16.mxu1 %v1047_v11  ;;  %946 = vmatprep.subr.bf16.mxu0 %v1048_v12  ;;  %v1054_v18 = vld [vmem:[%s1193_s11 + $0x60] sm:$0xff]   ;;  %v1057_v21 = vld [vmem:[%s1193_s11 + $0x58] sm:$0xff]   ;;  %v1060_v24 = vld [vmem:[%s1193_s11 + $0x50] sm:$0xff]  }
  0x2a   : > { %983 = vmatpush3.bf16.msra.mxu1 %v1047_v11  ;;  %v1055_v19 = vld [vmem:[%s1193_s11 + $0x20] sm:$0xff]   ;;  %v1059_v22 = vld [vmem:[%s1193_s11 + $0x98] sm:$0xff]   ;;  %v1062_v25 = vld [vmem:[%s1193_s11 + $0x90] sm:$0xff]  }
  0x2b   : > { %984 = vmatprep.subr.bf16.mxu1 %v1050_v14  ;;  %v1056_v20 = vld [vmem:[%s1193_s11 + $0xa0] sm:$0xff]   ;;  %v1058_v23 = vld [vmem:[%s1193_s11 + $0x18] sm:$0xff]   ;;  %v1061_v26 = vld [vmem:[%s1193_s11 + $0x10] sm:$0xff]  }
  0x2c   : > { %947 = vmatpush3.bf16.msra.mxu0 %v1049_v13  ;;  %v1063_v27 = vld [vmem:[%s1193_s11 + $0x48] sm:$0xff]   ;;  %v1066_v30 = vld [vmem:[%s1193_s11 + $0x40] sm:$0xff]   ;;  %v347_v44 = vld [vmem:[#allocation2 + $0x10] sm:$0xff] }
  0x2d   : > { %948 = vmatprep.subr.bf16.mxu0 %v1051_v15  ;;  %v1064_v28 = vld [vmem:[%s1193_s11 + $0x8] sm:$0xff]   ;;  %v1068_v31 = vld [vmem:[%s1193_s11 + $0x80] sm:$0xff]   ;;  %v349_v58 = vld [vmem:[#allocation2 + $0x18] sm:$0xff] }
  0x2e   : > { %985 = vmatpush3.bf16.msra.mxu1 %v1050_v14  ;;  %v1065_v29 = vld [vmem:[%s1193_s11 + $0x88] sm:$0xff]   ;;  %v1071_v32 = vld [vmem:[%s1195_s12 + $0x4] ss:$12 sps:$4 sm:$0xff]  }
  0x2f   : > { %986 = vmatprep.subr.bf16.mxu1 %v1053_v17  ;;  %v1072_v33 = vld [vmem:[%s1195_s12 + $0x8] ss:$12 sps:$4 sm:$0xff]   ;;  %615 = vmatprep.mubr.bf16.mxu0 %v1071_v32  ;;  %v1069_v35 = vld [vmem:[%s1195_s12] ss:$12 sps:$4 sm:$0xff]   ;;  %v1076_v38 = vld [vmem:[%s1195_s12 + $0x18] ss:$12 sps:$4 sm:$0xff]  }
  0x30   : > { %949 = vmatpush3.bf16.msra.mxu0 %v1052_v16  ;;  %v1067_v34 = vld [vmem:[%s1193_s11] sm:$0xff]   ;;  %998 = vmatprep.mubr.bf16.mxu1 %v1072_v33  ;;  %v1074_v36 = vld [vmem:[%s1195_s12 + $0x1c] ss:$12 sps:$4 sm:$0xff]  }
  0x31   : > { %950 = vmatprep.subr.bf16.mxu0 %v1054_v18  ;;  %v1073_v37 = vld [vmem:[%s1195_s12 + $0x20] ss:$12 sps:$4 sm:$0xff]  }
  0x32   : > { %987 = vmatpush3.bf16.msra.mxu1 %v1053_v17  ;;  %v348_v52 = vld [vmem:[#allocation2] sm:$0xff]  ;;  %v350_v0 = vld [vmem:[#allocation2 + $0x8] sm:$0xff] }
  0x33   : > { %988 = vmatprep.subr.bf16.mxu1 %v1056_v20 }
  0x34   : > { %951 = vmatpush3.bf16.msra.mxu0 %v1055_v19 }
  0x35   : > { %952 = vmatprep.subr.bf16.mxu0 %v1057_v21 }
  0x36   : > { %989 = vmatpush3.bf16.msra.mxu1 %v1056_v20 }
  0x37   : > { %990 = vmatprep.subr.bf16.mxu1 %v1059_v22 }
  0x38   : > { %953 = vmatpush3.bf16.msra.mxu0 %v1058_v23 }
  0x39   : > { %954 = vmatprep.subr.bf16.mxu0 %v1060_v24 }
  0x3a   : > { %991 = vmatpush3.bf16.msra.mxu1 %v1059_v22 }
  0x3b   : > { %992 = vmatprep.subr.bf16.mxu1 %v1062_v25 }
  0x3c   : > { %955 = vmatpush3.bf16.msra.mxu0 %v1061_v26 }
  0x3d   : > { %956 = vmatprep.subr.bf16.mxu0 %v1063_v27 }
  0x3e   : > { %993 = vmatpush3.bf16.msra.mxu1 %v1062_v25 }
  0x3f   : > { %994 = vmatprep.subr.bf16.mxu1 %v1065_v29 }
  0x40   : > { %957 = vmatpush3.bf16.msra.mxu0 %v1064_v28 }
  0x41   : > { %958 = vmatprep.subr.bf16.mxu0 %v1066_v30 }
  0x42   : > { %995 = vmatpush3.bf16.msra.mxu1 %v1065_v29 }
  0x43   : > { %996 = vmatprep.subr.bf16.mxu1 %v1068_v31 }
  0x44   : > { %959 = vmatpush3.bf16.msra.mxu0 %v1067_v34 }
  0x46   : > { %997 = vmatpush3.bf16.msra.mxu1 %v1068_v31 }
  0x47   : > { %616 = vmatmul.mubr.bf16.vlgmr.msra.gmra.mxu0 %v1069_v35 }
  0x48   : > { %623 = vmatprep.mubr.bf16.mxu0 %v1074_v36 }
  0x49   : > { %999 = vmatmul.mubr.bf16.vlgmr.msra.gmra.mxu1 %v1073_v37 }
  0x4f   : > { %624 = vmatmul.mubr.bf16.gmra.mxu0 %v1076_v38 }
 0x107   : > { %v960_v39 = vpop.f32.mrf.mxu0 }
 0x109   : > { %v961_v40 = vpop.f32.mrf.mxu0  ;;  %v1000_v41 = vpop.f32.mrf.mxu1 }
 0x10a   : > { %v962_v42 = vadd.f32 %v961_v40, %v960_v39 }
 0x10b   : > { %v963_v43 = vpop.f32.mrf.mxu0  ;;  %v666_v45 = vpop.f32.mrf.mxu1 }
 0x10c   : > { %v667_v46 = vadd.f32 %v962_v42, %v666_v45 }
 0x10d   : > { %v964_v47 = vpop.f32.mrf.mxu0  ;;  %v1001_v48 = vpop.f32.mrf.mxu1 }
 0x10e   : > { %v681_v49 = vadd.f32 %v667_v46, %v347_v44  ;;  %v965_v50 = vadd.f32 %v964_v47, %v963_v43 }
 0x10f   : > { %v966_v51 = vpop.f32.mrf.mxu0  ;;  %v669_v53 = vpop.f32.mrf.mxu1 }
 0x110   : > { %685 = vst [vmem:[#allocation2 + $0x10] sm:$0xff] %v681_v49  ;;  %v670_v54 = vadd.f32 %v965_v50, %v669_v53 }
 0x111   : > { %v967_v55 = vpop.f32.mrf.mxu0 }
 0x112   : > { %v682_v56 = vadd.f32 %v670_v54, %v348_v52  ;;  %v968_v57 = vadd.f32 %v967_v55, %v966_v51 }
 0x113   : > { %v969_v59 = vpop.f32.mrf.mxu0 }
 0x114   : > { %686 = vst [vmem:[#allocation2] sm:$0xff] %v682_v56  ;;  %v675_v60 = vadd.f32 %v1000_v41, %v968_v57 }
 0x115   : > { %v970_v61 = vpop.f32.mrf.mxu0 }
 0x116   : > { %v683_v62 = vadd.f32 %v675_v60, %v349_v58  ;;  %v971_v63 = vadd.f32 %v970_v61, %v969_v59 }
 0x118   : > { %687 = vst [vmem:[#allocation2 + $0x18] sm:$0xff] %v683_v62  ;;  %v678_v1 = vadd.f32 %v1001_v48, %v971_v63  ;;  %692 = sbr.rel (%p917_p11) target bundleno = 301 (0x12d), region = 70 }
 0x11a   : > { %v684_v2 = vadd.f32 %v678_v1, %v350_v0 }
 0x11c   : > { %688 = vst [vmem:[#allocation2 + $0x8] sm:$0xff] %v684_v2 }
 0x11d   : > { %v693_v3 = vld [vmem:[#allocation2 + $0x10] sm:$0xff]  ;;  %v694_v4 = vld [vmem:[#allocation2] sm:$0xff] }
 0x11e   : > { %v918_v5 = vld [vmem:[%s1258_s2] ss:$0 sm:$0xff] }
 0x11f   : > { %v704_v6 = vmul.f32 %v918_v5, %v693_v3  ;;  %v705_v7 = vmul.f32 %v918_v5, %v694_v4  ;;  %v919_v8 = vld [vmem:[%s1259_s3] ss:$0 sm:$0xff]  ;;  %v695_v9 = vld [vmem:[#allocation2 + $0x18] sm:$0xff] }
 0x120   : > { %v706_v11 = vmul.f32 %v918_v5, %v695_v9 }
 0x121   : > { %v715_v13 = vadd.f32 %v919_v8, %v704_v6  ;;  %v716_v14 = vadd.f32 %v919_v8, %v705_v7 }
 0x122   : > { %v717_v15 = vadd.f32 %v919_v8, %v706_v11 }
 0x123   : > { %v696_v10 = vld [vmem:[#allocation2 + $0x8] sm:$0xff]  ;;  %v719_v17 = vmax.f32 %v715_v13, 0.0  ;;  %v720_v18 = vmax.f32 %v716_v14, 0.0 }
 0x124   : > { %v707_v12 = vmul.f32 %v918_v5, %v696_v10  ;;  %v721_v19 = vmax.f32 %v717_v15, 0.0 }
 0x125   : > { %v936_v21 = vpack.c.bf16 %v720_v18, %v719_v17 }
 0x126   : > { %v718_v16 = vadd.f32 %v919_v8, %v707_v12 }
 0x127   : > { %937 = vst [vmem:[%s1260_s4] sm:$0xff] %v936_v21  }
 0x128   : > { %v722_v20 = vmax.f32 %v718_v16, 0.0 }
 0x12a   : > { %v941_v22 = vpack.c.bf16 %v722_v20, %v721_v19 }
 0x12c   : > { %943 = vst [vmem:[%s1260_s4 + $0x8] sm:$0xff] %v941_v22  }
 0x12d PF: > { %s14_s19 = sadd.s32 1, %s1115_s19   ;;  %s1261_s15 = smov %s1103_s16 }
 0x12e   : > { %p11_p12 = scmp.ge.s32.totalorder %s14_s19, 5   ;;  %s1262_s16 = smov %s1178_s23 }
 0x12f   : > { %s1263_s17 = smov %s1111_s18  ;;  %s1264_s18 = smov %s1266_s20 }
 0x130   :  { %13 = sbr.rel (!%p11_p12) target bundleno = 3 (0x3), region = 120 }

// kernel: _lambda_.41
= control target key start
LH: loop header
LB: loop body
LE: loop exit
PB: predicated region body
PF: predicated region fallthrough
CT: control target
= control target key end

     0   :  { %s362_s1 = inlined_call_operand.vmem [shape: bf16[128,128], index: 1, kind: input, shape index: {}]   ;;  %s363_s0 = inlined_call_operand.vmem [shape: bf16[32,128], index: 0, kind: input, shape index: {}]   ;;  %s364_s2 = inlined_call_operand.vmem [shape: f32[1,128], index: 2, kind: input, shape index: {}]   ;;  %s365_s3 = inlined_call_operand.vmem [shape: f32[1,128], index: 3, kind: input, shape index: {}]   ;;  %s366_s4 = inlined_call_operand.vmem [shape: bf16[32,128], index: 4, kind: output, shape index: {}]  }
   0x1   :  { %v285_v0 = vld [vmem:[%s362_s1 + $0x38] sm:$0xff]   ;;  %v286_v1 = vld [vmem:[%s362_s1 + $0x30] sm:$0xff]   ;;  %v287_v2 = vld [vmem:[%s362_s1 + $0x28] sm:$0xff]  }
   0x2   :  { %265 = vmatprep.subr.bf16.mxu0 %v285_v0  ;;  %v288_v3 = vld [vmem:[%s362_s1 + $0x20] sm:$0xff]   ;;  %v289_v5 = vld [vmem:[%s362_s1 + $0x18] sm:$0xff]   ;;  %v290_v6 = vld [vmem:[%s362_s1 + $0x10] sm:$0xff]  }
   0x3   :  { %266 = vmatpush3.bf16.msra.mxu0 %v285_v0  ;;  %v293_v4 = vld [vmem:[%s363_s0] sm:$0xff]   ;;  %v291_v7 = vld [vmem:[%s362_s1 + $0x8] sm:$0xff]  }
   0x4   :  { %267 = vmatprep.subr.bf16.mxu0 %v286_v1  ;;  %281 = vmatprep.mubr.bf16.mxu0 %v293_v4  ;;  %v292_v8 = vld [vmem:[%s362_s1] sm:$0xff]   ;;  %v294_v9 = vld [vmem:[%s363_s0 + $0x8] sm:$0xff]  }
   0x5   :  { %v234_v10 = vld [vmem:[%s364_s2] ss:$0 sm:$0xff] }
   0x6   :  { %v235_v13 = vld [vmem:[%s365_s3] ss:$0 sm:$0xff] }
   0x7   :  { %268 = vmatpush3.bf16.msra.mxu0 %v286_v1 }
   0x8   :  { %269 = vmatprep.subr.bf16.mxu0 %v287_v2 }
   0xb   :  { %270 = vmatpush3.bf16.msra.mxu0 %v287_v2 }
   0xc   :  { %271 = vmatprep.subr.bf16.mxu0 %v288_v3 }
   0xf   :  { %272 = vmatpush3.bf16.msra.mxu0 %v288_v3 }
  0x10   :  { %273 = vmatprep.subr.bf16.mxu0 %v289_v5 }
  0x13   :  { %274 = vmatpush3.bf16.msra.mxu0 %v289_v5 }
  0x14   :  { %275 = vmatprep.subr.bf16.mxu0 %v290_v6 }
  0x17   :  { %276 = vmatpush3.bf16.msra.mxu0 %v290_v6 }
  0x18   :  { %277 = vmatprep.subr.bf16.mxu0 %v291_v7 }
  0x1b   :  { %278 = vmatpush3.bf16.msra.mxu0 %v291_v7 }
  0x1c   :  { %279 = vmatprep.subr.bf16.mxu0 %v292_v8 }
  0x1f   :  { %280 = vmatpush3.bf16.msra.mxu0 %v292_v8 }
  0x22   :  { %282 = vmatmul.mubr.bf16.vlgmr.msra.gmra.mxu0 %v294_v9 }
  0xe2   :  { %v283_v11 = vpop.f32.mrf.mxu0 }
  0xe3   :  { %v183_v12 = vmul.f32 %v283_v11, %v234_v10 }
  0xe4   :  { %v144_v14 = vpop.f32.mrf.mxu0 }
  0xe5   :  { %v181_v15 = vmul.f32 %v234_v10, %v144_v14  ;;  %v194_v17 = vadd.f32 %v235_v13, %v183_v12 }
  0xe6   :  { %v284_v16 = vpop.f32.mrf.mxu0 }
  0xe7   :  { %v184_v18 = vmul.f32 %v284_v16, %v234_v10  ;;  %v192_v20 = vadd.f32 %v235_v13, %v181_v15  ;;  %v198_v23 = vmax.f32 %v194_v17, 0.0 }
  0xe8   :  { %v147_v19 = vpop.f32.mrf.mxu0 }
  0xe9   :  { %v195_v21 = vadd.f32 %v235_v13, %v184_v18  ;;  %v182_v22 = vmul.f32 %v234_v10, %v147_v19  ;;  %v196_v26 = vmax.f32 %v192_v20, 0.0 }
  0xeb   :  { %v199_v24 = vmax.f32 %v195_v21, 0.0  ;;  %v193_v25 = vadd.f32 %v235_v13, %v182_v22 }
  0xed   :  { %v252_v27 = vpack.c.bf16 %v199_v24, %v198_v23  ;;  %v197_v28 = vmax.f32 %v193_v25, 0.0 }
  0xef   :  { %254 = vst [vmem:[%s366_s4 + $0x8] sm:$0xff] %v252_v27   ;;  %v247_v29 = vpack.c.bf16 %v197_v28, %v196_v26 }
  0xf1   :  { %248 = vst [vmem:[%s366_s4] sm:$0xff] %v247_v29  }

// kernel: _lambda_.46
= control target key start
LH: loop header
LB: loop body
LE: loop exit
PB: predicated region body
PF: predicated region fallthrough
CT: control target
= control target key end

     0   :  { %v240_v0 = vmov 0.0   ;;  %vm241_vm0 = vmmov 0   ;;  %s303_s1 = inlined_call_operand.vmem [shape: bf16[128,128], index: 1, kind: input, shape index: {}]   ;;  %s304_s0 = inlined_call_operand.vmem [shape: bf16[16,128], index: 0, kind: input, shape index: {}]   ;;  %s305_s2 = inlined_call_operand.vmem [shape: f32[1,128], index: 2, kind: input, shape index: {}]   ;;  %s306_s3 = inlined_call_operand.vmem [shape: f32[1,128], index: 3, kind: input, shape index: {}]   ;;  %s307_s4 = inlined_call_operand.vmem [shape: bf16[16,128], index: 4, kind: output, shape index: {}]  }
   0x1   :  { %209 = vmatprep.subr.bf16.mxu0 %v240_v0  ;;  %v231_v1 = vld [vmem:[%s303_s1 + $0x38] sm:$0xff]   ;;  %225 = vmatprep.mubr.msk.bf16.mxu0 %vm241_vm0, %v240_v0  ;;  %v232_v2 = vld [vmem:[%s303_s1 + $0x30] sm:$0xff]   ;;  %v233_v3 = vld [vmem:[%s303_s1 + $0x28] sm:$0xff]  }
   0x2   :  { %210 = vmatpush3.bf16.msra.mxu0 %v231_v1  ;;  %v234_v4 = vld [vmem:[%s303_s1 + $0x20] sm:$0xff]   ;;  %v235_v5 = vld [vmem:[%s303_s1 + $0x18] sm:$0xff]   ;;  %v236_v6 = vld [vmem:[%s303_s1 + $0x10] sm:$0xff]  }
   0x3   :  { %211 = vmatprep.subr.bf16.mxu0 %v240_v0  ;;  %v237_v7 = vld [vmem:[%s303_s1 + $0x8] sm:$0xff]   ;;  %v238_v8 = vld [vmem:[%s303_s1] sm:$0xff]  }
   0x4   :  { %v239_v9 = vld [vmem:[%s304_s0] sm:$0xff]  }
   0x5   :  { %v189_v11 = vld [vmem:[%s305_s2] ss:$0 sm:$0xff] }
   0x6   :  { %212 = vmatpush3.bf16.msra.mxu0 %v232_v2  ;;  %v190_v14 = vld [vmem:[%s306_s3] ss:$0 sm:$0xff] }
   0x7   :  { %213 = vmatprep.subr.bf16.mxu0 %v240_v0 }
   0xa   :  { %214 = vmatpush3.bf16.msra.mxu0 %v233_v3 }
   0xb   :  { %215 = vmatprep.subr.bf16.mxu0 %v240_v0 }
   0xe   :  { %216 = vmatpush3.bf16.msra.mxu0 %v234_v4 }
   0xf   :  { %217 = vmatprep.subr.bf16.mxu0 %v240_v0 }
  0x12   :  { %218 = vmatpush3.bf16.msra.mxu0 %v235_v5 }
  0x13   :  { %219 = vmatprep.subr.bf16.mxu0 %v240_v0 }
  0x16   :  { %220 = vmatpush3.bf16.msra.mxu0 %v236_v6 }
  0x17   :  { %221 = vmatprep.subr.bf16.mxu0 %v240_v0 }
  0x1a   :  { %222 = vmatpush3.bf16.msra.mxu0 %v237_v7 }
  0x1b   :  { %223 = vmatprep.subr.bf16.mxu0 %v240_v0 }
  0x1e   :  { %224 = vmatpush3.bf16.msra.mxu0 %v238_v8 }
  0x21   :  { %226 = vmatmul.mubr.bf16.vlgmr.msra.gmra.mxu0 %v239_v9 }
  0xe1   :  { %v132_v10 = vpop.f32.mrf.mxu0 }
  0xe2   :  { %v155_v13 = vmul.f32 %v189_v11, %v132_v10 }
  0xe3   :  { %v227_v12 = vpop.f32.mrf.mxu0 }
  0xe4   :  { %v164_v18 = vadd.f32 %v190_v14, %v155_v13 }
  0xe5   :  { %v135_v15 = vpop.f32.mrf.mxu0 }
  0xe6   :  { %v156_v16 = vmul.f32 %v189_v11, %v135_v15 }
  0xe7   :  { %v228_v17 = vpop.f32.mrf.mxu0 }
  0xe8   :  { %v165_v19 = vadd.f32 %v190_v14, %v156_v16 }
  0xea   :  { %v198_v20 = vpack.c.bf16 %v165_v19, %v164_v18 }
  0xec   :  { %199 = vst [vmem:[%s307_s4] sm:$0xff] %v198_v20  }

// kernel: _lambda_.45
= control target key start
LH: loop header
LB: loop body
LE: loop exit
PB: predicated region body
PF: predicated region fallthrough
CT: control target
= control target key end

     0   :  { %s1049_s15 = smov 0   ;;  %s1051_s16 = smov 0   ;;  %s1156_s0 = inlined_call_operand.vmem [shape: bf16[16,1152], index: 0, kind: input, shape index: {}]   ;;  %s1157_s1 = inlined_call_operand.vmem [shape: bf16[1152,128], index: 1, kind: input, shape index: {}]   ;;  %s1158_s2 = inlined_call_operand.vmem [shape: f32[1,128], index: 2, kind: input, shape index: {}]   ;;  %s1159_s3 = inlined_call_operand.vmem [shape: f32[1,128], index: 3, kind: input, shape index: {}]   ;;  %s1160_s4 = inlined_call_operand.vmem [shape: bf16[16,128], index: 4, kind: output, shape index: {}]  }
   0x1   :  { %s1053_s17 = smov 0   ;;  %s1055_s18 = smov 0  }
   0x2   :  { %s1057_s19 = smov 0  }
   0x3 LB: > { %s26_s20 = sadd.s32 1, %s1015_s18  ;;  %p49_p1 = scmp.ne.s32.totalorder %s1007_s16, %s1003_s15  ;;  %s1019_s19 = sphi %s1057_s19, %s14_s19   ;;  %s1015_s18 = sphi %s1055_s18, %s1164_s18   ;;  %s1011_s17 = sphi %s1053_s17, %s1163_s17   ;;  %s1007_s16 = sphi %s1051_s16, %s1162_s16   ;;  %s1003_s15 = sphi %s1049_s15, %s1161_s15  }
   0x4   : > { %p27_p0 = scmp.ge.s32.totalorder %s26_s20, 3  ;;  %p50_p2 = scmp.eq.s32.totalorder %s1019_s19, 0 }
   0x5   : > { %s42_s22 = sadd.s32 1, %s1007_s16  ;;  %p804_p5 = scmp.ge.s32.totalorder %s1019_s19, 3 }
   0x6   : > { %s1166_s20 = smov (%p27_p0, %s26_s20), 0  ;;  %p51_p3 = por %p50_p2, %p49_p1 }
   0x7   : > { %s38_s21 = ssub.s32 %s1015_s18, %s1166_s20  ;;  %195 = sbr.rel (%p804_p5) target bundleno = 19 (0x13), region = 24 }
   0x8   : > { %p40_p4 = scmp.eq.s32.totalorder %s38_s21, 0 }
   0xa   : > { %s1084_s23 = scalar_select %p40_p4, %s1007_s16, %s42_s22  }
   0xc   : > { %198 = sbr.rel (!%p51_p3) target bundleno = 19 (0x13), region = 28  ;;  %s200_s24 = sand.u32 (%p51_p3), 1, %s1007_s16  }
   0xd   : > { %s849_s25 = smul.u32 (%p51_p3), 12, %s1015_s18 }
   0xe   : > { %s908_s26 = smul.u32 (%p51_p3), 24, %s200_s24 }
   0xf   : > { %s208_s29 = scalar_lea.vmem (%p51_p3), %s1156_s0, %s849_s25 }
  0x10   : > { %v223_v0 = vld [vmem:[%s208_s29] sm:$0xff] (%p51_p3)  ;;  %v806_v2 = vld [vmem:[%s208_s29 + $0x8] sm:$0xf] (%p51_p3)  ;;  %s202_s30 = scalar_lea.vmem (%p51_p3), [#allocation3], %s908_s26  ;;  %v808_v3 = vld [vmem:[%s208_s29 + $0x2c] sm:$0xf] (%p51_p3) }
  0x11   : > { %v225_v1 = vld [vmem:[%s208_s29 + $0x24] sm:$0xff]  ;;  %224 = vst [vmem:[%s202_s30] sm:$0xff] %v223_v0  ;;  %807 = vst [vmem:[%s202_s30 + $0x8] sm:$0xf] %v806_v2 }
  0x12   : > { %226 = vst [vmem:[%s202_s30 + $0xc] sm:$0xff] %v225_v1  ;;  %809 = vst [vmem:[%s202_s30 + $0x14] sm:$0xf] %v808_v3 }
  0x13 PF: > { %p810_p6 = scmp.ge.s32.totalorder %s1019_s19, 1  ;;  %p255_p7 = scmp.lt.s32.totalorder %s1019_s19, 4 }
  0x15   : > { %p256_p8 = pnand %p810_p6, %p255_p7 }
  0x16   : > { %s262_s5 = sand.u32 (!%p256_p8), 1, %s1003_s15   ;;  %s306_s6 = smul.u32 (!%p256_p8), 48, %s1011_s17 }
  0x17   : > { %259 = sbr.rel (%p256_p8) target bundleno = 291 (0x123), region = 58  ;;  %p812_p10 = scmp.ne.s32.totalorder (!%p256_p8), %s1011_s17, 0 }
  0x18   : > { %s909_s7 = smul.u32 (!%p256_p8), 24, %s262_s5  ;;  %p307_p9 = scmp.lt.s32.totalorder (!%p256_p8), %s306_s6, 143 }
  0x1a   : > { %s1101_s12 = scalar_lea.vmem (!%p256_p8), [#allocation3], %s909_s7 }
  0x1c   : > { %s1168_s6 = smov (!%p307_p9, %s306_s6), 143  ;;  %334 = sbr.rel (%p812_p10) target bundleno = 35 (0x23), region = 66 }
  0x1d   : > { %s811_s8 = sshll.u32 %s1168_s6, 2 }
  0x1e   : > { %s1099_s11 = scalar_lea.vmem %s1157_s1, %s811_s8 }
  0x21   : > { %v1021_v4 = vmov 0.0  }
  0x22   : > { %335 = vst [vmem:[#allocation2] sm:$0xff] %v1021_v4  ;;  %336 = vst [vmem:[#allocation2 + $0x8] sm:$0xff] %v1021_v4 }
  0x23 PF: > { %v953_v5 = vld [vmem:[%s1099_s11 + $0x78] sm:$0xff]   ;;  %v1022_v6 = vmov 0.0   ;;  %vm1023_vm0 = vmmov 0   ;;  %v956_v9 = vld [vmem:[%s1099_s11 + $0x70] sm:$0xff]   ;;  %v959_v12 = vld [vmem:[%s1099_s11 + $0x68] sm:$0xff]   ;;  %p840_p11 = scmp.ne.s32.totalorder %s1011_s17, 2 }
  0x24   : > { %888 = vmatprep.subr.bf16.mxu1 %v1022_v6  ;;  %v954_v7 = vld [vmem:[%s1099_s11 + $0xb8] sm:$0xff]   ;;  %857 = vmatprep.subr.bf16.mxu0 %v953_v5  ;;  %v957_v10 = vld [vmem:[%s1099_s11 + $0xb0] sm:$0xff]   ;;  %v960_v13 = vld [vmem:[%s1099_s11 + $0xa8] sm:$0xff]  }
  0x25   : > { %v955_v8 = vld [vmem:[%s1099_s11 + $0x38] sm:$0xff]   ;;  %904 = vmatprep.mubr.msk.bf16.mxu1 %vm1023_vm0, %v1022_v6  ;;  %889 = vmatpush3.bf16.msra.mxu1 %v954_v7  ;;  %v958_v11 = vld [vmem:[%s1099_s11 + $0x30] sm:$0xff]   ;;  %v961_v14 = vld [vmem:[%s1099_s11 + $0x28] sm:$0xff]  }
  0x26   : > { %858 = vmatpush3.bf16.msra.mxu0 %v955_v8  ;;  %890 = vmatprep.subr.bf16.mxu1 %v1022_v6  ;;  %v962_v15 = vld [vmem:[%s1099_s11 + $0x60] sm:$0xff]   ;;  %v965_v18 = vld [vmem:[%s1099_s11 + $0x58] sm:$0xff]   ;;  %v968_v21 = vld [vmem:[%s1099_s11 + $0x50] sm:$0xff]  }
  0x27   : > { %859 = vmatprep.subr.bf16.mxu0 %v956_v9  ;;  %v963_v16 = vld [vmem:[%s1099_s11 + $0xa0] sm:$0xff]   ;;  %v966_v19 = vld [vmem:[%s1099_s11 + $0x98] sm:$0xff]   ;;  %v969_v22 = vld [vmem:[%s1099_s11 + $0x90] sm:$0xff]  }
  0x28   : > { %v964_v17 = vld [vmem:[%s1099_s11 + $0x20] sm:$0xff]   ;;  %v967_v20 = vld [vmem:[%s1099_s11 + $0x18] sm:$0xff]   ;;  %v970_v23 = vld [vmem:[%s1099_s11 + $0x10] sm:$0xff]  }
  0x29   : > { %891 = vmatpush3.bf16.msra.mxu1 %v957_v10  ;;  %v971_v24 = vld [vmem:[%s1099_s11 + $0x48] sm:$0xff]   ;;  %v974_v27 = vld [vmem:[%s1099_s11 + $0x40] sm:$0xff]  }
  0x2a   : > { %860 = vmatpush3.bf16.msra.mxu0 %v958_v11  ;;  %892 = vmatprep.subr.bf16.mxu1 %v1022_v6  ;;  %v972_v25 = vld [vmem:[%s1099_s11 + $0x88] sm:$0xff]   ;;  %v975_v29 = vld [vmem:[%s1099_s11 + $0x80] sm:$0xff]  }
  0x2b   : > { %861 = vmatprep.subr.bf16.mxu0 %v959_v12  ;;  %v973_v26 = vld [vmem:[%s1099_s11 + $0x8] sm:$0xff]   ;;  %v976_v30 = vld [vmem:[%s1099_s11] sm:$0xff]  }
  0x2c   : > { %v979_v28 = vld [vmem:[%s1101_s12 + $0x4] ss:$12 sps:$4 sm:$0xff]   ;;  %v980_v31 = vld [vmem:[%s1101_s12 + $0x8] ss:$12 sps:$4 sm:$0xff]   ;;  %v977_v32 = vld [vmem:[%s1101_s12] ss:$12 sps:$4 sm:$0xff]  }
  0x2d   : > { %893 = vmatpush3.bf16.msra.mxu1 %v960_v13  ;;  %583 = vmatprep.mubr.bf16.mxu0 %v979_v28  ;;  %v337_v39 = vld [vmem:[#allocation2] sm:$0xff]  ;;  %v338_v46 = vld [vmem:[#allocation2 + $0x8] sm:$0xff] }
  0x2e   : > { %862 = vmatpush3.bf16.msra.mxu0 %v961_v14  ;;  %894 = vmatprep.subr.bf16.mxu1 %v1022_v6 }
  0x2f   : > { %863 = vmatprep.subr.bf16.mxu0 %v962_v15 }
  0x31   : > { %895 = vmatpush3.bf16.msra.mxu1 %v963_v16 }
  0x32   : > { %864 = vmatpush3.bf16.msra.mxu0 %v964_v17  ;;  %896 = vmatprep.subr.bf16.mxu1 %v1022_v6 }
  0x33   : > { %865 = vmatprep.subr.bf16.mxu0 %v965_v18 }
  0x35   : > { %897 = vmatpush3.bf16.msra.mxu1 %v966_v19 }
  0x36   : > { %866 = vmatpush3.bf16.msra.mxu0 %v967_v20  ;;  %898 = vmatprep.subr.bf16.mxu1 %v1022_v6 }
  0x37   : > { %867 = vmatprep.subr.bf16.mxu0 %v968_v21 }
  0x39   : > { %899 = vmatpush3.bf16.msra.mxu1 %v969_v22 }
  0x3a   : > { %868 = vmatpush3.bf16.msra.mxu0 %v970_v23  ;;  %900 = vmatprep.subr.bf16.mxu1 %v1022_v6 }
  0x3b   : > { %869 = vmatprep.subr.bf16.mxu0 %v971_v24 }
  0x3d   : > { %901 = vmatpush3.bf16.msra.mxu1 %v972_v25 }
  0x3e   : > { %870 = vmatpush3.bf16.msra.mxu0 %v973_v26  ;;  %902 = vmatprep.subr.bf16.mxu1 %v1022_v6 }
  0x3f   : > { %871 = vmatprep.subr.bf16.mxu0 %v974_v27 }
  0x41   : > { %903 = vmatpush3.bf16.msra.mxu1 %v975_v29 }
  0x42   : > { %872 = vmatpush3.bf16.msra.mxu0 %v976_v30 }
  0x44   : > { %905 = vmatmul.mubr.bf16.vlgmr.msra.gmra.mxu1 %v980_v31 }
  0x45   : > { %584 = vmatmul.mubr.bf16.vlgmr.msra.gmra.mxu0 %v977_v32 }
 0x104   : > { %v626_v33 = vpop.f32.mrf.mxu1 }
 0x105   : > { %v873_v34 = vpop.f32.mrf.mxu0 }
 0x106   : > { %v906_v35 = vpop.f32.mrf.mxu1 }
 0x107   : > { %v874_v36 = vpop.f32.mrf.mxu0 }
 0x108   : > { %v875_v37 = vadd.f32 %v874_v36, %v873_v34  ;;  %v629_v38 = vpop.f32.mrf.mxu1 }
 0x109   : > { %v876_v40 = vpop.f32.mrf.mxu0 }
 0x10a   : > { %v627_v41 = vadd.f32 %v875_v37, %v626_v33  ;;  %v907_v42 = vpop.f32.mrf.mxu1 }
 0x10b   : > { %v877_v43 = vpop.f32.mrf.mxu0 }
 0x10c   : > { %v633_v44 = vadd.f32 %v627_v41, %v337_v39  ;;  %v878_v45 = vadd.f32 %v877_v43, %v876_v40 }
 0x10e   : > { %635 = vst [vmem:[#allocation2] sm:$0xff] %v633_v44  ;;  %v630_v47 = vadd.f32 %v878_v45, %v629_v38  ;;  %640 = sbr.rel (%p840_p11) target bundleno = 291 (0x123), region = 70 }
 0x110   : > { %v634_v48 = vadd.f32 %v630_v47, %v338_v46 }
 0x112   : > { %636 = vst [vmem:[#allocation2 + $0x8] sm:$0xff] %v634_v48 }
 0x113   : > { %v841_v51 = vld [vmem:[%s1158_s2] ss:$0 sm:$0xff] }
 0x114   : > { %v842_v54 = vld [vmem:[%s1159_s3] ss:$0 sm:$0xff] }
 0x115   : > { %v641_v49 = vld [vmem:[#allocation2] sm:$0xff] }
 0x116   : > { %v650_v52 = vmul.f32 %v841_v51, %v641_v49 }
 0x118   : > { %v659_v55 = vadd.f32 %v842_v54, %v650_v52 }
 0x119   : > { %v642_v50 = vld [vmem:[#allocation2 + $0x8] sm:$0xff] }
 0x11a   : > { %v651_v53 = vmul.f32 %v841_v51, %v642_v50  ;;  %v661_v57 = vmax.f32 %v659_v55, 0.0 }
 0x11c   : > { %v660_v56 = vadd.f32 %v842_v54, %v651_v53 }
 0x11e   : > { %v662_v58 = vmax.f32 %v660_v56, 0.0 }
 0x120   : > { %v855_v59 = vpack.c.bf16 %v662_v58, %v661_v57 }
 0x122   : > { %856 = vst [vmem:[%s1160_s4] sm:$0xff] %v855_v59  }
 0x123 PF: > { %s14_s19 = sadd.s32 1, %s1019_s19   ;;  %s1161_s15 = smov %s1007_s16 }
 0x124   : > { %p11_p12 = scmp.ge.s32.totalorder %s14_s19, 5   ;;  %s1162_s16 = smov %s1084_s23 }
 0x125   : > { %s1163_s17 = smov %s1015_s18  ;;  %s1164_s18 = smov %s1166_s20 }
 0x126   :  { %13 = sbr.rel (!%p11_p12) target bundleno = 3 (0x3), region = 120 }

// kernel: _lambda_.47
= control target key start
LH: loop header
LB: loop body
LE: loop exit
PB: predicated region body
PF: predicated region fallthrough
CT: control target
= control target key end

     0   :  { %v255_v0 = vmov 0.0   ;;  %vm256_vm0 = vmmov 0   ;;  %s326_s1 = inlined_call_operand.vmem [shape: bf16[128,128], index: 1, kind: input, shape index: {}]   ;;  %s327_s0 = inlined_call_operand.vmem [shape: bf16[16,128], index: 0, kind: input, shape index: {}]   ;;  %s328_s2 = inlined_call_operand.vmem [shape: f32[1,128], index: 2, kind: input, shape index: {}]   ;;  %s329_s3 = inlined_call_operand.vmem [shape: f32[1,128], index: 3, kind: input, shape index: {}]   ;;  %s330_s4 = inlined_call_operand.vmem [shape: bf16[16,128], index: 4, kind: input, shape index: {}]   ;;  %s331_s5 = inlined_call_operand.vmem [shape: bf16[16,128], index: 5, kind: output, shape index: {}]  }
   0x1   :  { %224 = vmatprep.subr.bf16.mxu0 %v255_v0  ;;  %v246_v1 = vld [vmem:[%s326_s1 + $0x38] sm:$0xff]   ;;  %240 = vmatprep.mubr.msk.bf16.mxu0 %vm256_vm0, %v255_v0  ;;  %v247_v2 = vld [vmem:[%s326_s1 + $0x30] sm:$0xff]   ;;  %v248_v3 = vld [vmem:[%s326_s1 + $0x28] sm:$0xff]  }
   0x2   :  { %225 = vmatpush3.bf16.msra.mxu0 %v246_v1  ;;  %v249_v4 = vld [vmem:[%s326_s1 + $0x20] sm:$0xff]   ;;  %v250_v5 = vld [vmem:[%s326_s1 + $0x18] sm:$0xff]   ;;  %v251_v6 = vld [vmem:[%s326_s1 + $0x10] sm:$0xff]  }
   0x3   :  { %226 = vmatprep.subr.bf16.mxu0 %v255_v0  ;;  %v252_v7 = vld [vmem:[%s326_s1 + $0x8] sm:$0xff]   ;;  %v253_v8 = vld [vmem:[%s326_s1] sm:$0xff]  }
   0x4   :  { %v254_v9 = vld [vmem:[%s327_s0] sm:$0xff]  }
   0x5   :  { %v200_v10 = vld [vmem:[%s328_s2] ss:$0 sm:$0xff] }
   0x6   :  { %227 = vmatpush3.bf16.msra.mxu0 %v247_v2  ;;  %v201_v12 = vld [vmem:[%s329_s3] ss:$0 sm:$0xff] }
   0x7   :  { %228 = vmatprep.subr.bf16.mxu0 %v255_v0  ;;  %v207_v13 = vld [vmem:[%s330_s4] sm:$0xff]  }
   0x8   :  { %v208_v17 = vunpack.c.l.bf16 %v207_v13  ;;  %v209_v20 = vunpack.c.h.bf16 %v207_v13 }
   0xa   :  { %229 = vmatpush3.bf16.msra.mxu0 %v248_v3 }
   0xb   :  { %230 = vmatprep.subr.bf16.mxu0 %v255_v0 }
   0xe   :  { %231 = vmatpush3.bf16.msra.mxu0 %v249_v4 }
   0xf   :  { %232 = vmatprep.subr.bf16.mxu0 %v255_v0 }
  0x12   :  { %233 = vmatpush3.bf16.msra.mxu0 %v250_v5 }
  0x13   :  { %234 = vmatprep.subr.bf16.mxu0 %v255_v0 }
  0x16   :  { %235 = vmatpush3.bf16.msra.mxu0 %v251_v6 }
  0x17   :  { %236 = vmatprep.subr.bf16.mxu0 %v255_v0 }
  0x1a   :  { %237 = vmatpush3.bf16.msra.mxu0 %v252_v7 }
  0x1b   :  { %238 = vmatprep.subr.bf16.mxu0 %v255_v0 }
  0x1e   :  { %239 = vmatpush3.bf16.msra.mxu0 %v253_v8 }
  0x21   :  { %241 = vmatmul.mubr.bf16.vlgmr.msra.gmra.mxu0 %v254_v9 }
  0xe1   :  { %v135_v11 = vpop.f32.mrf.mxu0 }
  0xe2   :  { %v158_v14 = vmul.f32 %v200_v10, %v135_v11 }
  0xe3   :  { %v242_v15 = vpop.f32.mrf.mxu0 }
  0xe4   :  { %v167_v16 = vadd.f32 %v201_v12, %v158_v14 }
  0xe5   :  { %v138_v18 = vpop.f32.mrf.mxu0 }
  0xe6   :  { %v159_v19 = vmul.f32 %v200_v10, %v138_v18  ;;  %v173_v22 = vadd.f32 %v208_v17, %v167_v16 }
  0xe7   :  { %v243_v21 = vpop.f32.mrf.mxu0 }
  0xe8   :  { %v168_v23 = vadd.f32 %v201_v12, %v159_v19  ;;  %v175_v25 = vmax.f32 %v173_v22, 0.0 }
  0xea   :  { %v174_v24 = vadd.f32 %v209_v20, %v168_v23 }
  0xec   :  { %v176_v26 = vmax.f32 %v174_v24, 0.0 }
  0xee   :  { %v213_v27 = vpack.c.bf16 %v176_v26, %v175_v25 }
  0xf0   :  { %214 = vst [vmem:[%s331_s5] sm:$0xff] %v213_v27  }

// kernel: _lambda_.48
= control target key start
LH: loop header
LB: loop body
LE: loop exit
PB: predicated region body
PF: predicated region fallthrough
CT: control target
= control target key end

     0   :  { %v242_v0 = vmov 0.0   ;;  %vm243_vm0 = vmmov 0   ;;  %s305_s1 = inlined_call_operand.vmem [shape: bf16[128,128], index: 1, kind: input, shape index: {}]   ;;  %s306_s0 = inlined_call_operand.vmem [shape: bf16[16,128], index: 0, kind: input, shape index: {}]   ;;  %s307_s2 = inlined_call_operand.vmem [shape: f32[1,128], index: 2, kind: input, shape index: {}]   ;;  %s308_s3 = inlined_call_operand.vmem [shape: f32[1,128], index: 3, kind: input, shape index: {}]   ;;  %s309_s4 = inlined_call_operand.vmem [shape: bf16[16,128], index: 4, kind: output, shape index: {}]  }
   0x1   :  { %211 = vmatprep.subr.bf16.mxu0 %v242_v0  ;;  %v233_v1 = vld [vmem:[%s305_s1 + $0x38] sm:$0xff]   ;;  %227 = vmatprep.mubr.msk.bf16.mxu0 %vm243_vm0, %v242_v0  ;;  %v234_v2 = vld [vmem:[%s305_s1 + $0x30] sm:$0xff]   ;;  %v235_v3 = vld [vmem:[%s305_s1 + $0x28] sm:$0xff]  }
   0x2   :  { %212 = vmatpush3.bf16.msra.mxu0 %v233_v1  ;;  %v236_v4 = vld [vmem:[%s305_s1 + $0x20] sm:$0xff]   ;;  %v237_v5 = vld [vmem:[%s305_s1 + $0x18] sm:$0xff]   ;;  %v238_v6 = vld [vmem:[%s305_s1 + $0x10] sm:$0xff]  }
   0x3   :  { %213 = vmatprep.subr.bf16.mxu0 %v242_v0  ;;  %v239_v7 = vld [vmem:[%s305_s1 + $0x8] sm:$0xff]   ;;  %v240_v8 = vld [vmem:[%s305_s1] sm:$0xff]  }
   0x4   :  { %v241_v9 = vld [vmem:[%s306_s0] sm:$0xff]  }
   0x5   :  { %v191_v10 = vld [vmem:[%s307_s2] ss:$0 sm:$0xff] }
   0x6   :  { %214 = vmatpush3.bf16.msra.mxu0 %v234_v2  ;;  %v192_v13 = vld [vmem:[%s308_s3] ss:$0 sm:$0xff] }
   0x7   :  { %215 = vmatprep.subr.bf16.mxu0 %v242_v0 }
   0xa   :  { %216 = vmatpush3.bf16.msra.mxu0 %v235_v3 }
   0xb   :  { %217 = vmatprep.subr.bf16.mxu0 %v242_v0 }
   0xe   :  { %218 = vmatpush3.bf16.msra.mxu0 %v236_v4 }
   0xf   :  { %219 = vmatprep.subr.bf16.mxu0 %v242_v0 }
  0x12   :  { %220 = vmatpush3.bf16.msra.mxu0 %v237_v5 }
  0x13   :  { %221 = vmatprep.subr.bf16.mxu0 %v242_v0 }
  0x16   :  { %222 = vmatpush3.bf16.msra.mxu0 %v238_v6 }
  0x17   :  { %223 = vmatprep.subr.bf16.mxu0 %v242_v0 }
  0x1a   :  { %224 = vmatpush3.bf16.msra.mxu0 %v239_v7 }
  0x1b   :  { %225 = vmatprep.subr.bf16.mxu0 %v242_v0 }
  0x1e   :  { %226 = vmatpush3.bf16.msra.mxu0 %v240_v8 }
  0x21   :  { %228 = vmatmul.mubr.bf16.vlgmr.msra.gmra.mxu0 %v241_v9 }
  0xe1   :  { %v132_v11 = vpop.f32.mrf.mxu0 }
  0xe2   :  { %v155_v12 = vmul.f32 %v191_v10, %v132_v11 }
  0xe3   :  { %v229_v14 = vpop.f32.mrf.mxu0 }
  0xe4   :  { %v164_v16 = vadd.f32 %v192_v13, %v155_v12 }
  0xe5   :  { %v135_v15 = vpop.f32.mrf.mxu0 }
  0xe6   :  { %v156_v17 = vmul.f32 %v191_v10, %v135_v15  ;;  %v166_v20 = vmax.f32 %v164_v16, 0.0 }
  0xe7   :  { %v230_v18 = vpop.f32.mrf.mxu0 }
  0xe8   :  { %v165_v19 = vadd.f32 %v192_v13, %v156_v17 }
  0xea   :  { %v167_v21 = vmax.f32 %v165_v19, 0.0 }
  0xec   :  { %v200_v22 = vpack.c.bf16 %v167_v21, %v166_v20 }
  0xee   :  { %201 = vst [vmem:[%s309_s4] sm:$0xff] %v200_v22  }

</bundles_post_ra>
